<compile_context>
chip_gen: v7x
topology: tpu7x:2x2x1
jax: 0.10.0
libtpu: 0.0.40
codegen_flags: <defaults>
</compile_context>

<pallas_src>
import functools

import jax
import jax.numpy as jnp
from jax.experimental import pallas as pl
from jax.experimental.pallas import tpu as pltpu

BN_EPS = 1e-5
_LANES = 128


def _round_up(x, m):
    return (x + m - 1) // m * m


def _vmem_cap_bytes():
    """Generation-aware VMEM cap: physical capacity minus ~20% headroom."""
    try:
        cap = int(pltpu.get_tpu_info().vmem_capacity_bytes)
    except Exception:
        cap = 64 << 20  # v7x-safe fallback
    return max(16 << 20, int(cap * 0.8))


def _band_rows(oh, ow, target_tm=128):
    """Largest divisor of OH whose band (rows * OW) stays <= target_tm rows."""
    best = 1
    for d in range(1, oh + 1):
        if oh % d == 0 and d * ow <= target_tm:
            best = d
    return best


def _row_tile(total, target=2048, mult=16):
    """Row tile for the BN-apply pass: multiple of 16 dividing `total`."""
    if total <= target:
        return total
    t = (target // mult) * mult
    while t >= mult:
        if total % t == 0:
            return t
        t -= mult
    return total


# ---------------------------------------------------------------------------
# Pass 1: conv via K-packed patch slab (bf16 MXU, f32 acc) + incremental BN stats
# ---------------------------------------------------------------------------
def _conv_stats_kernel(xp_ref, w_ref, y_ref, stats_ref, patch_ref, *,
                       kh, kw, stride, toh, ow, n_bands, c):
    """One image per grid step; internal loop over output-row bands.

    xp_ref:    (1, HP, WP, C)      bf16  spatially padded NHWC activations
    w_ref:     (kh*kw*C, OCp)      bf16  K-packed weights (OC zero-padded)
    y_ref:     (1, OH*OW, OCp)     bf16  conv output (lane-dense)
    stats_ref: (1, 2, OCp)         f32   per-image [sum; sum_sq] over rows
    patch_ref: (toh, OW, kh*kw*C)  bf16  VMEM scratch patch slab
    """
    kp = kh * kw * c
    tm = toh * ow
    ocp = y_ref.shape[-1]

    def band_body(band, carry):
        s0, s1 = carry
        r0 = pl.multiple_of(band * toh, toh)          # first output row of band
        # Build the (toh, OW, kh*kw*C) patch slab for this band (tap-unrolled).
        for i in range(kh):
            for j in range(kw):
                off = (i * kw + j) * c
                if stride == 1:
                    slab = xp_ref[0, pl.ds(r0 + i, toh), j:j + ow, :]
                else:
                    # TODO(synk): stride > 1 strided ref windows — untested path.
                    slab = xp_ref[0,
                                  pl.ds(r0 * stride + i, toh, stride),
                                  pl.ds(j, ow, stride), :]
                patch_ref[:, :, off:off + c] = slab
        patch = patch_ref[...].reshape(tm, kp)        # (tile_M, kh*kw*C) bf16
        acc = jnp.dot(patch, w_ref[...],
                      preferred_element_type=jnp.float32)   # (tile_M, OCp) f32
        m0 = pl.multiple_of(band * tm, tm)
        y_ref[0, pl.ds(m0, tm), :] = acc.astype(y_ref.dtype)
        s0 = s0 + jnp.sum(acc, axis=0, keepdims=True)
        s1 = s1 + jnp.sum(acc * acc, axis=0, keepdims=True)
        return s0, s1

    init = (jnp.zeros((1, ocp), jnp.float32),
            jnp.zeros((1, ocp), jnp.float32))
    s0, s1 = jax.lax.fori_loop(0, n_bands, band_body, init,
                               unroll=n_bands <= 4)
    stats_ref[0] = jnp.concatenate([s0, s1], axis=0)


# ---------------------------------------------------------------------------
# Pass 2: BN apply — per-channel scale/shift already folded; one FMA / element
# ---------------------------------------------------------------------------
def _bn_apply_kernel(y_ref, scale_ref, shift_ref, o_ref):
    o_ref[...] = (y_ref[...].astype(jnp.float32) * scale_ref[...]
                  + shift_ref[...])


# ---------------------------------------------------------------------------
# Wrapper
# ---------------------------------------------------------------------------
@functools.partial(jax.jit, static_argnames=("stride", "padding"))
def dense_conv2d_bn(x, weight, gamma, beta, *, stride=1, padding=0):
    """Forward of DenseConv2dBN (Conv2d bias=False, groups=1 + training BN).

    x:      (N, C, H, W)    float32, NCHW like PyTorch
    weight: (OC, C, KH, KW) float32
    gamma, beta: (OC,)      float32
    returns (N, OC, OH, OW) float32
    """
    n, c, h, w = x.shape
    oc, wc, kh, kw = weight.shape
    if wc != c:
        raise NotImplementedError("groups > 1 is not supported")
    oh = (h + 2 * padding - kh) // stride + 1
    ow = (w + 2 * padding - kw) // stride + 1
    assert oh > 0 and ow > 0
    ocp = max(_LANES, _round_up(oc, _LANES))
    kp = kh * kw * c
    m_img = oh * ow
    hp, wp = h + 2 * padding, w + 2 * padding

    toh = _band_rows(oh, ow)                # output rows per in-kernel band
    tm = toh * ow
    n_bands = oh // toh

    # NHWC internally + spatial zero-padding; bf16 MXU operands.
    xp = jnp.pad(x.transpose(0, 2, 3, 1),
                 ((0, 0), (padding, padding), (padding, padding), (0, 0)))
    xp = xp.astype(jnp.bfloat16)

    # K-packed weights: (kh*kw*C, OCp), zero-padded OC -> lane-dense.
    w_pack = weight.transpose(2, 3, 1, 0).reshape(kp, oc)
    w_pack = jnp.pad(w_pack, ((0, 0), (0, ocp - oc))).astype(jnp.bfloat16)

    cap = _vmem_cap_bytes()
    xp_bytes = hp * wp * c * 2
    y_bytes = m_img * ocp * 2               # bf16 intermediate
    w_bytes = kp * ocp * 2
    stats_bytes = 2 * ocp * 4
    patch_bytes = tm * max(kp, _LANES) * 2
    need1 = (2 * (xp_bytes + y_bytes + w_bytes + stats_bytes)
             + patch_bytes + (4 << 20))
    vmem1 = int(min(max(need1, 32 << 20), cap))

    conv_cost = pl.CostEstimate(
        flops=2 * n * m_img * kp * ocp,
        transcendentals=0,
        bytes_accessed=n * (xp_bytes + y_bytes + stats_bytes) + w_bytes)

    kernel1 = functools.partial(_conv_stats_kernel, kh=kh, kw=kw,
                                stride=stride, toh=toh, ow=ow,
                                n_bands=n_bands, c=c)

    y, stats = pl.pallas_call(
        kernel1,
        out_shape=(jax.ShapeDtypeStruct((n, m_img, ocp), jnp.bfloat16),
                   jax.ShapeDtypeStruct((n, 2, ocp), jnp.float32)),
        grid_spec=pltpu.PrefetchScalarGridSpec(
            num_scalar_prefetch=0,
            grid=(n,),
            in_specs=[
                pl.BlockSpec((1, hp, wp, c), lambda b: (b, 0, 0, 0)),
                pl.BlockSpec((kp, ocp), lambda b: (0, 0)),
            ],
            out_specs=[
                pl.BlockSpec((1, m_img, ocp), lambda b: (b, 0, 0)),
                pl.BlockSpec((1, 2, ocp), lambda b: (b, 0, 0)),
            ],
            scratch_shapes=[pltpu.VMEM((toh, ow, kp), jnp.bfloat16)]),
        compiler_params=pltpu.CompilerParams(
            dimension_semantics=("parallel",),
            vmem_limit_bytes=vmem1),
        cost_estimate=conv_cost,
    )(xp, w_pack)

    # Tiny per-channel reduction + BN scale/shift folding (negligible JAX glue).
    cnt = jnp.float32(n * m_img)                 # exact count, no padded rows
    total = jnp.sum(stats[:, 0, :], axis=0)      # (OCp,)
    total_sq = jnp.sum(stats[:, 1, :], axis=0)
    mean = total / cnt
    # TODO(synk): E[x^2] - mean^2 in f32 can cancel for very large / strongly
    # biased activations; switch to a shifted two-level accumulation if needed.
    var = jnp.maximum(total_sq / cnt - mean * mean, 0.0)   # biased batch var
    inv = jax.lax.rsqrt(var + BN_EPS)
    gamma_p = jnp.pad(gamma.astype(jnp.float32), (0, ocp - oc))
    beta_p = jnp.pad(beta.astype(jnp.float32), (0, ocp - oc))
    scale = (gamma_p * inv).reshape(1, ocp)                 # padded chans -> 0
    shift = (beta_p - mean * gamma_p * inv).reshape(1, ocp)

    total_rows = n * m_img
    tr = _row_tile(total_rows)
    y_flat = y.reshape(total_rows, ocp)

    need2 = 2 * (tr * ocp * 2 + tr * ocp * 4 + 2 * ocp * 4) + (4 << 20)
    vmem2 = int(min(max(need2, 32 << 20), cap))

    apply_cost = pl.CostEstimate(
        flops=2 * total_rows * ocp,
        transcendentals=0,
        bytes_accessed=total_rows * ocp * (2 + 4) + 2 * 2 * ocp * 4)

    y_bn = pl.pallas_call(
        _bn_apply_kernel,
        out_shape=jax.ShapeDtypeStruct((total_rows, ocp), jnp.float32),
        grid_spec=pltpu.PrefetchScalarGridSpec(
            num_scalar_prefetch=0,
            grid=(total_rows // tr,),
            in_specs=[
                pl.BlockSpec((tr, ocp), lambda r: (r, 0)),
                pl.BlockSpec((1, ocp), lambda r: (0, 0)),
                pl.BlockSpec((1, ocp), lambda r: (0, 0)),
            ],
            out_specs=pl.BlockSpec((tr, ocp), lambda r: (r, 0))),
        compiler_params=pltpu.CompilerParams(
            dimension_semantics=("parallel",),
            vmem_limit_bytes=vmem2),
        cost_estimate=apply_cost,
    )(y_flat, scale, shift)

    # Back to NCHW only at the model boundary; padded channels sliced off.
    return y_bn.reshape(n, oh, ow, ocp)[..., :oc].transpose(0, 3, 1, 2)


# ---------------------------------------------------------------------------
# Reference (plain JAX, f32) for a sanity check
# ---------------------------------------------------------------------------
def _reference(x, weight, gamma, beta, stride, padding):
    y = jax.lax.conv_general_dilated(
        x, weight, window_strides=(stride, stride),
        padding=[(padding, padding), (padding, padding)],
        dimension_numbers=("NCHW", "OIHW", "NCHW"))
    mean = jnp.mean(y, axis=(0, 2, 3), keepdims=True)
    var = jnp.mean((y - mean) ** 2, axis=(0, 2, 3), keepdims=True)
    yhat = (y - mean) * jax.lax.rsqrt(var + BN_EPS)
    return yhat * gamma.reshape(1, -1, 1, 1) + beta.reshape(1, -1, 1, 1)


if __name__ == "__main__":
    # DenseConv2dBN(in_channels=4, out_channels=8, kernel_size=3, stride=1,
    #               padding=1, bias=False)
    N, C, H, W = 2, 4, 16, 16
    OC, KH, KW = 8, 3, 3
    stride, padding = 1, 1

    key = jax.random.PRNGKey(0)
    kx, kw_ = jax.random.split(key)
    x = jax.random.normal(kx, (N, C, H, W), dtype=jnp.float32)
    fan_in = C * KH * KW
    weight = jax.random.normal(kw_, (OC, C, KH, KW), dtype=jnp.float32) / jnp.sqrt(fan_in)
    gamma = jnp.ones((OC,), jnp.float32)
    beta = jnp.zeros((OC,), jnp.float32)

    out = dense_conv2d_bn(x, weight, gamma, beta, stride=stride, padding=padding)
    out = jax.block_until_ready(out)

    ref = _reference(x, weight, gamma, beta, stride, padding)
    assert out.shape == (N, OC, H, W), out.shape
    # bf16 MXU operands + bf16 intermediate y (f32 accumulation / stats / BN
    # math) vs a pure f32 reference -> bf16-level tolerance.
    max_err = float(jnp.max(jnp.abs(out - ref)))
    assert max_err < 5e-2, max_err
    print("KERNEL_OK")
</pallas_src>

<mosaic_0001>
module attributes {stable_mosaic.version = 11 : i64} {
  func.func @_conv_stats_kernel(%arg0: i32, %arg1: memref<1x18x18x4xbf16, #tpu.memory_space<vmem>>, %arg2: memref<36x128xbf16, #tpu.memory_space<vmem>>, %arg3: memref<1x256x128xbf16, #tpu.memory_space<vmem>>, %arg4: memref<1x2x128xf32, #tpu.memory_space<vmem>>, %arg5: memref<8x16x36xbf16, #tpu.memory_space<vmem>>) attributes {dimension_semantics = [#tpu.dimension_semantics<parallel>], iteration_bounds = array<i64: 2>, scalar_prefetch = 0 : i64, scratch_operands = 1 : i64, tpu.core_type = #tpu.core_type<tc>, window_params = [{transform_indices = @transform_0, window_bounds = array<i64: 1, 18, 18, 4>}, {pipeline_mode = #tpu.pipeline_mode<synchronous>, transform_indices = @transform_1, window_bounds = array<i64: 36, 128>}, {transform_indices = @transform_2, window_bounds = array<i64: 1, 256, 128>}, {transform_indices = @transform_3, window_bounds = array<i64: 1, 2, 128>}]} {
    %cst = arith.constant 0.000000e+00 : f32
    %0 = vector.broadcast %cst : f32 to vector<1x128xf32>
    %cst_0 = arith.constant 0.000000e+00 : f32
    %1 = vector.broadcast %cst_0 : f32 to vector<1x128xf32>
    %c0_i32 = arith.constant 0 : i32
    %c8_i32 = arith.constant 8 : i32
    %2 = arith.muli %c0_i32, %c8_i32 : i32
    %3 = tpu.assume_multiple %2, 8 : i32
    %c0_i32_1 = arith.constant 0 : i32
    %4 = arith.addi %3, %c0_i32_1 : i32
    %c0 = arith.constant 0 : index
    %5 = arith.index_cast %4 : i32 to index
    %c0_2 = arith.constant 0 : index
    %c0_3 = arith.constant 0 : index
    %6 = vector.load %arg1[%c0, %5, %c0_2, %c0_3] : memref<1x18x18x4xbf16, #tpu.memory_space<vmem>>, vector<1x8x16x4xbf16>
    %7 = vector.shape_cast %6 : vector<1x8x16x4xbf16> to vector<8x16x4xbf16>
    %c0_4 = arith.constant 0 : index
    %c0_5 = arith.constant 0 : index
    %c0_6 = arith.constant 0 : index
    %8 = vector.load %arg5[%c0_4, %c0_5, %c0_6] : memref<8x16x36xbf16, #tpu.memory_space<vmem>>, vector<8x16x4xbf16>
    tpu.vector_store %arg5[%c0_4, %c0_5, %c0_6], %7 {strides = array<i32>} : memref<8x16x36xbf16, #tpu.memory_space<vmem>>, vector<8x16x4xbf16>,
    %c0_i32_7 = arith.constant 0 : i32
    %9 = arith.addi %3, %c0_i32_7 : i32
    %c0_8 = arith.constant 0 : index
    %10 = arith.index_cast %9 : i32 to index
    %c1 = arith.constant 1 : index
    %c0_9 = arith.constant 0 : index
    %11 = vector.load %arg1[%c0_8, %10, %c1, %c0_9] : memref<1x18x18x4xbf16, #tpu.memory_space<vmem>>, vector<1x8x16x4xbf16>
    %12 = vector.shape_cast %11 : vector<1x8x16x4xbf16> to vector<8x16x4xbf16>
    %c0_10 = arith.constant 0 : index
    %c0_11 = arith.constant 0 : index
    %c4 = arith.constant 4 : index
    %13 = vector.load %arg5[%c0_10, %c0_11, %c4] : memref<8x16x36xbf16, #tpu.memory_space<vmem>>, vector<8x16x4xbf16>
    tpu.vector_store %arg5[%c0_10, %c0_11, %c4], %12 {strides = array<i32>} : memref<8x16x36xbf16, #tpu.memory_space<vmem>>, vector<8x16x4xbf16>,
    %c0_i32_12 = arith.constant 0 : i32
    %14 = arith.addi %3, %c0_i32_12 : i32
    %c0_13 = arith.constant 0 : index
    %15 = arith.index_cast %14 : i32 to index
    %c2 = arith.constant 2 : index
    %c0_14 = arith.constant 0 : index
    %16 = vector.load %arg1[%c0_13, %15, %c2, %c0_14] : memref<1x18x18x4xbf16, #tpu.memory_space<vmem>>, vector<1x8x16x4xbf16>
    %17 = vector.shape_cast %16 : vector<1x8x16x4xbf16> to vector<8x16x4xbf16>
    %c0_15 = arith.constant 0 : index
    %c0_16 = arith.constant 0 : index
    %c8 = arith.constant 8 : index
    %18 = vector.load %arg5[%c0_15, %c0_16, %c8] : memref<8x16x36xbf16, #tpu.memory_space<vmem>>, vector<8x16x4xbf16>
    tpu.vector_store %arg5[%c0_15, %c0_16, %c8], %17 {strides = array<i32>} : memref<8x16x36xbf16, #tpu.memory_space<vmem>>, vector<8x16x4xbf16>,
    %c1_i32 = arith.constant 1 : i32
    %19 = arith.addi %3, %c1_i32 : i32
    %c0_17 = arith.constant 0 : index
    %20 = arith.index_cast %19 : i32 to index
    %c0_18 = arith.constant 0 : index
    %c0_19 = arith.constant 0 : index
    %21 = vector.load %arg1[%c0_17, %20, %c0_18, %c0_19] : memref<1x18x18x4xbf16, #tpu.memory_space<vmem>>, vector<1x8x16x4xbf16>
    %22 = vector.shape_cast %21 : vector<1x8x16x4xbf16> to vector<8x16x4xbf16>
    %c0_20 = arith.constant 0 : index
    %c0_21 = arith.constant 0 : index
    %c12 = arith.constant 12 : index
    %23 = vector.load %arg5[%c0_20, %c0_21, %c12] : memref<8x16x36xbf16, #tpu.memory_space<vmem>>, vector<8x16x4xbf16>
    tpu.vector_store %arg5[%c0_20, %c0_21, %c12], %22 {strides = array<i32>} : memref<8x16x36xbf16, #tpu.memory_space<vmem>>, vector<8x16x4xbf16>,
    %c1_i32_22 = arith.constant 1 : i32
    %24 = arith.addi %3, %c1_i32_22 : i32
    %c0_23 = arith.constant 0 : index
    %25 = arith.index_cast %24 : i32 to index
    %c1_24 = arith.constant 1 : index
    %c0_25 = arith.constant 0 : index
    %26 = vector.load %arg1[%c0_23, %25, %c1_24, %c0_25] : memref<1x18x18x4xbf16, #tpu.memory_space<vmem>>, vector<1x8x16x4xbf16>
    %27 = vector.shape_cast %26 : vector<1x8x16x4xbf16> to vector<8x16x4xbf16>
    %c0_26 = arith.constant 0 : index
    %c0_27 = arith.constant 0 : index
    %c16 = arith.constant 16 : index
    %28 = vector.load %arg5[%c0_26, %c0_27, %c16] : memref<8x16x36xbf16, #tpu.memory_space<vmem>>, vector<8x16x4xbf16>
    tpu.vector_store %arg5[%c0_26, %c0_27, %c16], %27 {strides = array<i32>} : memref<8x16x36xbf16, #tpu.memory_space<vmem>>, vector<8x16x4xbf16>,
    %c1_i32_28 = arith.constant 1 : i32
    %29 = arith.addi %3, %c1_i32_28 : i32
    %c0_29 = arith.constant 0 : index
    %30 = arith.index_cast %29 : i32 to index
    %c2_30 = arith.constant 2 : index
    %c0_31 = arith.constant 0 : index
    %31 = vector.load %arg1[%c0_29, %30, %c2_30, %c0_31] : memref<1x18x18x4xbf16, #tpu.memory_space<vmem>>, vector<1x8x16x4xbf16>
    %32 = vector.shape_cast %31 : vector<1x8x16x4xbf16> to vector<8x16x4xbf16>
    %c0_32 = arith.constant 0 : index
    %c0_33 = arith.constant 0 : index
    %c20 = arith.constant 20 : index
    %33 = vector.load %arg5[%c0_32, %c0_33, %c20] : memref<8x16x36xbf16, #tpu.memory_space<vmem>>, vector<8x16x4xbf16>
    tpu.vector_store %arg5[%c0_32, %c0_33, %c20], %32 {strides = array<i32>} : memref<8x16x36xbf16, #tpu.memory_space<vmem>>, vector<8x16x4xbf16>,
    %c2_i32 = arith.constant 2 : i32
    %34 = arith.addi %3, %c2_i32 : i32
    %c0_34 = arith.constant 0 : index
    %35 = arith.index_cast %34 : i32 to index
    %c0_35 = arith.constant 0 : index
    %c0_36 = arith.constant 0 : index
    %36 = vector.load %arg1[%c0_34, %35, %c0_35, %c0_36] : memref<1x18x18x4xbf16, #tpu.memory_space<vmem>>, vector<1x8x16x4xbf16>
    %37 = vector.shape_cast %36 : vector<1x8x16x4xbf16> to vector<8x16x4xbf16>
    %c0_37 = arith.constant 0 : index
    %c0_38 = arith.constant 0 : index
    %c24 = arith.constant 24 : index
    %38 = vector.load %arg5[%c0_37, %c0_38, %c24] : memref<8x16x36xbf16, #tpu.memory_space<vmem>>, vector<8x16x4xbf16>
    tpu.vector_store %arg5[%c0_37, %c0_38, %c24], %37 {strides = array<i32>} : memref<8x16x36xbf16, #tpu.memory_space<vmem>>, vector<8x16x4xbf16>,
    %c2_i32_39 = arith.constant 2 : i32
    %39 = arith.addi %3, %c2_i32_39 : i32
    %c0_40 = arith.constant 0 : index
    %40 = arith.index_cast %39 : i32 to index
    %c1_41 = arith.constant 1 : index
    %c0_42 = arith.constant 0 : index
    %41 = vector.load %arg1[%c0_40, %40, %c1_41, %c0_42] : memref<1x18x18x4xbf16, #tpu.memory_space<vmem>>, vector<1x8x16x4xbf16>
    %42 = vector.shape_cast %41 : vector<1x8x16x4xbf16> to vector<8x16x4xbf16>
    %c0_43 = arith.constant 0 : index
    %c0_44 = arith.constant 0 : index
    %c28 = arith.constant 28 : index
    %43 = vector.load %arg5[%c0_43, %c0_44, %c28] : memref<8x16x36xbf16, #tpu.memory_space<vmem>>, vector<8x16x4xbf16>
    tpu.vector_store %arg5[%c0_43, %c0_44, %c28], %42 {strides = array<i32>} : memref<8x16x36xbf16, #tpu.memory_space<vmem>>, vector<8x16x4xbf16>,
    %c2_i32_45 = arith.constant 2 : i32
    %44 = arith.addi %3, %c2_i32_45 : i32
    %c0_46 = arith.constant 0 : index
    %45 = arith.index_cast %44 : i32 to index
    %c2_47 = arith.constant 2 : index
    %c0_48 = arith.constant 0 : index
    %46 = vector.load %arg1[%c0_46, %45, %c2_47, %c0_48] : memref<1x18x18x4xbf16, #tpu.memory_space<vmem>>, vector<1x8x16x4xbf16>
    %47 = vector.shape_cast %46 : vector<1x8x16x4xbf16> to vector<8x16x4xbf16>
    %c0_49 = arith.constant 0 : index
    %c0_50 = arith.constant 0 : index
    %c32 = arith.constant 32 : index
    %48 = vector.load %arg5[%c0_49, %c0_50, %c32] : memref<8x16x36xbf16, #tpu.memory_space<vmem>>, vector<8x16x4xbf16>
    tpu.vector_store %arg5[%c0_49, %c0_50, %c32], %47 {strides = array<i32>} : memref<8x16x36xbf16, #tpu.memory_space<vmem>>, vector<8x16x4xbf16>,
    %c0_51 = arith.constant 0 : index
    %c0_52 = arith.constant 0 : index
    %c0_53 = arith.constant 0 : index
    %49 = vector.load %arg5[%c0_51, %c0_52, %c0_53] : memref<8x16x36xbf16, #tpu.memory_space<vmem>>, vector<8x16x36xbf16>
    %50 = vector.shape_cast %49 : vector<8x16x36xbf16> to vector<128x36xbf16>
    %c0_54 = arith.constant 0 : index
    %c0_55 = arith.constant 0 : index
    %51 = vector.load %arg2[%c0_54, %c0_55] : memref<36x128xbf16, #tpu.memory_space<vmem>>, vector<36x128xbf16>
    %cst_56 = arith.constant dense<0.000000e+00> : vector<128x128xf32>
    %52 = tpu.matmul %50, %51, %cst_56 {dimension_numbers = #tpu.dot_dimension_numbers<[1], [0], [0], [1], [0, 0, 1, 1], [], []>} : vector<128x36xbf16>, vector<36x128xbf16>, vector<128x128xf32> -> vector<128x128xf32>
    %c128_i32 = arith.constant 128 : i32
    %53 = arith.muli %c0_i32, %c128_i32 : i32
    %54 = tpu.assume_multiple %53, 128 : i32
    %55 = arith.truncf %52 : vector<128x128xf32> to vector<128x128xbf16>
    %c0_57 = arith.constant 0 : index
    %56 = arith.index_cast %54 : i32 to index
    %c0_58 = arith.constant 0 : index
    %57 = vector.load %arg3[%c0_57, %56, %c0_58] : memref<1x256x128xbf16, #tpu.memory_space<vmem>>, vector<1x128x128xbf16>
    %58 = vector.shape_cast %57 : vector<1x128x128xbf16> to vector<128x128xbf16>
    %59 = vector.shape_cast %55 : vector<128x128xbf16> to vector<1x128x128xbf16>
    tpu.vector_store %arg3[%c0_57, %56, %c0_58], %59 {strides = array<i32>} : memref<1x256x128xbf16, #tpu.memory_space<vmem>>, vector<1x128x128xbf16>,
    %cst_59 = arith.constant dense<0.000000e+00> : vector<128xf32>
    %60 = vector.multi_reduction <add>, %52, %cst_59 [0] : vector<128x128xf32> to vector<128xf32>
    %61 = vector.shape_cast %60 : vector<128xf32> to vector<1x128xf32>
    %62 = arith.addf %0, %61 : vector<1x128xf32>
    %63 = arith.mulf %52, %52 : vector<128x128xf32>
    %cst_60 = arith.constant dense<0.000000e+00> : vector<128xf32>
    %64 = vector.multi_reduction <add>, %63, %cst_60 [0] : vector<128x128xf32> to vector<128xf32>
    %65 = vector.shape_cast %64 : vector<128xf32> to vector<1x128xf32>
    %66 = arith.addf %1, %65 : vector<1x128xf32>
    %c1_i32_61 = arith.constant 1 : i32
    %c8_i32_62 = arith.constant 8 : i32
    %67 = arith.muli %c1_i32_61, %c8_i32_62 : i32
    %68 = tpu.assume_multiple %67, 8 : i32
    %c0_i32_63 = arith.constant 0 : i32
    %69 = arith.addi %68, %c0_i32_63 : i32
    %c0_64 = arith.constant 0 : index
    %70 = arith.index_cast %69 : i32 to index
    %c0_65 = arith.constant 0 : index
    %c0_66 = arith.constant 0 : index
    %71 = vector.load %arg1[%c0_64, %70, %c0_65, %c0_66] : memref<1x18x18x4xbf16, #tpu.memory_space<vmem>>, vector<1x8x16x4xbf16>
    %72 = vector.shape_cast %71 : vector<1x8x16x4xbf16> to vector<8x16x4xbf16>
    %c0_67 = arith.constant 0 : index
    %c0_68 = arith.constant 0 : index
    %c0_69 = arith.constant 0 : index
    %73 = vector.load %arg5[%c0_67, %c0_68, %c0_69] : memref<8x16x36xbf16, #tpu.memory_space<vmem>>, vector<8x16x4xbf16>
    tpu.vector_store %arg5[%c0_67, %c0_68, %c0_69], %72 {strides = array<i32>} : memref<8x16x36xbf16, #tpu.memory_space<vmem>>, vector<8x16x4xbf16>,
    %c0_i32_70 = arith.constant 0 : i32
    %74 = arith.addi %68, %c0_i32_70 : i32
    %c0_71 = arith.constant 0 : index
    %75 = arith.index_cast %74 : i32 to index
    %c1_72 = arith.constant 1 : index
    %c0_73 = arith.constant 0 : index
    %76 = vector.load %arg1[%c0_71, %75, %c1_72, %c0_73] : memref<1x18x18x4xbf16, #tpu.memory_space<vmem>>, vector<1x8x16x4xbf16>
    %77 = vector.shape_cast %76 : vector<1x8x16x4xbf16> to vector<8x16x4xbf16>
    %c0_74 = arith.constant 0 : index
    %c0_75 = arith.constant 0 : index
    %c4_76 = arith.constant 4 : index
    %78 = vector.load %arg5[%c0_74, %c0_75, %c4_76] : memref<8x16x36xbf16, #tpu.memory_space<vmem>>, vector<8x16x4xbf16>
    tpu.vector_store %arg5[%c0_74, %c0_75, %c4_76], %77 {strides = array<i32>} : memref<8x16x36xbf16, #tpu.memory_space<vmem>>, vector<8x16x4xbf16>,
    %c0_i32_77 = arith.constant 0 : i32
    %79 = arith.addi %68, %c0_i32_77 : i32
    %c0_78 = arith.constant 0 : index
    %80 = arith.index_cast %79 : i32 to index
    %c2_79 = arith.constant 2 : index
    %c0_80 = arith.constant 0 : index
    %81 = vector.load %arg1[%c0_78, %80, %c2_79, %c0_80] : memref<1x18x18x4xbf16, #tpu.memory_space<vmem>>, vector<1x8x16x4xbf16>
    %82 = vector.shape_cast %81 : vector<1x8x16x4xbf16> to vector<8x16x4xbf16>
    %c0_81 = arith.constant 0 : index
    %c0_82 = arith.constant 0 : index
    %c8_83 = arith.constant 8 : index
    %83 = vector.load %arg5[%c0_81, %c0_82, %c8_83] : memref<8x16x36xbf16, #tpu.memory_space<vmem>>, vector<8x16x4xbf16>
    tpu.vector_store %arg5[%c0_81, %c0_82, %c8_83], %82 {strides = array<i32>} : memref<8x16x36xbf16, #tpu.memory_space<vmem>>, vector<8x16x4xbf16>,
    %c1_i32_84 = arith.constant 1 : i32
    %84 = arith.addi %68, %c1_i32_84 : i32
    %c0_85 = arith.constant 0 : index
    %85 = arith.index_cast %84 : i32 to index
    %c0_86 = arith.constant 0 : index
    %c0_87 = arith.constant 0 : index
    %86 = vector.load %arg1[%c0_85, %85, %c0_86, %c0_87] : memref<1x18x18x4xbf16, #tpu.memory_space<vmem>>, vector<1x8x16x4xbf16>
    %87 = vector.shape_cast %86 : vector<1x8x16x4xbf16> to vector<8x16x4xbf16>
    %c0_88 = arith.constant 0 : index
    %c0_89 = arith.constant 0 : index
    %c12_90 = arith.constant 12 : index
    %88 = vector.load %arg5[%c0_88, %c0_89, %c12_90] : memref<8x16x36xbf16, #tpu.memory_space<vmem>>, vector<8x16x4xbf16>
    tpu.vector_store %arg5[%c0_88, %c0_89, %c12_90], %87 {strides = array<i32>} : memref<8x16x36xbf16, #tpu.memory_space<vmem>>, vector<8x16x4xbf16>,
    %c1_i32_91 = arith.constant 1 : i32
    %89 = arith.addi %68, %c1_i32_91 : i32
    %c0_92 = arith.constant 0 : index
    %90 = arith.index_cast %89 : i32 to index
    %c1_93 = arith.constant 1 : index
    %c0_94 = arith.constant 0 : index
    %91 = vector.load %arg1[%c0_92, %90, %c1_93, %c0_94] : memref<1x18x18x4xbf16, #tpu.memory_space<vmem>>, vector<1x8x16x4xbf16>
    %92 = vector.shape_cast %91 : vector<1x8x16x4xbf16> to vector<8x16x4xbf16>
    %c0_95 = arith.constant 0 : index
    %c0_96 = arith.constant 0 : index
    %c16_97 = arith.constant 16 : index
    %93 = vector.load %arg5[%c0_95, %c0_96, %c16_97] : memref<8x16x36xbf16, #tpu.memory_space<vmem>>, vector<8x16x4xbf16>
    tpu.vector_store %arg5[%c0_95, %c0_96, %c16_97], %92 {strides = array<i32>} : memref<8x16x36xbf16, #tpu.memory_space<vmem>>, vector<8x16x4xbf16>,
    %c1_i32_98 = arith.constant 1 : i32
    %94 = arith.addi %68, %c1_i32_98 : i32
    %c0_99 = arith.constant 0 : index
    %95 = arith.index_cast %94 : i32 to index
    %c2_100 = arith.constant 2 : index
    %c0_101 = arith.constant 0 : index
    %96 = vector.load %arg1[%c0_99, %95, %c2_100, %c0_101] : memref<1x18x18x4xbf16, #tpu.memory_space<vmem>>, vector<1x8x16x4xbf16>
    %97 = vector.shape_cast %96 : vector<1x8x16x4xbf16> to vector<8x16x4xbf16>
    %c0_102 = arith.constant 0 : index
    %c0_103 = arith.constant 0 : index
    %c20_104 = arith.constant 20 : index
    %98 = vector.load %arg5[%c0_102, %c0_103, %c20_104] : memref<8x16x36xbf16, #tpu.memory_space<vmem>>, vector<8x16x4xbf16>
    tpu.vector_store %arg5[%c0_102, %c0_103, %c20_104], %97 {strides = array<i32>} : memref<8x16x36xbf16, #tpu.memory_space<vmem>>, vector<8x16x4xbf16>,
    %c2_i32_105 = arith.constant 2 : i32
    %99 = arith.addi %68, %c2_i32_105 : i32
    %c0_106 = arith.constant 0 : index
    %100 = arith.index_cast %99 : i32 to index
    %c0_107 = arith.constant 0 : index
    %c0_108 = arith.constant 0 : index
    %101 = vector.load %arg1[%c0_106, %100, %c0_107, %c0_108] : memref<1x18x18x4xbf16, #tpu.memory_space<vmem>>, vector<1x8x16x4xbf16>
    %102 = vector.shape_cast %101 : vector<1x8x16x4xbf16> to vector<8x16x4xbf16>
    %c0_109 = arith.constant 0 : index
    %c0_110 = arith.constant 0 : index
    %c24_111 = arith.constant 24 : index
    %103 = vector.load %arg5[%c0_109, %c0_110, %c24_111] : memref<8x16x36xbf16, #tpu.memory_space<vmem>>, vector<8x16x4xbf16>
    tpu.vector_store %arg5[%c0_109, %c0_110, %c24_111], %102 {strides = array<i32>} : memref<8x16x36xbf16, #tpu.memory_space<vmem>>, vector<8x16x4xbf16>,
    %c2_i32_112 = arith.constant 2 : i32
    %104 = arith.addi %68, %c2_i32_112 : i32
    %c0_113 = arith.constant 0 : index
    %105 = arith.index_cast %104 : i32 to index
    %c1_114 = arith.constant 1 : index
    %c0_115 = arith.constant 0 : index
    %106 = vector.load %arg1[%c0_113, %105, %c1_114, %c0_115] : memref<1x18x18x4xbf16, #tpu.memory_space<vmem>>, vector<1x8x16x4xbf16>
    %107 = vector.shape_cast %106 : vector<1x8x16x4xbf16> to vector<8x16x4xbf16>
    %c0_116 = arith.constant 0 : index
    %c0_117 = arith.constant 0 : index
    %c28_118 = arith.constant 28 : index
    %108 = vector.load %arg5[%c0_116, %c0_117, %c28_118] : memref<8x16x36xbf16, #tpu.memory_space<vmem>>, vector<8x16x4xbf16>
    tpu.vector_store %arg5[%c0_116, %c0_117, %c28_118], %107 {strides = array<i32>} : memref<8x16x36xbf16, #tpu.memory_space<vmem>>, vector<8x16x4xbf16>,
    %c2_i32_119 = arith.constant 2 : i32
    %109 = arith.addi %68, %c2_i32_119 : i32
    %c0_120 = arith.constant 0 : index
    %110 = arith.index_cast %109 : i32 to index
    %c2_121 = arith.constant 2 : index
    %c0_122 = arith.constant 0 : index
    %111 = vector.load %arg1[%c0_120, %110, %c2_121, %c0_122] : memref<1x18x18x4xbf16, #tpu.memory_space<vmem>>, vector<1x8x16x4xbf16>
    %112 = vector.shape_cast %111 : vector<1x8x16x4xbf16> to vector<8x16x4xbf16>
    %c0_123 = arith.constant 0 : index
    %c0_124 = arith.constant 0 : index
    %c32_125 = arith.constant 32 : index
    %113 = vector.load %arg5[%c0_123, %c0_124, %c32_125] : memref<8x16x36xbf16, #tpu.memory_space<vmem>>, vector<8x16x4xbf16>
    tpu.vector_store %arg5[%c0_123, %c0_124, %c32_125], %112 {strides = array<i32>} : memref<8x16x36xbf16, #tpu.memory_space<vmem>>, vector<8x16x4xbf16>,
    %c0_126 = arith.constant 0 : index
    %c0_127 = arith.constant 0 : index
    %c0_128 = arith.constant 0 : index
    %114 = vector.load %arg5[%c0_126, %c0_127, %c0_128] : memref<8x16x36xbf16, #tpu.memory_space<vmem>>, vector<8x16x36xbf16>
    %115 = vector.shape_cast %114 : vector<8x16x36xbf16> to vector<128x36xbf16>
    %c0_129 = arith.constant 0 : index
    %c0_130 = arith.constant 0 : index
    %116 = vector.load %arg2[%c0_129, %c0_130] : memref<36x128xbf16, #tpu.memory_space<vmem>>, vector<36x128xbf16>
    %cst_131 = arith.constant dense<0.000000e+00> : vector<128x128xf32>
    %117 = tpu.matmul %115, %116, %cst_131 {dimension_numbers = #tpu.dot_dimension_numbers<[1], [0], [0], [1], [0, 0, 1, 1], [], []>} : vector<128x36xbf16>, vector<36x128xbf16>, vector<128x128xf32> -> vector<128x128xf32>
    %c128_i32_132 = arith.constant 128 : i32
    %118 = arith.muli %c1_i32_61, %c128_i32_132 : i32
    %119 = tpu.assume_multiple %118, 128 : i32
    %120 = arith.truncf %117 : vector<128x128xf32> to vector<128x128xbf16>
    %c0_133 = arith.constant 0 : index
    %121 = arith.index_cast %119 : i32 to index
    %c0_134 = arith.constant 0 : index
    %122 = vector.load %arg3[%c0_133, %121, %c0_134] : memref<1x256x128xbf16, #tpu.memory_space<vmem>>, vector<1x128x128xbf16>
    %123 = vector.shape_cast %122 : vector<1x128x128xbf16> to vector<128x128xbf16>
    %124 = vector.shape_cast %120 : vector<128x128xbf16> to vector<1x128x128xbf16>
    tpu.vector_store %arg3[%c0_133, %121, %c0_134], %124 {strides = array<i32>} : memref<1x256x128xbf16, #tpu.memory_space<vmem>>, vector<1x128x128xbf16>,
    %cst_135 = arith.constant dense<0.000000e+00> : vector<128xf32>
    %125 = vector.multi_reduction <add>, %117, %cst_135 [0] : vector<128x128xf32> to vector<128xf32>
    %126 = vector.shape_cast %125 : vector<128xf32> to vector<1x128xf32>
    %127 = arith.addf %62, %126 : vector<1x128xf32>
    %128 = arith.mulf %117, %117 : vector<128x128xf32>
    %cst_136 = arith.constant dense<0.000000e+00> : vector<128xf32>
    %129 = vector.multi_reduction <add>, %128, %cst_136 [0] : vector<128x128xf32> to vector<128xf32>
    %130 = vector.shape_cast %129 : vector<128xf32> to vector<1x128xf32>
    %131 = arith.addf %66, %130 : vector<1x128xf32>
    %c2_i32_137 = arith.constant 2 : i32
    %132 = tpu.concatenate %127, %131 in 0 : vector<1x128xf32>, vector<1x128xf32> -> vector<2x128xf32>
    %c0_138 = arith.constant 0 : index
    %c0_139 = arith.constant 0 : index
    %c0_140 = arith.constant 0 : index
    %133 = vector.load %arg4[%c0_138, %c0_139, %c0_140] : memref<1x2x128xf32, #tpu.memory_space<vmem>>, vector<1x2x128xf32>
    %134 = vector.shape_cast %133 : vector<1x2x128xf32> to vector<2x128xf32>
    %135 = vector.shape_cast %132 : vector<2x128xf32> to vector<1x2x128xf32>
    tpu.vector_store %arg4[%c0_138, %c0_139, %c0_140], %135 {strides = array<i32>} : memref<1x2x128xf32, #tpu.memory_space<vmem>>, vector<1x2x128xf32>,
    return
  }
  func.func @transform_0(%arg0: i32) -> (i32, i32, i32, i32) {
    %c0_i32 = arith.constant 0 : i32
    %c0_i32_0 = arith.constant 0 : i32
    %c0_i32_1 = arith.constant 0 : i32
    %c0_i32_2 = arith.constant 0 : i32
    return %arg0, %c0_i32, %c0_i32_0, %c0_i32_1 : i32, i32, i32, i32
  }
  func.func @transform_1(%arg0: i32) -> (i32, i32) {
    %c0_i32 = arith.constant 0 : i32
    %c0_i32_0 = arith.constant 0 : i32
    %c0_i32_1 = arith.constant 0 : i32
    return %c0_i32, %c0_i32_0 : i32, i32
  }
  func.func @transform_2(%arg0: i32) -> (i32, i32, i32) {
    %c0_i32 = arith.constant 0 : i32
    %c0_i32_0 = arith.constant 0 : i32
    %c0_i32_1 = arith.constant 0 : i32
    return %arg0, %c0_i32, %c0_i32_0 : i32, i32, i32
  }
  func.func @transform_3(%arg0: i32) -> (i32, i32, i32) {
    %c0_i32 = arith.constant 0 : i32
    %c0_i32_0 = arith.constant 0 : i32
    %c0_i32_1 = arith.constant 0 : i32
    return %arg0, %c0_i32, %c0_i32_0 : i32, i32, i32
  }
}

module attributes {stable_mosaic.version = 11 : i64} {
  func.func @_bn_apply_kernel(%arg0: i32, %arg1: memref<512x128xbf16, #tpu.memory_space<vmem>>, %arg2: memref<1x128xf32, #tpu.memory_space<vmem>>, %arg3: memref<1x128xf32, #tpu.memory_space<vmem>>, %arg4: memref<512x128xf32, #tpu.memory_space<vmem>>) attributes {dimension_semantics = [#tpu.dimension_semantics<parallel>], iteration_bounds = array<i64: 1>, scalar_prefetch = 0 : i64, scratch_operands = 0 : i64, tpu.core_type = #tpu.core_type<tc>, window_params = [{transform_indices = @transform_0, window_bounds = array<i64: 512, 128>}, {pipeline_mode = #tpu.pipeline_mode<synchronous>, transform_indices = @transform_1, window_bounds = array<i64: 1, 128>}, {pipeline_mode = #tpu.pipeline_mode<synchronous>, transform_indices = @transform_2, window_bounds = array<i64: 1, 128>}, {transform_indices = @transform_3, window_bounds = array<i64: 512, 128>}]} {
    %c0 = arith.constant 0 : index
    %c0_0 = arith.constant 0 : index
    %0 = vector.load %arg1[%c0, %c0_0] : memref<512x128xbf16, #tpu.memory_space<vmem>>, vector<512x128xbf16>
    %1 = arith.extf %0 : vector<512x128xbf16> to vector<512x128xf32>
    %c0_1 = arith.constant 0 : index
    %c0_2 = arith.constant 0 : index
    %2 = vector.load %arg2[%c0_1, %c0_2] : memref<1x128xf32, #tpu.memory_space<vmem>>, vector<1x128xf32>
    %3 = vector.broadcast %2 : vector<1x128xf32> to vector<512x128xf32>
    %4 = arith.mulf %1, %3 : vector<512x128xf32>
    %c0_3 = arith.constant 0 : index
    %c0_4 = arith.constant 0 : index
    %5 = vector.load %arg3[%c0_3, %c0_4] : memref<1x128xf32, #tpu.memory_space<vmem>>, vector<1x128xf32>
    %6 = vector.broadcast %5 : vector<1x128xf32> to vector<512x128xf32>
    %7 = arith.addf %4, %6 : vector<512x128xf32>
    %c0_5 = arith.constant 0 : index
    %c0_6 = arith.constant 0 : index
    %8 = vector.load %arg4[%c0_5, %c0_6] : memref<512x128xf32, #tpu.memory_space<vmem>>, vector<512x128xf32>
    tpu.vector_store %arg4[%c0_5, %c0_6], %7 {strides = array<i32>} : memref<512x128xf32, #tpu.memory_space<vmem>>, vector<512x128xf32>,
    return
  }
  func.func @transform_0(%arg0: i32) -> (i32, i32) {
    %c0_i32 = arith.constant 0 : i32
    %c0_i32_0 = arith.constant 0 : i32
    return %arg0, %c0_i32 : i32, i32
  }
  func.func @transform_1(%arg0: i32) -> (i32, i32) {
    %c0_i32 = arith.constant 0 : i32
    %c0_i32_0 = arith.constant 0 : i32
    %c0_i32_1 = arith.constant 0 : i32
    return %c0_i32, %c0_i32_0 : i32, i32
  }
  func.func @transform_2(%arg0: i32) -> (i32, i32) {
    %c0_i32 = arith.constant 0 : i32
    %c0_i32_0 = arith.constant 0 : i32
    %c0_i32_1 = arith.constant 0 : i32
    return %c0_i32, %c0_i32_0 : i32, i32
  }
  func.func @transform_3(%arg0: i32) -> (i32, i32) {
    %c0_i32 = arith.constant 0 : i32
    %c0_i32_0 = arith.constant 0 : i32
    return %arg0, %c0_i32 : i32, i32
  }
}

</mosaic_0001>

<bundles_post_ra>
// kernel: dense_conv2d_bn.3
= control target key start
LH: loop header
LB: loop body
LE: loop exit
PB: predicated region body
PF: predicated region fallthrough
CT: control target
= control target key end

     0   :  { %s959_s0 = inlined_call_operand.vmem [shape: bf16[512,128], index: 0, kind: input, shape index: {}]   ;;  %s960_s1 = inlined_call_operand.vmem [shape: f32[1,128], index: 1, kind: input, shape index: {}]   ;;  %s961_s2 = inlined_call_operand.vmem [shape: f32[1,128], index: 2, kind: input, shape index: {}]   ;;  %s962_s3 = inlined_call_operand.vmem [shape: f32[512,128], index: 3, kind: output, shape index: {}]  }
   0x1   :  { %v355_v0 = vld [vmem:[%s959_s0] sm:$0xff]   ;;  %v482_v4 = vld [vmem:[%s959_s0 + $0x8] sm:$0xff]   ;;  %v483_v5 = vld [vmem:[%s959_s0 + $0x10] sm:$0xff]  }
   0x2   :  { %v539_v1 = vld [vmem:[%s960_s1] ss:$0 sm:$0xff]  ;;  %v356_v2 = vunpack.c.l.bf16 %v355_v0  ;;  %v357_v3 = vunpack.c.h.bf16 %v355_v0  ;;  %v484_v6 = vld [vmem:[%s959_s0 + $0x18] sm:$0xff]   ;;  %v360_v8 = vunpack.c.l.bf16 %v482_v4  ;;  %v361_v9 = vunpack.c.h.bf16 %v482_v4  ;;  %v486_v25 = vld [vmem:[%s959_s0 + $0x28] sm:$0xff]  }
   0x3   :  { %v553_v7 = vld [vmem:[%s961_s2] ss:$0 sm:$0xff]  ;;  %v364_v10 = vunpack.c.l.bf16 %v483_v5  ;;  %v365_v11 = vunpack.c.h.bf16 %v483_v5  ;;  %v368_v14 = vunpack.c.l.bf16 %v484_v6  ;;  %v369_v15 = vunpack.c.h.bf16 %v484_v6  ;;  %v487_v26 = vld [vmem:[%s959_s0 + $0x30] sm:$0xff]   ;;  %v488_v31 = vld [vmem:[%s959_s0 + $0x38] sm:$0xff]  }
   0x4   :  { %v149_v12 = vmul.f32 %v356_v2, %v539_v1  ;;  %v150_v13 = vmul.f32 %v357_v3, %v539_v1  ;;  %v151_v16 = vmul.f32 %v360_v8, %v539_v1  ;;  %v152_v17 = vmul.f32 %v361_v9, %v539_v1  ;;  %v485_v20 = vld [vmem:[%s959_s0 + $0x20] sm:$0xff]   ;;  %v490_v53 = vld [vmem:[%s959_s0 + $0x48] sm:$0xff]   ;;  %v491_v54 = vld [vmem:[%s959_s0 + $0x50] sm:$0xff]  }
   0x5   :  { %v153_v18 = vmul.f32 %v364_v10, %v539_v1  ;;  %v154_v19 = vmul.f32 %v365_v11, %v539_v1  ;;  %v155_v23 = vmul.f32 %v368_v14, %v539_v1  ;;  %v156_v24 = vmul.f32 %v369_v15, %v539_v1  ;;  %v489_v48 = vld [vmem:[%s959_s0 + $0x40] sm:$0xff]   ;;  %v492_v59 = vld [vmem:[%s959_s0 + $0x58] sm:$0xff]  }
   0x6   :  { %v220_v21 = vadd.f32 %v553_v7, %v149_v12  ;;  %v221_v22 = vadd.f32 %v553_v7, %v150_v13  ;;  %v222_v27 = vadd.f32 %v553_v7, %v151_v16  ;;  %v223_v28 = vadd.f32 %v553_v7, %v152_v17  ;;  %v493_v14 = vld [vmem:[%s959_s0 + $0x60] sm:$0xff]  }
   0x7   :  { %v224_v29 = vadd.f32 %v553_v7, %v153_v18  ;;  %v225_v30 = vadd.f32 %v553_v7, %v154_v19  ;;  %v226_v32 = vadd.f32 %v553_v7, %v155_v23  ;;  %v227_v33 = vadd.f32 %v553_v7, %v156_v24  ;;  %v494_v19 = vld [vmem:[%s959_s0 + $0x68] sm:$0xff]  }
   0x8   :  { %284 = vst [vmem:[%s962_s3] sm:$0xff] %v220_v21  ;;  %285 = vst [vmem:[%s962_s3 + $0x8] sm:$0xff] %v221_v22  ;;  %v372_v34 = vunpack.c.l.bf16 %v485_v20  ;;  %v373_v35 = vunpack.c.h.bf16 %v485_v20  ;;  %v376_v36 = vunpack.c.l.bf16 %v486_v25  ;;  %v377_v37 = vunpack.c.h.bf16 %v486_v25  ;;  %v495_v20 = vld [vmem:[%s959_s0 + $0x70] sm:$0xff]   ;;  %v496_v25 = vld [vmem:[%s959_s0 + $0x78] sm:$0xff]  }
   0x9   :  { %286 = vst [vmem:[%s962_s3 + $0x10] sm:$0xff] %v222_v27  ;;  %287 = vst [vmem:[%s962_s3 + $0x18] sm:$0xff] %v223_v28  ;;  %v380_v38 = vunpack.c.l.bf16 %v487_v26  ;;  %v381_v39 = vunpack.c.h.bf16 %v487_v26  ;;  %v384_v42 = vunpack.c.l.bf16 %v488_v31  ;;  %v385_v43 = vunpack.c.h.bf16 %v488_v31 }
   0xa   :  { %288 = vst [vmem:[%s962_s3 + $0x20] sm:$0xff] %v224_v29  ;;  %289 = vst [vmem:[%s962_s3 + $0x28] sm:$0xff] %v225_v30  ;;  %v157_v40 = vmul.f32 %v372_v34, %v539_v1  ;;  %v158_v41 = vmul.f32 %v373_v35, %v539_v1  ;;  %v159_v44 = vmul.f32 %v376_v36, %v539_v1  ;;  %v388_v62 = vunpack.c.l.bf16 %v489_v48 }
   0xb   :  { %290 = vst [vmem:[%s962_s3 + $0x30] sm:$0xff] %v226_v32  ;;  %291 = vst [vmem:[%s962_s3 + $0x38] sm:$0xff] %v227_v33  ;;  %v160_v45 = vmul.f32 %v377_v37, %v539_v1  ;;  %v161_v46 = vmul.f32 %v380_v38, %v539_v1  ;;  %v162_v47 = vmul.f32 %v381_v39, %v539_v1  ;;  %v389_v63 = vunpack.c.h.bf16 %v489_v48  ;;  %v499_v48 = vld [vmem:[%s959_s0 + $0x90] sm:$0xff]  }
   0xc   :  { %v228_v49 = vadd.f32 %v553_v7, %v157_v40  ;;  %v229_v50 = vadd.f32 %v553_v7, %v158_v41  ;;  %v163_v51 = vmul.f32 %v384_v42, %v539_v1  ;;  %v164_v52 = vmul.f32 %v385_v43, %v539_v1  ;;  %v497_v42 = vld [vmem:[%s959_s0 + $0x80] sm:$0xff]  }
   0xd   :  { %v230_v55 = vadd.f32 %v553_v7, %v159_v44  ;;  %v231_v56 = vadd.f32 %v553_v7, %v160_v45  ;;  %v232_v57 = vadd.f32 %v553_v7, %v161_v46  ;;  %v233_v58 = vadd.f32 %v553_v7, %v162_v47  ;;  %v498_v47 = vld [vmem:[%s959_s0 + $0x88] sm:$0xff]  }
   0xe   :  { %292 = vst [vmem:[%s962_s3 + $0x40] sm:$0xff] %v228_v49  ;;  %293 = vst [vmem:[%s962_s3 + $0x48] sm:$0xff] %v229_v50  ;;  %v234_v60 = vadd.f32 %v553_v7, %v163_v51  ;;  %v235_v61 = vadd.f32 %v553_v7, %v164_v52  ;;  %v392_v0 = vunpack.c.l.bf16 %v490_v53  ;;  %v393_v2 = vunpack.c.h.bf16 %v490_v53  ;;  %v500_v53 = vld [vmem:[%s959_s0 + $0x98] sm:$0xff]  }
   0xf   :  { %294 = vst [vmem:[%s962_s3 + $0x50] sm:$0xff] %v230_v55  ;;  %295 = vst [vmem:[%s962_s3 + $0x58] sm:$0xff] %v231_v56  ;;  %v396_v3 = vunpack.c.l.bf16 %v491_v54  ;;  %v397_v4 = vunpack.c.h.bf16 %v491_v54  ;;  %v165_v5 = vmul.f32 %v388_v62, %v539_v1  ;;  %v166_v6 = vmul.f32 %v389_v63, %v539_v1 }
  0x10   :  { %296 = vst [vmem:[%s962_s3 + $0x60] sm:$0xff] %v232_v57  ;;  %297 = vst [vmem:[%s962_s3 + $0x68] sm:$0xff] %v233_v58  ;;  %v400_v8 = vunpack.c.l.bf16 %v492_v59  ;;  %v401_v9 = vunpack.c.h.bf16 %v492_v59  ;;  %v167_v10 = vmul.f32 %v392_v0, %v539_v1  ;;  %v168_v11 = vmul.f32 %v393_v2, %v539_v1 }
  0x11   :  { %298 = vst [vmem:[%s962_s3 + $0x70] sm:$0xff] %v234_v60  ;;  %299 = vst [vmem:[%s962_s3 + $0x78] sm:$0xff] %v235_v61  ;;  %v169_v12 = vmul.f32 %v396_v3, %v539_v1  ;;  %v170_v13 = vmul.f32 %v397_v4, %v539_v1  ;;  %v236_v15 = vadd.f32 %v553_v7, %v165_v5  ;;  %v404_v28 = vunpack.c.l.bf16 %v493_v14 }
  0x12   :  { %v237_v16 = vadd.f32 %v553_v7, %v166_v6  ;;  %v171_v17 = vmul.f32 %v400_v8, %v539_v1  ;;  %v172_v18 = vmul.f32 %v401_v9, %v539_v1  ;;  %v238_v21 = vadd.f32 %v553_v7, %v167_v10  ;;  %v501_v8 = vld [vmem:[%s959_s0 + $0xa0] sm:$0xff]  }
  0x13   :  { %v239_v22 = vadd.f32 %v553_v7, %v168_v11  ;;  %v240_v23 = vadd.f32 %v553_v7, %v169_v12  ;;  %v241_v24 = vadd.f32 %v553_v7, %v170_v13  ;;  %300 = vst [vmem:[%s962_s3 + $0x80] sm:$0xff] %v236_v15  ;;  %v405_v29 = vunpack.c.h.bf16 %v493_v14  ;;  %v502_v13 = vld [vmem:[%s959_s0 + $0xa8] sm:$0xff]   ;;  %v503_v14 = vld [vmem:[%s959_s0 + $0xb0] sm:$0xff]  }
  0x14   :  { %301 = vst [vmem:[%s962_s3 + $0x88] sm:$0xff] %v237_v16  ;;  %v242_v26 = vadd.f32 %v553_v7, %v171_v17  ;;  %v243_v27 = vadd.f32 %v553_v7, %v172_v18  ;;  %302 = vst [vmem:[%s962_s3 + $0x90] sm:$0xff] %v238_v21  ;;  %v408_v30 = vunpack.c.l.bf16 %v494_v19  ;;  %v409_v31 = vunpack.c.h.bf16 %v494_v19  ;;  %v504_v19 = vld [vmem:[%s959_s0 + $0xb8] sm:$0xff]  }
  0x15   :  { %303 = vst [vmem:[%s962_s3 + $0x98] sm:$0xff] %v239_v22  ;;  %304 = vst [vmem:[%s962_s3 + $0xa0] sm:$0xff] %v240_v23  ;;  %v412_v32 = vunpack.c.l.bf16 %v495_v20  ;;  %v413_v33 = vunpack.c.h.bf16 %v495_v20  ;;  %v173_v34 = vmul.f32 %v404_v28, %v539_v1  ;;  %v174_v35 = vmul.f32 %v405_v29, %v539_v1 }
  0x16   :  { %305 = vst [vmem:[%s962_s3 + $0xa8] sm:$0xff] %v241_v24  ;;  %306 = vst [vmem:[%s962_s3 + $0xb0] sm:$0xff] %v242_v26  ;;  %v416_v36 = vunpack.c.l.bf16 %v496_v25  ;;  %v417_v37 = vunpack.c.h.bf16 %v496_v25  ;;  %v175_v38 = vmul.f32 %v408_v30, %v539_v1  ;;  %v176_v39 = vmul.f32 %v409_v31, %v539_v1 }
  0x17   :  { %307 = vst [vmem:[%s962_s3 + $0xb8] sm:$0xff] %v243_v27  ;;  %v177_v40 = vmul.f32 %v412_v32, %v539_v1  ;;  %v178_v41 = vmul.f32 %v413_v33, %v539_v1  ;;  %v244_v43 = vadd.f32 %v553_v7, %v173_v34  ;;  %v245_v44 = vadd.f32 %v553_v7, %v174_v35 }
  0x18   :  { %v179_v45 = vmul.f32 %v416_v36, %v539_v1  ;;  %v180_v46 = vmul.f32 %v417_v37, %v539_v1  ;;  %v246_v49 = vadd.f32 %v553_v7, %v175_v38  ;;  %v247_v50 = vadd.f32 %v553_v7, %v176_v39  ;;  %v505_v36 = vld [vmem:[%s959_s0 + $0xc0] sm:$0xff]  }
  0x19   :  { %v248_v51 = vadd.f32 %v553_v7, %v177_v40  ;;  %v249_v52 = vadd.f32 %v553_v7, %v178_v41  ;;  %308 = vst [vmem:[%s962_s3 + $0xc0] sm:$0xff] %v244_v43  ;;  %309 = vst [vmem:[%s962_s3 + $0xc8] sm:$0xff] %v245_v44  ;;  %v420_v56 = vunpack.c.l.bf16 %v497_v42  ;;  %v421_v57 = vunpack.c.h.bf16 %v497_v42  ;;  %v506_v41 = vld [vmem:[%s959_s0 + $0xc8] sm:$0xff]   ;;  %v507_v42 = vld [vmem:[%s959_s0 + $0xd0] sm:$0xff]  }
  0x1a   :  { %v250_v54 = vadd.f32 %v553_v7, %v179_v45  ;;  %v251_v55 = vadd.f32 %v553_v7, %v180_v46  ;;  %310 = vst [vmem:[%s962_s3 + $0xd0] sm:$0xff] %v246_v49  ;;  %311 = vst [vmem:[%s962_s3 + $0xd8] sm:$0xff] %v247_v50  ;;  %v424_v58 = vunpack.c.l.bf16 %v498_v47  ;;  %v425_v59 = vunpack.c.h.bf16 %v498_v47  ;;  %v508_v47 = vld [vmem:[%s959_s0 + $0xd8] sm:$0xff]  }
  0x1b   :  { %312 = vst [vmem:[%s962_s3 + $0xe0] sm:$0xff] %v248_v51  ;;  %313 = vst [vmem:[%s962_s3 + $0xe8] sm:$0xff] %v249_v52  ;;  %v428_v60 = vunpack.c.l.bf16 %v499_v48  ;;  %v429_v61 = vunpack.c.h.bf16 %v499_v48  ;;  %v181_v62 = vmul.f32 %v420_v56, %v539_v1  ;;  %v182_v63 = vmul.f32 %v421_v57, %v539_v1 }
  0x1c   :  { %314 = vst [vmem:[%s962_s3 + $0xf0] sm:$0xff] %v250_v54  ;;  %315 = vst [vmem:[%s962_s3 + $0xf8] sm:$0xff] %v251_v55  ;;  %v432_v0 = vunpack.c.l.bf16 %v500_v53  ;;  %v433_v2 = vunpack.c.h.bf16 %v500_v53  ;;  %v183_v3 = vmul.f32 %v424_v58, %v539_v1  ;;  %v184_v4 = vmul.f32 %v425_v59, %v539_v1 }
  0x1d   :  { %v185_v5 = vmul.f32 %v428_v60, %v539_v1  ;;  %v186_v6 = vmul.f32 %v429_v61, %v539_v1  ;;  %v252_v9 = vadd.f32 %v553_v7, %v181_v62  ;;  %v253_v10 = vadd.f32 %v553_v7, %v182_v63 }
  0x1e   :  { %v187_v11 = vmul.f32 %v432_v0, %v539_v1  ;;  %v188_v12 = vmul.f32 %v433_v2, %v539_v1  ;;  %v254_v15 = vadd.f32 %v553_v7, %v183_v3  ;;  %v255_v16 = vadd.f32 %v553_v7, %v184_v4  ;;  %v509_v0 = vld [vmem:[%s959_s0 + $0xe0] sm:$0xff]  }
  0x1f   :  { %v256_v17 = vadd.f32 %v553_v7, %v185_v5  ;;  %v257_v18 = vadd.f32 %v553_v7, %v186_v6  ;;  %316 = vst [vmem:[%s962_s3 + $0x100] sm:$0xff] %v252_v9  ;;  %317 = vst [vmem:[%s962_s3 + $0x108] sm:$0xff] %v253_v10  ;;  %v436_v22 = vunpack.c.l.bf16 %v501_v8  ;;  %v437_v23 = vunpack.c.h.bf16 %v501_v8  ;;  %v510_v6 = vld [vmem:[%s959_s0 + $0xe8] sm:$0xff]   ;;  %v511_v8 = vld [vmem:[%s959_s0 + $0xf0] sm:$0xff]  }
  0x20   :  { %v258_v20 = vadd.f32 %v553_v7, %v187_v11  ;;  %v259_v21 = vadd.f32 %v553_v7, %v188_v12  ;;  %318 = vst [vmem:[%s962_s3 + $0x110] sm:$0xff] %v254_v15  ;;  %319 = vst [vmem:[%s962_s3 + $0x118] sm:$0xff] %v255_v16  ;;  %v440_v24 = vunpack.c.l.bf16 %v502_v13  ;;  %v441_v25 = vunpack.c.h.bf16 %v502_v13  ;;  %v512_v13 = vld [vmem:[%s959_s0 + $0xf8] sm:$0xff]  }
  0x21   :  { %320 = vst [vmem:[%s962_s3 + $0x120] sm:$0xff] %v256_v17  ;;  %321 = vst [vmem:[%s962_s3 + $0x128] sm:$0xff] %v257_v18  ;;  %v444_v26 = vunpack.c.l.bf16 %v503_v14  ;;  %v445_v27 = vunpack.c.h.bf16 %v503_v14  ;;  %v189_v28 = vmul.f32 %v436_v22, %v539_v1  ;;  %v190_v29 = vmul.f32 %v437_v23, %v539_v1 }
  0x22   :  { %322 = vst [vmem:[%s962_s3 + $0x130] sm:$0xff] %v258_v20  ;;  %323 = vst [vmem:[%s962_s3 + $0x138] sm:$0xff] %v259_v21  ;;  %v448_v30 = vunpack.c.l.bf16 %v504_v19  ;;  %v449_v31 = vunpack.c.h.bf16 %v504_v19  ;;  %v191_v32 = vmul.f32 %v440_v24, %v539_v1  ;;  %v192_v33 = vmul.f32 %v441_v25, %v539_v1 }
  0x23   :  { %v193_v34 = vmul.f32 %v444_v26, %v539_v1  ;;  %v194_v35 = vmul.f32 %v445_v27, %v539_v1  ;;  %v260_v37 = vadd.f32 %v553_v7, %v189_v28  ;;  %v261_v38 = vadd.f32 %v553_v7, %v190_v29 }
  0x24   :  { %v195_v39 = vmul.f32 %v448_v30, %v539_v1  ;;  %v196_v40 = vmul.f32 %v449_v31, %v539_v1  ;;  %v262_v43 = vadd.f32 %v553_v7, %v191_v32  ;;  %v263_v44 = vadd.f32 %v553_v7, %v192_v33 }
  0x25   :  { %v264_v45 = vadd.f32 %v553_v7, %v193_v34  ;;  %v265_v46 = vadd.f32 %v553_v7, %v194_v35  ;;  %324 = vst [vmem:[%s962_s3 + $0x140] sm:$0xff] %v260_v37  ;;  %325 = vst [vmem:[%s962_s3 + $0x148] sm:$0xff] %v261_v38  ;;  %v452_v50 = vunpack.c.l.bf16 %v505_v36  ;;  %v453_v51 = vunpack.c.h.bf16 %v505_v36 }
  0x26   :  { %v266_v48 = vadd.f32 %v553_v7, %v195_v39  ;;  %v267_v49 = vadd.f32 %v553_v7, %v196_v40  ;;  %326 = vst [vmem:[%s962_s3 + $0x150] sm:$0xff] %v262_v43  ;;  %327 = vst [vmem:[%s962_s3 + $0x158] sm:$0xff] %v263_v44  ;;  %v456_v52 = vunpack.c.l.bf16 %v506_v41  ;;  %v457_v53 = vunpack.c.h.bf16 %v506_v41 }
  0x27   :  { %328 = vst [vmem:[%s962_s3 + $0x160] sm:$0xff] %v264_v45  ;;  %329 = vst [vmem:[%s962_s3 + $0x168] sm:$0xff] %v265_v46  ;;  %v460_v54 = vunpack.c.l.bf16 %v507_v42  ;;  %v461_v55 = vunpack.c.h.bf16 %v507_v42  ;;  %v197_v56 = vmul.f32 %v452_v50, %v539_v1  ;;  %v198_v57 = vmul.f32 %v453_v51, %v539_v1 }
  0x28   :  { %330 = vst [vmem:[%s962_s3 + $0x170] sm:$0xff] %v266_v48  ;;  %331 = vst [vmem:[%s962_s3 + $0x178] sm:$0xff] %v267_v49  ;;  %v464_v58 = vunpack.c.l.bf16 %v508_v47  ;;  %v465_v59 = vunpack.c.h.bf16 %v508_v47  ;;  %v199_v60 = vmul.f32 %v456_v52, %v539_v1  ;;  %v200_v61 = vmul.f32 %v457_v53, %v539_v1 }
  0x29   :  { %v201_v62 = vmul.f32 %v460_v54, %v539_v1  ;;  %v202_v63 = vmul.f32 %v461_v55, %v539_v1  ;;  %v268_v2 = vadd.f32 %v553_v7, %v197_v56  ;;  %v269_v3 = vadd.f32 %v553_v7, %v198_v57 }
  0x2a   :  { %v203_v4 = vmul.f32 %v464_v58, %v539_v1  ;;  %v204_v5 = vmul.f32 %v465_v59, %v539_v1  ;;  %v270_v9 = vadd.f32 %v553_v7, %v199_v60  ;;  %v271_v10 = vadd.f32 %v553_v7, %v200_v61 }
  0x2b   :  { %v272_v11 = vadd.f32 %v553_v7, %v201_v62  ;;  %v273_v12 = vadd.f32 %v553_v7, %v202_v63  ;;  %332 = vst [vmem:[%s962_s3 + $0x180] sm:$0xff] %v268_v2  ;;  %333 = vst [vmem:[%s962_s3 + $0x188] sm:$0xff] %v269_v3  ;;  %v468_v16 = vunpack.c.l.bf16 %v509_v0  ;;  %v469_v17 = vunpack.c.h.bf16 %v509_v0 }
  0x2c   :  { %v274_v14 = vadd.f32 %v553_v7, %v203_v4  ;;  %v275_v15 = vadd.f32 %v553_v7, %v204_v5  ;;  %334 = vst [vmem:[%s962_s3 + $0x190] sm:$0xff] %v270_v9  ;;  %335 = vst [vmem:[%s962_s3 + $0x198] sm:$0xff] %v271_v10  ;;  %v472_v18 = vunpack.c.l.bf16 %v510_v6  ;;  %v473_v19 = vunpack.c.h.bf16 %v510_v6 }
  0x2d   :  { %336 = vst [vmem:[%s962_s3 + $0x1a0] sm:$0xff] %v272_v11  ;;  %337 = vst [vmem:[%s962_s3 + $0x1a8] sm:$0xff] %v273_v12  ;;  %v476_v20 = vunpack.c.l.bf16 %v511_v8  ;;  %v477_v21 = vunpack.c.h.bf16 %v511_v8  ;;  %v205_v22 = vmul.f32 %v468_v16, %v539_v1  ;;  %v206_v23 = vmul.f32 %v469_v17, %v539_v1 }
  0x2e   :  { %338 = vst [vmem:[%s962_s3 + $0x1b0] sm:$0xff] %v274_v14  ;;  %339 = vst [vmem:[%s962_s3 + $0x1b8] sm:$0xff] %v275_v15  ;;  %v480_v24 = vunpack.c.l.bf16 %v512_v13  ;;  %v481_v25 = vunpack.c.h.bf16 %v512_v13  ;;  %v207_v26 = vmul.f32 %v472_v18, %v539_v1  ;;  %v208_v27 = vmul.f32 %v473_v19, %v539_v1 }
  0x2f   :  { %v209_v28 = vmul.f32 %v476_v20, %v539_v1  ;;  %v210_v29 = vmul.f32 %v477_v21, %v539_v1  ;;  %v276_v30 = vadd.f32 %v553_v7, %v205_v22  ;;  %v277_v31 = vadd.f32 %v553_v7, %v206_v23 }
  0x30   :  { %v211_v32 = vmul.f32 %v480_v24, %v539_v1  ;;  %v212_v33 = vmul.f32 %v481_v25, %v539_v1  ;;  %v278_v34 = vadd.f32 %v553_v7, %v207_v26  ;;  %v279_v35 = vadd.f32 %v553_v7, %v208_v27 }
  0x31   :  { %v280_v36 = vadd.f32 %v553_v7, %v209_v28  ;;  %v281_v37 = vadd.f32 %v553_v7, %v210_v29  ;;  %340 = vst [vmem:[%s962_s3 + $0x1c0] sm:$0xff] %v276_v30  ;;  %341 = vst [vmem:[%s962_s3 + $0x1c8] sm:$0xff] %v277_v31 }
  0x32   :  { %v282_v38 = vadd.f32 %v553_v7, %v211_v32  ;;  %v283_v1 = vadd.f32 %v553_v7, %v212_v33  ;;  %342 = vst [vmem:[%s962_s3 + $0x1d0] sm:$0xff] %v278_v34  ;;  %343 = vst [vmem:[%s962_s3 + $0x1d8] sm:$0xff] %v279_v35 }
  0x33   :  { %344 = vst [vmem:[%s962_s3 + $0x1e0] sm:$0xff] %v280_v36  ;;  %345 = vst [vmem:[%s962_s3 + $0x1e8] sm:$0xff] %v281_v37 }
  0x34   :  { %346 = vst [vmem:[%s962_s3 + $0x1f0] sm:$0xff] %v282_v38  ;;  %347 = vst [vmem:[%s962_s3 + $0x1f8] sm:$0xff] %v283_v1 }

// kernel: dense_conv2d_bn.2
= control target key start
LH: loop header
LB: loop body
LE: loop exit
PB: predicated region body
PF: predicated region fallthrough
CT: control target
= control target key end

     0   :  { %s4689_s12 = smov 0   ;;  %s5389_s0 = inlined_call_operand.vmem [shape: bf16[2,18,18,4], index: 0, kind: input, shape index: {}]   ;;  %s5390_s1 = inlined_call_operand.vmem [shape: bf16[36,128], index: 1, kind: input, shape index: {}]   ;;  %s5391_s2 = inlined_call_operand.vmem [shape: bf16[2,256,128], index: 2, kind: output, shape index: {0}]   ;;  %s5392_s3 = inlined_call_operand.vmem [shape: f32[2,2,128], index: 3, kind: output, shape index: {1}]  }
   0x1 LB: > { %s3553_s13 = sadd.s32 4294967295, %s4659_s12   ;;  %p3557_p0 = scmp.ge.s32.totalorder %s4659_s12, 1  ;;  %s4659_s12 = sphi %s4689_s12, %s14_s12  }
   0x2   : > { %p140_p1 = scmp.lt.s32.totalorder %s4659_s12, 3 }
   0x4   : > { %p141_p2 = pnand %p3557_p0, %p140_p1 }
   0x5   : > { %p168_p3 = scmp.lt.s32.totalorder (!%p141_p2), %s3553_s13, 1  ;;  %vm565_vm0 = vcmask (!%p141_p2), 1046528   ;;  %s4661_s18 = smov (!%p141_p2), 12   ;;  %vm347_vm1 = vsmask.f32 (!%p141_p2), 7424  ;;  %vm250_vm2 = vcmask (!%p141_p2), 31744  }
   0x6   : > { %144 = sbr.rel (%p141_p2) target bundleno = 635 (0x27b), region = 28  ;;  %s4662_s19 = smov (!%p141_p2), 20   ;;  %vm468_vm3 = vcmask (!%p141_p2), 64544   ;;  %vm614_vm4 = vcmask (!%p141_p2), 97344   ;;  %vm707_vm5 = vcmask (!%p141_p2), 130144   ;;  %vm924_vm6 = vcmask (!%p141_p2), 162944  }
   0x7   : > { %s4663_s20 = smov (!%p141_p2), 8   ;;  %s4664_s21 = smov (!%p141_p2), 4   ;;  %vm1069_vm7 = vcmask (!%p141_p2), 195744   ;;  %vm1162_vm8 = vcmask (!%p141_p2), 228544   ;;  %vm1379_vm9 = vcmask (!%p141_p2), 261344   ;;  %vm1524_vm10 = vcmask (!%p141_p2), 294144  }
   0x8   : > { %s4665_s22 = smov (!%p141_p2), 16   ;;  %s4666_s23 = smov (!%p141_p2), 24   ;;  %vm1586_vm11 = vcmask (!%p141_p2), 1041408   ;;  %vm1561_vm12 = vcmask (!%p141_p2), 293888   ;;  %vm3459_vm13 = vcmask (!%p141_p2), 1040384  }
   0x9   : > { %s4667_s24 = smov (!%p141_p2), 28   ;;  %s4668_s25 = smov (!%p141_p2), 32  }
   0xd   : > { %s5394_s13 = smov (!%p168_p3, %s3553_s13), 1 }
   0xe   : > { %s4390_s14 = smul.u32 216, %s5394_s13  ;;  %s4194_s11 = sshll.u32 %s5394_s13, 7 }
   0xf   : > { %s5358_s16 = scalar_lea.vmem %s5391_s2, %s4194_s11 }
  0x10   : > { %s4703_s17 = scalar_lea.vmem %s5389_s0, %s4390_s14 }
  0x11   : > { %v4407_v0 = vld [vmem:[%s4703_s17 + $0x18] sm:$0xff]   ;;  %v4408_v1 = vld [vmem:[%s4703_s17 + $0xc] sm:$0xff]   ;;  %v4410_v3 = vld [vmem:[%s4703_s17 + $0x14] ss:$0 sps:$4 sm:$0x11]  }
  0x12   : > { %685 = vrot.lane.b32.xlu1 %v4407_v0, %s4661_s18  ;;  %683 = vrot.lane.b32.xlu0 %v4408_v1, %s4661_s18  ;;  %v4409_v2 = vld [vmem:[%s4703_s17 + $0xc] sm:$0xfe]   ;;  %v4415_v4 = vld [vmem:[%s4703_s17] sm:$0xff]   ;;  %v1022_v6 = vrot.slane %v4410_v3, 1 }
  0x13   : > { %v1021_v5 = vrot.slane %v4409_v2, 1  ;;  %v4411_v7 = vld [vmem:[%s4703_s17] sm:$0xfe]   ;;  %v4412_v8 = vld [vmem:[%s4703_s17 + $0x8] ss:$0 sps:$4 sm:$0x11]  }
  0x14   : > { %v349_v9 = vshrl.u32 %v4415_v4, 16  ;;  %v566_v11 = vrot.slane %v4411_v7, 1  ;;  %v4413_v12 = vld [vmem:[%s4703_s17 + $0xc] sm:$0xfe]   ;;  %v351_v13 = vshll.u32 %v4415_v4, 16  ;;  %v567_v14 = vrot.slane %v4412_v8, 1 }
  0x15   : > { %v1023_v10 = vsel %vm565_vm0, %v1021_v5, %v1022_v6  ;;  %v4414_v15 = vld [vmem:[%s4703_s17 + $0x14] ss:$0 sps:$4 sm:$0x11]   ;;  %v569_v16 = vrot.slane %v4413_v12, 1  ;;  %v4417_v21 = vld [vmem:[%s4703_s17 + $0x18] sm:$0xfe]  }
  0x16   : > { %1045 = vrot.lane.b32.xlu0 %v1023_v10, %s4662_s19  ;;  %v353_v17 = vrot.slane %v351_v13, 1  ;;  %v568_v18 = vsel %vm565_vm0, %v566_v11, %v567_v14  ;;  %v570_v19 = vrot.slane %v4414_v15, 1  ;;  %v4416_v20 = vld [vmem:[%s4703_s17 + $0x8] ss:$0 sps:$4 sm:$0x11]   ;;  %v1024_v26 = vrot.slane %v4417_v21, 1 }
  0x17   : > { %590 = vrot.lane.b32.xlu1 %v568_v18, %s4663_s20  ;;  %v356_v24 = vshll.u32 %v4416_v20, 16  ;;  %v4418_v25 = vld [vmem:[%s4703_s17 + $0x20] ss:$0 sps:$4 sm:$0x11]   ;;  %v4419_v27 = vld [vmem:[%s4703_s17 + $0xc] sm:$0xff]   ;;  %v4421_v31 = vld [vmem:[%s4703_s17 + $0x18] sm:$0xff]  }
  0x18   : > { %v571_v22 = vsel %vm565_vm0, %v569_v16, %v570_v19  ;;  %v354_v23 = vor.u32 %v353_v17, %v349_v9  ;;  %v1025_v29 = vrot.slane %v4418_v25, 1  ;;  %v4420_v30 = vld [vmem:[%s4703_s17 + $0x14] ss:$0 sps:$4 sm:$0x11]   ;;  %v361_v32 = vshrl.u32 %v4419_v27, 16  ;;  %v4423_v41 = vld [vmem:[%s4703_s17 + $0xc] sm:$0xff]  }
  0x19   : > { %v358_v28 = vrot.slane %v356_v24, 1  ;;  %v363_v33 = vshll.u32 %v4419_v27, 16  ;;  %v368_v36 = vshll.u32 %v4420_v30, 16  ;;  %v4422_v37 = vld [vmem:[%s4703_s17 + $0x20] ss:$0 sps:$4 sm:$0x11]  }
  0x1a   : > { %v1026_v35 = vsel %vm565_vm0, %v1024_v26, %v1025_v29  ;;  %v817_v39 = vshrl.u32 %v4421_v31, 16  ;;  %v819_v40 = vshll.u32 %v4421_v31, 16  ;;  %v824_v43 = vshll.u32 %v4422_v37, 16  ;;  %v4424_v46 = vld [vmem:[%s4703_s17 + $0x14] ss:$0 sps:$4 sm:$0x11]  }
  0x1b   : > { %592 = vrot.lane.b32.xlu1 %v571_v22, %s4663_s20  ;;  %v359_v34 = vsel %vm347_vm1, %v354_v23, %v358_v28  ;;  %v365_v38 = vrot.slane %v363_v33, 1  ;;  %v370_v42 = vrot.slane %v368_v36, 1  ;;  %v805_v47 = vshrl.u32 %v4423_v41, 16  ;;  %v4425_v54 = vld [vmem:[%s4703_s17 + $0x24] sm:$0xff]   ;;  %v4426_v59 = vld [vmem:[%s4703_s17 + $0x18] sm:$0xff]  }
  0x1c   : > { %444 = vrot.lane.b32.xlu0 %v359_v34, %s4664_s21  ;;  %v821_v45 = vrot.slane %v819_v40, 1  ;;  %v807_v48 = vshll.u32 %v4423_v41, 16  ;;  %v826_v49 = vrot.slane %v824_v43, 1  ;;  %v812_v53 = vshll.u32 %v4424_v46, 16  ;;  %v4427_v58 = vld [vmem:[%s4703_s17 + $0x24] sm:$0xff]   ;;  %v4429_v61 = vld [vmem:[%s4703_s17 + $0x18] sm:$0xff]  }
  0x1d   : > { %v366_v44 = vor.u32 %v365_v38, %v361_v32  ;;  %v4428_v60 = vld [vmem:[%s4703_s17 + $0x2c] ss:$0 sps:$4 sm:$0x11]   ;;  %v1272_v63 = vshrl.u32 %v4427_v58, 16  ;;  %v1274_v0 = vshll.u32 %v4427_v58, 16  ;;  %v1260_v3 = vshrl.u32 %v4429_v61, 16 }
  0x1e   : > { %v822_v51 = vor.u32 %v821_v45, %v817_v39  ;;  %v809_v52 = vrot.slane %v807_v48, 1  ;;  %v814_v57 = vrot.slane %v812_v53, 1  ;;  %v1279_v1 = vshll.u32 %v4428_v60, 16  ;;  %v4430_v2 = vld [vmem:[%s4703_s17 + $0x20] ss:$0 sps:$4 sm:$0x11]  }
  0x1f   : > { %1047 = vrot.lane.b32.xlu1 %v1026_v35, %s4662_s19  ;;  %v371_v50 = vsel %vm347_vm1, %v366_v44, %v370_v42  ;;  %v1262_v4 = vshll.u32 %v4429_v61, 16  ;;  %v1276_v5 = vrot.slane %v1274_v0, 1  ;;  %v4431_v6 = vld [vmem:[%s4703_s17 + $0x18] sm:$0xff]   ;;  %v1267_v9 = vshll.u32 %v4430_v2, 16  ;;  %v4435_v26 = vld [vmem:[%s4703_s17 + $0x24] sm:$0xff]   ;;  %v4445_v43 = vld [vmem:[%s4703_s17 + $0x30] sm:$0xff]  }
  0x20   : > { %446 = vrot.lane.b32.xlu0 %v371_v50, %s4664_s21  ;;  %v827_v55 = vsel %vm347_vm1, %v822_v51, %v826_v49  ;;  %v810_v56 = vor.u32 %v809_v52, %v805_v47  ;;  %v1281_v7 = vrot.slane %v1279_v1, 1  ;;  %v4432_v10 = vld [vmem:[%s4703_s17 + $0x20] ss:$0 sps:$4 sm:$0x11]   ;;  %v373_v12 = vshrl.u32 %v4431_v6, 16  ;;  %v4447_v47 = vld [vmem:[%s4703_s17 + $0x24] sm:$0xff]  }
  0x21   : > { %v1264_v8 = vrot.slane %v1262_v4, 1  ;;  %v1277_v11 = vor.u32 %v1276_v5, %v1272_v63  ;;  %v375_v13 = vshll.u32 %v4431_v6, 16  ;;  %v1269_v15 = vrot.slane %v1267_v9, 1  ;;  %v4433_v17 = vld [vmem:[%s4703_s17 + $0x18] sm:$0xfe]  }
  0x22   : > { %v815_v62 = vsel %vm347_vm1, %v810_v56, %v814_v57  ;;  %v380_v16 = vshll.u32 %v4432_v10, 16  ;;  %v4434_v20 = vld [vmem:[%s4703_s17 + $0x20] ss:$0 sps:$4 sm:$0x11]   ;;  %v1476_v23 = vrot.slane %v4433_v17, 1  ;;  %v385_v30 = vshrl.u32 %v4435_v26, 16 }
  0x23   : > { %902 = vrot.lane.b32.xlu1 %v827_v55, %s4665_s22  ;;  %v1265_v14 = vor.u32 %v1264_v8, %v1260_v3  ;;  %v1282_v18 = vsel %vm347_vm1, %v1277_v11, %v1281_v7  ;;  %v377_v19 = vrot.slane %v375_v13, 1  ;;  %v1477_v25 = vrot.slane %v4434_v20, 1  ;;  %v4436_v27 = vld [vmem:[%s4703_s17 + $0x2c] ss:$0 sps:$4 sm:$0x11]   ;;  %v4443_v55 = vld [vmem:[%s4703_s17 + $0x30] sm:$0xff]  }
  0x24   : > { %900 = vrot.lane.b32.xlu0 %v815_v62, %s4665_s22  ;;  %v382_v22 = vrot.slane %v380_v16, 1  ;;  %v387_v31 = vshll.u32 %v4435_v26, 16  ;;  %v4437_v32 = vld [vmem:[%s4703_s17 + $0x24] sm:$0xfe]   ;;  %v392_v33 = vshll.u32 %v4436_v27, 16  ;;  %v843_v51 = vshll.u32 %v4445_v43, 16 }
  0x25   : > { %v1270_v21 = vsel %vm347_vm1, %v1265_v14, %v1269_v15  ;;  %v378_v24 = vor.u32 %v377_v19, %v373_v12  ;;  %v1478_v29 = vsel %vm565_vm0, %v1476_v23, %v1477_v25  ;;  %v4438_v34 = vld [vmem:[%s4703_s17 + $0x2c] ss:$0 sps:$4 sm:$0x11]   ;;  %v1479_v36 = vrot.slane %v4437_v32, 1  ;;  %v4439_v37 = vld [vmem:[%s4703_s17 + $0x24] sm:$0xfe]  }
  0x26   : > { %v389_v35 = vrot.slane %v387_v31, 1  ;;  %v394_v38 = vrot.slane %v392_v33, 1  ;;  %v1480_v39 = vrot.slane %v4438_v34, 1  ;;  %v4440_v40 = vld [vmem:[%s4703_s17 + $0x2c] ss:$0 sps:$4 sm:$0x11]  }
  0x27   : > { %1140 = vrot.lane.b32.xlu1 %v4425_v54, %s4666_s23  ;;  %v383_v28 = vsel %vm347_vm1, %v378_v24, %v382_v22  ;;  %v575_v42 = vrot.slane %v4439_v37, 1  ;;  %v576_v45 = vrot.slane %v4440_v40, 1  ;;  %v4441_v46 = vld [vmem:[%s4703_s17 + $0x18] sm:$0xfe]   ;;  %v841_v54 = vshrl.u32 %v4445_v43, 16  ;;  %v4444_v56 = vld [vmem:[%s4703_s17 + $0x24] sm:$0xff]  }
  0x28   : > { %1138 = vrot.lane.b32.xlu0 %v4426_v59, %s4666_s23  ;;  %v390_v41 = vor.u32 %v389_v35, %v385_v30  ;;  %v1481_v44 = vsel %vm565_vm0, %v1479_v36, %v1480_v39  ;;  %v4442_v49 = vld [vmem:[%s4703_s17 + $0x20] ss:$0 sps:$4 sm:$0x11]   ;;  %v572_v50 = vrot.slane %v4441_v46, 1  ;;  %v845_v57 = vrot.slane %v843_v51, 1  ;;  %v4457_v16 = vld [vmem:[%s4703_s17 + $0x30] sm:$0xff]  }
  0x29   : > { %v577_v52 = vsel %vm565_vm0, %v575_v42, %v576_v45  ;;  %v573_v53 = vrot.slane %v4442_v49, 1  ;;  %v831_v58 = vshll.u32 %v4447_v47, 16  ;;  %v4446_v60 = vld [vmem:[%s4703_s17 + $0x38] ss:$0 sps:$4 sm:$0x11]   ;;  %v829_v61 = vshrl.u32 %v4447_v47, 16 }
  0x2a   : > { %v395_v48 = vsel %vm347_vm1, %v390_v41, %v394_v38  ;;  %v846_v63 = vor.u32 %v845_v57, %v841_v54  ;;  %v848_v0 = vshll.u32 %v4446_v60, 16  ;;  %v4448_v1 = vld [vmem:[%s4703_s17 + $0x2c] ss:$0 sps:$4 sm:$0x11]   ;;  %v4449_v2 = vld [vmem:[%s4703_s17 + $0x30] sm:$0xfe]  }
  0x2b   : > { %1357 = vrot.lane.b32.xlu1 %v1282_v18, %s4667_s24  ;;  %v574_v59 = vsel %vm565_vm0, %v572_v50, %v573_v53  ;;  %v833_v62 = vrot.slane %v831_v58, 1  ;;  %v836_v5 = vshll.u32 %v4448_v1, 16  ;;  %v4450_v6 = vld [vmem:[%s4703_s17 + $0x38] ss:$0 sps:$4 sm:$0x11]   ;;  %v1030_v7 = vrot.slane %v4449_v2, 1 }
  0x2c   : > { %1355 = vrot.lane.b32.xlu0 %v1270_v21, %s4667_s24  ;;  %v850_v3 = vrot.slane %v848_v0, 1  ;;  %v1031_v10 = vrot.slane %v4450_v6, 1  ;;  %v4451_v11 = vld [vmem:[%s4703_s17 + $0x24] sm:$0xfe]   ;;  %v4455_v13 = vld [vmem:[%s4703_s17 + $0x3c] sm:$0xff]   ;;  %v1284_v21 = vshrl.u32 %v4457_v16, 16 }
  0x2d   : > { %v834_v4 = vor.u32 %v833_v62, %v829_v61  ;;  %v838_v9 = vrot.slane %v836_v5, 1  ;;  %v4452_v12 = vld [vmem:[%s4703_s17 + $0x2c] ss:$0 sps:$4 sm:$0x11]   ;;  %v1027_v15 = vrot.slane %v4451_v11, 1  ;;  %v1296_v18 = vshrl.u32 %v4455_v13, 16 }
  0x2e   : > { %v851_v8 = vsel %vm347_vm1, %v846_v63, %v850_v3  ;;  %v1028_v17 = vrot.slane %v4452_v12, 1  ;;  %v1032_v19 = vsel %vm565_vm0, %v1030_v7, %v1031_v10  ;;  %v1298_v20 = vshll.u32 %v4455_v13, 16  ;;  %v4453_v23 = vld [vmem:[%s4703_s17 + $0x3c] sm:$0xff]   ;;  %v4454_v24 = vld [vmem:[%s4703_s17 + $0x30] sm:$0xff]  }
  0x2f   : > { %448 = vrot.lane.b32.xlu1 %v383_v28, %s4664_s21  ;;  %v839_v14 = vsel %vm347_vm1, %v834_v4, %v838_v9  ;;  %v4456_v25 = vld [vmem:[%s4703_s17 + $0x44] ss:$0 sps:$4 sm:$0x11]   ;;  %v1286_v26 = vshll.u32 %v4457_v16, 16  ;;  %v4459_v28 = vld [vmem:[%s4703_s17 + $0x30] sm:$0xff]   ;;  %v4469_v54 = vld [vmem:[%s4703_s17 + $0x3c] sm:$0xff]  }
  0x30   : > { %1500 = vrot.lane.b32.xlu0 %v1478_v29, %s4668_s25  ;;  %v1029_v22 = vsel %vm565_vm0, %v1027_v15, %v1028_v17  ;;  %v1300_v27 = vrot.slane %v1298_v20, 1  ;;  %v1303_v29 = vshll.u32 %v4456_v25, 16  ;;  %v4458_v30 = vld [vmem:[%s4703_s17 + $0x38] ss:$0 sps:$4 sm:$0x11]   ;;  %v4463_v32 = vld [vmem:[%s4703_s17 + $0x60] sm:$0xff]  }
  0x31   : > { %v1288_v31 = vrot.slane %v1286_v26, 1  ;;  %v1291_v36 = vshll.u32 %v4458_v30, 16  ;;  %v4460_v37 = vld [vmem:[%s4703_s17 + $0x38] ss:$0 sps:$4 sm:$0x11]   ;;  %v397_v38 = vshrl.u32 %v4459_v28, 16 }
  0x32   : > { %v1301_v33 = vor.u32 %v1300_v27, %v1296_v18  ;;  %v1305_v34 = vrot.slane %v1303_v29, 1  ;;  %v399_v39 = vshll.u32 %v4459_v28, 16  ;;  %v1991_v40 = vshrl.u32 %v4463_v32, 16  ;;  %v4461_v43 = vld [vmem:[%s4703_s17 + $0x30] sm:$0xfe]   ;;  %v4475_v27 = vld [vmem:[%s4703_s17 + $0x3c] sm:$0xff]  }
  0x33   : > { %450 = vrot.lane.b32.xlu1 %v395_v48, %s4664_s21  ;;  %v1289_v35 = vor.u32 %v1288_v31, %v1284_v21  ;;  %v1293_v41 = vrot.slane %v1291_v36, 1  ;;  %v404_v42 = vshll.u32 %v4460_v37, 16  ;;  %v4462_v46 = vld [vmem:[%s4703_s17 + $0x38] ss:$0 sps:$4 sm:$0x11]   ;;  %v1482_v49 = vrot.slane %v4461_v43, 1 }
  0x34   : > { %1502 = vrot.lane.b32.xlu0 %v1481_v44, %s4668_s25  ;;  %v1306_v44 = vsel %vm347_vm1, %v1301_v33, %v1305_v34  ;;  %v401_v45 = vrot.slane %v399_v39, 1  ;;  %v1483_v51 = vrot.slane %v4462_v46, 1  ;;  %v1993_v53 = vshll.u32 %v4463_v32, 16  ;;  %v4466_v60 = vld [vmem:[%s4703_s17 + $0x44] ss:$0 sps:$4 sm:$0x11]  }
  0x35   : > { %v1294_v47 = vsel %vm347_vm1, %v1289_v35, %v1293_v41  ;;  %v406_v48 = vrot.slane %v404_v42, 1  ;;  %v409_v61 = vshrl.u32 %v4469_v54, 16  ;;  %v1486_v1 = vrot.slane %v4466_v60, 1  ;;  %v4467_v2 = vld [vmem:[%s4703_s17 + $0x30] sm:$0xfe]   ;;  %v4481_v32 = vld [vmem:[%s4703_s17 + $0x3c] sm:$0xff]  }
  0x36   : > { %v402_v50 = vor.u32 %v401_v45, %v397_v38  ;;  %v1995_v57 = vrot.slane %v1993_v53, 1  ;;  %v4468_v3 = vld [vmem:[%s4703_s17 + $0x38] ss:$0 sps:$4 sm:$0x11]   ;;  %v578_v6 = vrot.slane %v4467_v2, 1  ;;  %v411_v9 = vshll.u32 %v4469_v54, 16 }
  0x37   : > { %596 = vrot.lane.b32.xlu1 %v577_v52, %s4663_s20  ;;  %v4464_v52 = vld [vmem:[%s4703_s17 + $0x68] ss:$0 sps:$4 sm:$0x11]   ;;  %v579_v7 = vrot.slane %v4468_v3, 1  ;;  %v4471_v12 = vld [vmem:[%s4703_s17 + $0x60] sm:$0xfe]  }
  0x38   : > { %594 = vrot.lane.b32.xlu0 %v574_v59, %s4663_s20  ;;  %v1998_v58 = vshll.u32 %v4464_v52, 16  ;;  %v4465_v59 = vld [vmem:[%s4703_s17 + $0x3c] sm:$0xfe]   ;;  %v1996_v62 = vor.u32 %v1995_v57, %v1991_v40  ;;  %v413_v10 = vrot.slane %v411_v9, 1  ;;  %v4473_v15 = vld [vmem:[%s4703_s17 + $0x6c] sm:$0xff]   ;;  %v2206_v18 = vrot.slane %v4471_v12, 1 }
  0x39   : > { %v1485_v0 = vrot.slane %v4465_v59, 1  ;;  %v580_v13 = vsel %vm565_vm0, %v578_v6, %v579_v7  ;;  %v4474_v20 = vld [vmem:[%s4703_s17 + $0x74] ss:$0 sps:$4 sm:$0x11]   ;;  %v2003_v21 = vshrl.u32 %v4473_v15, 16  ;;  %v4478_v37 = vld [vmem:[%s4703_s17 + $0x6c] sm:$0xff]  }
  0x3a   : > { %v2000_v63 = vrot.slane %v1998_v58, 1  ;;  %v414_v16 = vor.u32 %v413_v10, %v409_v61  ;;  %v2010_v26 = vshll.u32 %v4474_v20, 16  ;;  %v4476_v28 = vld [vmem:[%s4703_s17 + $0x3c] sm:$0xfe]   ;;  %v4479_v36 = vld [vmem:[%s4703_s17 + $0x6c] sm:$0xfe]  }
  0x3b   : > { %689 = vrot.lane.b32.xlu1 %v4443_v55, %s4661_s18  ;;  %v407_v55 = vsel %vm347_vm1, %v402_v50, %v406_v48  ;;  %v1487_v5 = vsel %vm565_vm0, %v1485_v0, %v1486_v1  ;;  %v4477_v29 = vld [vmem:[%s4703_s17 + $0x44] ss:$0 sps:$4 sm:$0x11]   ;;  %v581_v33 = vrot.slane %v4476_v28, 1  ;;  %v853_v39 = vshrl.u32 %v4481_v32, 16  ;;  %v4483_v52 = vld [vmem:[%s4703_s17 + $0x48] sm:$0xff]  }
  0x3c   : > { %687 = vrot.lane.b32.xlu0 %v4444_v56, %s4661_s18  ;;  %v1484_v56 = vsel %vm565_vm0, %v1482_v49, %v1483_v51  ;;  %v2001_v4 = vsel %vm347_vm1, %v1996_v62, %v2000_v63  ;;  %v2012_v31 = vrot.slane %v2010_v26, 1  ;;  %v582_v34 = vrot.slane %v4477_v29, 1  ;;  %v4480_v38 = vld [vmem:[%s4703_s17 + $0x74] ss:$0 sps:$4 sm:$0x11]   ;;  %v4493_v57 = vld [vmem:[%s4703_s17 + $0x78] sm:$0xff]  }
  0x3d   : > { %v2209_v41 = vrot.slane %v4479_v36, 1  ;;  %v4482_v42 = vld [vmem:[%s4703_s17 + $0x44] ss:$0 sps:$4 sm:$0x11]   ;;  %v2210_v43 = vrot.slane %v4480_v38, 1  ;;  %v4486_v1 = vld [vmem:[%s4703_s17 + $0x78] sm:$0xff]  }
  0x3e   : > { %v583_v40 = vsel %vm565_vm0, %v581_v33, %v582_v34  ;;  %v860_v45 = vshll.u32 %v4482_v42, 16  ;;  %v4485_v50 = vld [vmem:[%s4703_s17 + $0x74] ss:$0 sps:$4 sm:$0x11]   ;;  %v4487_v60 = vld [vmem:[%s4703_s17 + $0x3c] sm:$0xfe]  }
  0x3f   : > { %906 = vrot.lane.b32.xlu1 %v851_v8, %s4665_s22  ;;  %v4470_v8 = vld [vmem:[%s4703_s17 + $0x44] ss:$0 sps:$4 sm:$0x11]   ;;  %v2211_v48 = vsel %vm565_vm0, %v2209_v41, %v2210_v43  ;;  %v1033_v2 = vrot.slane %v4487_v60, 1  ;;  %v2455_v6 = vshrl.u32 %v4493_v57, 16  ;;  %v2457_v9 = vshll.u32 %v4493_v57, 16 }
  0x40   : > { %904 = vrot.lane.b32.xlu0 %v839_v14, %s4665_s22  ;;  %v416_v11 = vshll.u32 %v4470_v8, 16  ;;  %v4472_v14 = vld [vmem:[%s4703_s17 + $0x68] ss:$0 sps:$4 sm:$0x11]   ;;  %v862_v49 = vrot.slane %v860_v45, 1  ;;  %v4498_v38 = vld [vmem:[%s4703_s17 + $0x78] sm:$0xff]  }
  0x41   : > { %v4488_v61 = vld [vmem:[%s4703_s17 + $0x44] ss:$0 sps:$4 sm:$0x11]   ;;  %v4492_v12 = vld [vmem:[%s4703_s17 + $0x74] ss:$0 sps:$4 sm:$0x11]  }
  0x42   : > { %v418_v17 = vrot.slane %v416_v11, 1  ;;  %v1034_v3 = vrot.slane %v4488_v61, 1  ;;  %v4491_v11 = vld [vmem:[%s4703_s17 + $0x6c] sm:$0xfe]   ;;  %v4504_v43 = vld [vmem:[%s4703_s17 + $0x78] sm:$0xff]  }
  0x43   : > { %1051 = vrot.lane.b32.xlu1 %v1032_v19, %s4662_s19  ;;  %v2207_v19 = vrot.slane %v4472_v14, 1  ;;  %v4495_v28 = vld [vmem:[%s4703_s17 + $0x48] sm:$0xff]   ;;  %v4500_v34 = vld [vmem:[%s4703_s17 + $0x80] ss:$0 sps:$4 sm:$0x11]  }
  0x44   : > { %1049 = vrot.lane.b32.xlu0 %v1029_v22, %s4662_s19  ;;  %v2005_v22 = vshll.u32 %v4473_v15, 16  ;;  %v1035_v14 = vsel %vm565_vm0, %v1033_v2, %v1034_v3  ;;  %v4505_v45 = vld [vmem:[%s4703_s17 + $0x80] ss:$0 sps:$4 sm:$0x11]   ;;  %v4506_v3 = vld [vmem:[%s4703_s17 + $0x84] sm:$0xff]  }
  0x46   : > { %v2007_v25 = vrot.slane %v2005_v22, 1  ;;  %v4501_v22 = vld [vmem:[%s4703_s17 + $0x48] sm:$0xff]  }
  0x47   : > { %1144 = vrot.lane.b32.xlu1 %v4453_v23, %s4666_s23  ;;  %v419_v23 = vsel %vm347_vm1, %v414_v16, %v418_v17  ;;  %v2658_v16 = vrot.slane %v4491_v11, 1  ;;  %v2659_v17 = vrot.slane %v4492_v12, 1  ;;  %v1310_v33 = vshll.u32 %v4501_v22, 16  ;;  %v4512_v11 = vld [vmem:[%s4703_s17 + $0x80] ss:$0 sps:$4 sm:$0x11]  }
  0x48   : > { %1142 = vrot.lane.b32.xlu0 %v4454_v24, %s4666_s23  ;;  %v2208_v24 = vsel %vm565_vm0, %v2206_v18, %v2207_v19  ;;  %v2008_v30 = vor.u32 %v2007_v25, %v2003_v21  ;;  %v4494_v18 = vld [vmem:[%s4703_s17 + $0x80] ss:$0 sps:$4 sm:$0x11]   ;;  %v2459_v19 = vrot.slane %v2457_v9, 1 }
  0x49   : > { %v2462_v21 = vshll.u32 %v4494_v18, 16  ;;  %v2660_v25 = vsel %vm565_vm0, %v2658_v16, %v2659_v17  ;;  %v4514_v16 = vld [vmem:[%s4703_s17 + $0x8c] ss:$0 sps:$4 sm:$0x11]  }
  0x4a   : > { %v2013_v35 = vsel %vm347_vm1, %v2008_v30, %v2012_v31  ;;  %v4518_v18 = vld [vmem:[%s4703_s17 + $0x48] sm:$0xff]  }
  0x4b   : > { %1361 = vrot.lane.b32.xlu1 %v1306_v44, %s4667_s24  ;;  %v855_v44 = vshll.u32 %v4481_v32, 16  ;;  %v2464_v26 = vrot.slane %v2462_v21, 1  ;;  %v4499_v32 = vld [vmem:[%s4703_s17 + $0x78] sm:$0xfe]   ;;  %v4520_v21 = vld [vmem:[%s4703_s17 + $0xc] sm:$0xff]  }
  0x4c   : > { %1359 = vrot.lane.b32.xlu0 %v1294_v47, %s4667_s24  ;;  %v4484_v47 = vld [vmem:[%s4703_s17 + $0x6c] sm:$0xff]   ;;  %v2661_v36 = vrot.slane %v4499_v32, 1  ;;  %252 = vst.msk [vmem:[#allocation2 + $0x8] sm:$0xff] %vm250_vm2, %v4520_v21 }
  0x4d   : > { %v857_v46 = vrot.slane %v855_v44, 1  ;;  %v2443_v53 = vshrl.u32 %v4484_v47, 16  ;;  %v2445_v54 = vshll.u32 %v4484_v47, 16  ;;  %v2895_v47 = vshrl.u32 %v4504_v43, 16 }
  0x4f   : > { %452 = vrot.lane.b32.xlu1 %v407_v55, %s4664_s21  ;;  %v858_v51 = vor.u32 %v857_v46, %v853_v39  ;;  %v4489_v55 = vld [vmem:[%s4703_s17 + $0x48] sm:$0xff]   ;;  %v2447_v59 = vrot.slane %v2445_v54, 1  ;;  %v2662_v39 = vrot.slane %v4500_v34, 1  ;;  %v423_v34 = vshll.u32 %v4518_v18, 16 }
  0x50   : > { %1504 = vrot.lane.b32.xlu0 %v1484_v56, %s4668_s25  ;;  %v2450_v56 = vshll.u32 %v4485_v50, 16  ;;  %v865_v63 = vshrl.u32 %v4489_v55, 16 }
  0x51   : > { %v863_v58 = vsel %vm347_vm1, %v858_v51, %v862_v49  ;;  %v2448_v0 = vor.u32 %v2447_v59, %v2443_v53  ;;  %v4509_v49 = vld [vmem:[%s4703_s17 + $0x54] sm:$0xff]   ;;  %v2663_v50 = vsel %vm565_vm0, %v2661_v36, %v2662_v39  ;;  %v2902_v51 = vshll.u32 %v4505_v45, 16 }
  0x52   : > { %v2452_v62 = vrot.slane %v2450_v56, 1  ;;  %v4503_v53 = vld [vmem:[%s4703_s17 + $0x54] sm:$0xff]   ;;  %v4508_v56 = vld [vmem:[%s4703_s17 + $0x50] ss:$0 sps:$4 sm:$0x11]   ;;  %v1320_v59 = vshrl.u32 %v4509_v49, 16 }
  0x53   : > { %2086 = vrot.lane.b32.xlu1 %v2001_v4, %s4664_s21  ;;  %v867_v4 = vshll.u32 %v4489_v55, 16  ;;  %v4507_v55 = vld [vmem:[%s4703_s17 + $0x48] sm:$0xfe]   ;;  %v425_v39 = vrot.slane %v423_v34, 1 }
  0x54   : > { %1506 = vrot.lane.b32.xlu0 %v1487_v5, %s4668_s25  ;;  %v4490_v5 = vld [vmem:[%s4703_s17 + $0x50] ss:$0 sps:$4 sm:$0x11]   ;;  %v2453_v7 = vsel %vm347_vm1, %v2448_v0, %v2452_v62  ;;  %v1488_v61 = vrot.slane %v4507_v55, 1  ;;  %v1489_v62 = vrot.slane %v4508_v56, 1  ;;  %v4515_v0 = vld [vmem:[%s4703_s17] sm:$0xff]  }
  0x55   : > { %v869_v8 = vrot.slane %v867_v4, 1  ;;  %v872_v10 = vshll.u32 %v4490_v5, 16  ;;  %251 = vst.msk [vmem:[#allocation2] sm:$0xff] %vm250_vm2, %v4515_v0  ;;  %v4526_v56 = vld [vmem:[%s4703_s17 + $0x5c] ss:$0 sps:$4 sm:$0x11]  }
  0x56   : > { %v4527_v0 = vld [vmem:[%s4703_s17 + $0x48] sm:$0xfe]  }
  0x57   : > { %598 = vrot.lane.b32.xlu1 %v580_v13, %s4663_s20  ;;  %v870_v13 = vor.u32 %v869_v8, %v865_v63  ;;  %v874_v15 = vrot.slane %v872_v10, 1  ;;  %v1322_v63 = vshll.u32 %v4509_v49, 16  ;;  %v4511_v10 = vld [vmem:[%s4703_s17 + $0x78] sm:$0xfe]  }
  0x58   : > { %454 = vrot.lane.b32.xlu0 %v419_v23, %s4664_s21  ;;  %v2460_v23 = vor.u32 %v2459_v19, %v2455_v6  ;;  %v1490_v19 = vsel %vm565_vm0, %v1488_v61, %v1489_v62 }
  0x59   : > { %v875_v20 = vsel %vm347_vm1, %v870_v13, %v874_v15  ;;  %v1324_v4 = vrot.slane %v1322_v63, 1  ;;  %v3111_v15 = vrot.slane %v4512_v11, 1  ;;  %v440_v63 = vshll.u32 %v4526_v56, 16  ;;  %v4530_v11 = vld [vmem:[%s4703_s17 + $0x8c] ss:$0 sps:$4 sm:$0x11]  }
  0x5a   : > { %v2465_v30 = vsel %vm347_vm1, %v2460_v23, %v2464_v26 }
  0x5b   : > { %2230 = vrot.lane.b32.xlu1 %v2208_v24, %s4663_s20  ;;  %v4496_v24 = vld [vmem:[%s4703_s17 + $0x48] sm:$0xfe]   ;;  %v1325_v12 = vor.u32 %v1324_v4, %v1320_v59 }
  0x5c   : > { %2088 = vrot.lane.b32.xlu0 %v2013_v35, %s4664_s21  ;;  %v1036_v29 = vrot.slane %v4496_v24, 1  ;;  %v1308_v35 = vshrl.u32 %v4501_v22, 16  ;;  %v4516_v22 = vld [vmem:[%s4703_s17 + $0x54] sm:$0xfe]  }
  0x5f   : > { %691 = vrot.lane.b32.xlu1 %v4475_v27, %s4661_s18  ;;  %v4497_v27 = vld [vmem:[%s4703_s17 + $0x50] ss:$0 sps:$4 sm:$0x11]  }
  0x60   : > { %600 = vrot.lane.b32.xlu0 %v583_v40, %s4663_s20  ;;  %v1037_v31 = vrot.slane %v4497_v27, 1  ;;  %v4502_v40 = vld [vmem:[%s4703_s17 + $0x50] ss:$0 sps:$4 sm:$0x11]  }
  0x61   : > { %v1315_v42 = vshll.u32 %v4502_v40, 16 }
  0x62   : > { %v1038_v41 = vsel %vm565_vm0, %v1036_v29, %v1037_v31  ;;  %v1491_v29 = vrot.slane %v4516_v22, 1  ;;  %v4533_v22 = vld [vmem:[%s4703_s17 + $0x54] sm:$0xfe]  }
  0x63   : > { %2322 = vrot.lane.b32.xlu1 %v4478_v37, %s4661_s18  ;;  %v1312_v37 = vrot.slane %v1310_v33, 1  ;;  %v1317_v46 = vrot.slane %v1315_v42, 1  ;;  %v421_v33 = vshrl.u32 %v4518_v18, 16  ;;  %v2034_v18 = vshll.u32 %v4530_v11, 16 }
  0x64   : > { %2232 = vrot.lane.b32.xlu0 %v2211_v48, %s4663_s20  ;;  %v2897_v48 = vshll.u32 %v4504_v43, 16  ;;  %v4521_v43 = vld [vmem:[%s4703_s17 + $0x84] sm:$0xfe]  }
  0x65   : > { %v1313_v44 = vor.u32 %v1312_v37, %v1308_v35  ;;  %v4523_v35 = vld [vmem:[%s4703_s17 + $0x78] sm:$0xff]   ;;  %v4551_v11 = vld [vmem:[%s4703_s17 + $0x68] ss:$0 sps:$4 sm:$0x11]  }
  0x66   : > { %v2899_v54 = vrot.slane %v2897_v48, 1  ;;  %v2015_v40 = vshrl.u32 %v4523_v35, 16  ;;  %v3113_v48 = vrot.slane %v4521_v43, 1  ;;  %v4541_v43 = vld [vmem:[%s4703_s17 + $0x24] sm:$0xff]  }
  0x67   : > { %908 = vrot.lane.b32.xlu1 %v863_v58, %s4665_s22  ;;  %v1318_v57 = vsel %vm347_vm1, %v1313_v44, %v1317_v46  ;;  %v2904_v58 = vrot.slane %v2902_v51, 1  ;;  %v4522_v44 = vld [vmem:[%s4703_s17 + $0x8c] ss:$0 sps:$4 sm:$0x11]   ;;  %v2017_v51 = vshll.u32 %v4523_v35, 16  ;;  %v4537_v35 = vld [vmem:[%s5390_s1] sm:$0xff]  }
  0x68   : > { %693 = vrot.lane.b32.xlu0 %v4483_v52, %s4661_s18  ;;  %v4513_v52 = vld [vmem:[%s4703_s17 + $0x84] sm:$0xff]   ;;  %v2900_v60 = vor.u32 %v2899_v54, %v2895_v47  ;;  %v426_v47 = vor.u32 %v425_v39, %v421_v33  ;;  %v3114_v49 = vrot.slane %v4522_v44, 1  ;;  %v4535_v33 = vld [vmem:[%s4703_s17 + $0x54] sm:$0xff]   ;;  %4344 = vmatprep.subr.bf16.mxu0 %v4537_v35  ;;  %v4539_v39 = vld [vmem:[%s4703_s17 + $0x8c] ss:$0 sps:$4 sm:$0x11]  }
  0x69   : > { %v2907_v2 = vshrl.u32 %v4513_v52, 16  ;;  %v2909_v5 = vshll.u32 %v4513_v52, 16  ;;  %v2019_v54 = vrot.slane %v2017_v51, 1  ;;  %4345 = vmatpush3.bf16.msra.mxu0 %v4537_v35  ;;  %v2216_v44 = vrot.slane %v4539_v39, 1  ;;  %254 = vst.msk [vmem:[#allocation2 + $0x18] sm:$0xff] %vm250_vm2, %v4541_v43 }
  0x6a   : > { %v2905_v6 = vsel %vm347_vm1, %v2900_v60, %v2904_v58  ;;  %v4546_v51 = vld [vmem:[%s5390_s1 + $0x10] ss:$0 sps:$4 sm:$0x33]   ;;  %v4558_v43 = vld [vmem:[%s4703_s17 + $0x60] sm:$0xfe]  }
  0x6b   : > { %2538 = vrot.lane.b32.xlu1 %v2453_v7, %s4665_s22  ;;  %v2911_v17 = vrot.slane %v2909_v5, 1  ;;  %v2020_v61 = vor.u32 %v2019_v54, %v2015_v40  ;;  %v442_v5 = vrot.slane %v440_v63, 1  ;;  %v4540_v40 = vld [vmem:[%s4703_s17 + $0x84] sm:$0xff]  }
  0x6c   : > { %2324 = vrot.lane.b32.xlu0 %v4486_v1, %s4661_s18  ;;  %v4510_v1 = vld [vmem:[%s4703_s17 + $0x5c] ss:$0 sps:$4 sm:$0x11]  }
  0x6d   : > { %v1327_v9 = vshll.u32 %v4510_v1, 16  ;;  %v2912_v26 = vor.u32 %v2911_v17, %v2907_v2  ;;  %v4528_v2 = vld [vmem:[%s4703_s17 + $0x50] ss:$0 sps:$4 sm:$0x11]  }
  0x6f   : > { %1053 = vrot.lane.b32.xlu1 %v1035_v14, %s4662_s19  ;;  %v1329_v13 = vrot.slane %v1327_v9, 1  ;;  %v3110_v14 = vrot.slane %v4511_v10, 1  ;;  %v585_v9 = vrot.slane %v4528_v2, 1  ;;  %v4529_v10 = vld [vmem:[%s4703_s17 + $0x84] sm:$0xff]  }
  0x70   : > { %910 = vrot.lane.b32.xlu0 %v875_v20, %s4665_s22  ;;  %v2914_v20 = vshll.u32 %v4514_v16, 16  ;;  %v4531_v16 = vld [vmem:[%s4703_s17 + $0x78] sm:$0xfe]  }
  0x71   : > { %v1330_v23 = vsel %vm347_vm1, %v1325_v12, %v1329_v13  ;;  %v3112_v31 = vsel %vm565_vm0, %v3110_v14, %v3111_v15  ;;  %v2029_v15 = vshll.u32 %v4529_v10, 16  ;;  %v2212_v21 = vrot.slane %v4531_v16, 1 }
  0x72   : > { %v2916_v27 = vrot.slane %v2914_v20, 1  ;;  %v896_v16 = vshll.u32 %v4551_v11, 16 }
  0x73   : > { %2682 = vrot.lane.b32.xlu1 %v2660_v25, %s4662_s19  ;;  %v2031_v20 = vrot.slane %v2029_v15, 1 }
  0x74   : > { %2540 = vrot.lane.b32.xlu0 %v2465_v30, %s4665_s22  ;;  %v4519_v30 = vld [vmem:[%s4703_s17 + $0x50] ss:$0 sps:$4 sm:$0x11]   ;;  %v2917_v37 = vsel %vm347_vm1, %v2912_v26, %v2916_v27  ;;  %v4534_v27 = vld [vmem:[%s4703_s17 + $0x5c] ss:$0 sps:$4 sm:$0x11]  }
  0x75   : > { %v428_v36 = vshll.u32 %v4519_v30, 16 }
  0x77   : > { %1146 = vrot.lane.b32.xlu1 %v4495_v28, %s4666_s23  ;;  %v4517_v28 = vld [vmem:[%s4703_s17 + $0x5c] ss:$0 sps:$4 sm:$0x11]   ;;  %v430_v42 = vrot.slane %v428_v36, 1 }
  0x78   : > { %1055 = vrot.lane.b32.xlu0 %v1038_v41, %s4662_s19  ;;  %v1492_v32 = vrot.slane %v4517_v28, 1  ;;  %v4525_v41 = vld [vmem:[%s4703_s17 + $0x54] sm:$0xff]   ;;  %v587_v28 = vrot.slane %v4533_v22, 1 }
  0x79   : > { %v431_v52 = vsel %vm347_vm1, %v426_v47, %v430_v42  ;;  %v433_v58 = vshrl.u32 %v4525_v41, 16  ;;  %v435_v59 = vshll.u32 %v4525_v41, 16 }
  0x7a   : > { %v1493_v46 = vsel %vm565_vm0, %v1491_v29, %v1492_v32  ;;  %v4536_v29 = vld [vmem:[%s4703_s17 + $0x18] sm:$0xff]   ;;  %v588_v32 = vrot.slane %v4534_v27, 1 }
  0x7b   : > { %2774 = vrot.lane.b32.xlu1 %v4498_v38, %s4666_s23  ;;  %v437_v1 = vrot.slane %v435_v59, 1  ;;  %253 = vst.msk [vmem:[#allocation2 + $0x10] sm:$0xff] %vm250_vm2, %v4536_v29  ;;  %v4550_v59 = vld [vmem:[%s4703_s17 + $0x60] sm:$0xff]   ;;  %v4555_v29 = vld [vmem:[%s4703_s17 + $0x98] ss:$0 sps:$4 sm:$0x11]  }
  0x7c   : > { %2684 = vrot.lane.b32.xlu0 %v2663_v50, %s4662_s19  ;;  %v4524_v50 = vld [vmem:[%s4703_s17 + $0x80] ss:$0 sps:$4 sm:$0x11]   ;;  %v889_v2 = vshrl.u32 %v4550_v59, 16 }
  0x7d   : > { %v2022_v55 = vshll.u32 %v4524_v50, 16  ;;  %v4543_v50 = vld [vmem:[%s4703_s17 + $0x60] sm:$0xff]  }
  0x7f   : > { %1363 = vrot.lane.b32.xlu1 %v1318_v57, %s4667_s24  ;;  %v3115_v57 = vsel %vm565_vm0, %v3113_v48, %v3114_v49  ;;  %v2024_v62 = vrot.slane %v2022_v55, 1  ;;  %v4544_v48 = vld [vmem:[%s4703_s17 + $0x54] sm:$0xff]   ;;  %v4545_v49 = vld [vmem:[%s4703_s17 + $0x5c] ss:$0 sps:$4 sm:$0x11]   ;;  %v4548_v55 = vld [vmem:[%s4703_s17 + $0x84] sm:$0xff]  }
  0x80   : > { %1148 = vrot.lane.b32.xlu0 %v4503_v53, %s4666_s23  ;;  %v884_v54 = vshll.u32 %v4545_v49, 16  ;;  %v2469_v63 = vshll.u32 %v4548_v55, 16  ;;  %v1042_v49 = vrot.slane %v4558_v43, 1 }
  0x83   : > { %2990 = vrot.lane.b32.xlu1 %v2905_v6, %s4667_s24  ;;  %v584_v6 = vrot.slane %v4527_v0, 1  ;;  %v4547_v0 = vld [vmem:[%s4703_s17 + $0x90] sm:$0xff]  }
  0x84   : > { %v4909_v7 = vpop.permute.xlu1 %685  ;;  %v4911_v8 = vpop.permute.xlu0 %683  ;;  %2776 = vrot.lane.b32.xlu0 %v4506_v3, %s4666_s23  ;;  %v2025_v3 = vsel %vm347_vm1, %v2020_v61, %v2024_v62  ;;  %v886_v61 = vrot.slane %v884_v54, 1  ;;  %v2467_v62 = vshrl.u32 %v4548_v55, 16 }
  0x85   : > { %v586_v14 = vsel %vm565_vm0, %v584_v6, %v585_v9 }
  0x87   : > { %1508 = vrot.lane.b32.xlu1 %v1490_v19, %s4668_s25  ;;  %v4532_v19 = vld [vmem:[%s4703_s17 + $0x80] ss:$0 sps:$4 sm:$0x11]  }
  0x88   : > { %v4924_v24 = vpop.permute.xlu0 %1045  ;;  %1365 = vrot.lane.b32.xlu0 %v1330_v23, %s4667_s24  ;;  %v2213_v26 = vrot.slane %v4532_v19, 1  ;;  %v4553_v19 = vld [vmem:[%s4703_s17 + $0x5c] ss:$0 sps:$4 sm:$0x11]  }
  0x89   : > { %v591_v25 = vpop.permute.xlu1 %590 }
  0x8a   : > { %v2214_v30 = vsel %vm565_vm0, %v2212_v21, %v2213_v26  ;;  %v898_v26 = vrot.slane %v896_v16, 1 }
  0x8b   : > { %3134 = vrot.lane.b32.xlu1 %v3112_v31, %s4668_s25 }
  0x8c   : > { %2992 = vrot.lane.b32.xlu0 %v2917_v37, %s4667_s24  ;;  %v4538_v37 = vld [vmem:[%s4703_s17 + $0x84] sm:$0xfe]  }
  0x8d   : > { %v593_v38 = vpop.permute.xlu1 %592  ;;  %v2215_v42 = vrot.slane %v4538_v37, 1 }
  0x8e   : > { %v445_v45 = vpop.permute.xlu0 %444 }
  0x8f   : > { %469 = vst.msk [vmem:[#allocation2] sm:$0xff] %vm468_vm3, %v445_v45  ;;  %1510 = vrot.lane.b32.xlu1 %v1493_v46, %s4668_s25  ;;  %v4542_v45 = vld [vmem:[%s5390_s1 + $0x8] sm:$0xff]   ;;  %v2217_v47 = vsel %vm565_vm0, %v2215_v42, %v2216_v44 }
  0x90   : > { %615 = vst.msk [vmem:[#allocation2] sm:$0xff] %vm614_vm4, %v591_v25  ;;  %456 = vrot.lane.b32.xlu0 %v431_v52, %s4664_s21  ;;  %v2036_v25 = vrot.slane %v2034_v18, 1  ;;  %4346 = vmatprep.subr.bf16.mxu0 %v4542_v45  ;;  %v877_v52 = vshrl.u32 %v4544_v48, 16  ;;  %v4559_v44 = vld [vmem:[%s4703_s17 + $0x68] ss:$0 sps:$4 sm:$0x11]  }
  0x91   : > { %v1048_v53 = vpop.permute.xlu1 %1047  ;;  %708 = vst.msk [vmem:[#allocation2] sm:$0xff] %vm707_vm5, %v4911_v8  ;;  %v438_v8 = vor.u32 %v437_v1, %v433_v58  ;;  %4347 = vmatpush3.bf16.msra.mxu0 %v4542_v45  ;;  %v1588_v58 = vsel %vm1586_vm11, %v4546_v51, 0  ;;  %v4549_v1 = vld [vmem:[%s4703_s17 + $0x8c] ss:$0 sps:$4 sm:$0x11]  }
  0x92   : > { %v447_v60 = vpop.permute.xlu0 %446  ;;  %4388 = vmatprep.subr.msk.bf16.mxu0 %vm1586_vm11, %v4546_v51  ;;  %v4560_v51 = vld [vmem:[%s4703_s17 + $0x60] sm:$0xff]  }
  0x93   : > { %470 = vst.msk [vmem:[#allocation2 + $0x8] sm:$0xff] %vm468_vm3, %v447_v60  ;;  %3136 = vrot.lane.b32.xlu1 %v3115_v57, %s4668_s25  ;;  %v443_v13 = vsel %vm347_vm1, %v438_v8, %v442_v5  ;;  %v891_v5 = vshll.u32 %v4550_v59, 16 }
  0x94   : > { %616 = vst.msk [vmem:[#allocation2 + $0x8] sm:$0xff] %vm614_vm4, %v593_v38  ;;  %2090 = vrot.lane.b32.xlu0 %v2025_v3, %s4664_s21  ;;  %v589_v38 = vsel %vm565_vm0, %v587_v28, %v588_v32  ;;  %v1040_v28 = vrot.slane %v4553_v19, 1 }
  0x95   : > { %v903_v4 = vpop.permute.xlu1 %902  ;;  %709 = vst.msk [vmem:[#allocation2 + $0x8] sm:$0xff] %vm707_vm5, %v4909_v7  ;;  %v2027_v7 = vshrl.u32 %v4529_v10, 16  ;;  %4349 = vmatpush3.bf16.msra.mxu0 %v1588_v58  ;;  %v2474_v10 = vshll.u32 %v4549_v1, 16  ;;  %v4564_v1 = vld [vmem:[%s4703_s17 + $0x6c] sm:$0xff]  }
  0x96   : > { %926 = vst.msk [vmem:[#allocation2 + $0x8] sm:$0xff] %vm924_vm6, %v903_v4  ;;  %v901_v12 = vpop.permute.xlu0 %900  ;;  %v2471_v4 = vrot.slane %v2469_v63, 1  ;;  %v4563_v63 = vld [vmem:[%s4703_s17 + $0x90] sm:$0xff]  }
  0x97   : > { %925 = vst.msk [vmem:[#allocation2] sm:$0xff] %vm924_vm6, %v901_v12  ;;  %602 = vrot.lane.b32.xlu1 %v586_v14, %s4663_s20  ;;  %v4554_v12 = vld [vmem:[%s4703_s17 + $0x90] sm:$0xff]   ;;  %v2476_v15 = vrot.slane %v2474_v10, 1 }
  0x98   : > { %1071 = vst.msk [vmem:[#allocation2 + $0x8] sm:$0xff] %vm1069_vm7, %v1048_v53  ;;  %1070 = vst.msk [vmem:[#allocation2] sm:$0xff] %vm1069_vm7, %v4924_v24  ;;  %458 = vrot.lane.b32.xlu0 %v443_v13, %s4664_s21  ;;  %v2032_v24 = vor.u32 %v2031_v20, %v2027_v7  ;;  %v879_v53 = vshll.u32 %v4544_v48, 16  ;;  %v2472_v14 = vor.u32 %v2471_v4, %v2467_v62  ;;  %v893_v7 = vrot.slane %v891_v5, 1  ;;  %v4571_v5 = vld [vmem:[%s4703_s17 + $0x60] sm:$0xff]  }
  0x99   : > { %v1141_v17 = vpop.permute.xlu1 %1140  ;;  %v2479_v20 = vshrl.u32 %v4554_v12, 16 }
  0x9a   : > { %1164 = vst.msk [vmem:[#allocation2 + $0x8] sm:$0xff] %vm1162_vm8, %v1141_v17  ;;  %v1139_v23 = vpop.permute.xlu0 %1138  ;;  %v2037_v34 = vsel %vm347_vm1, %v2032_v24, %v2036_v25  ;;  %v881_v60 = vrot.slane %v879_v53, 1  ;;  %v4552_v17 = vld [vmem:[%s4703_s17 + $0x54] sm:$0xfe]   ;;  %v894_v18 = vor.u32 %v893_v7, %v889_v2  ;;  %v2477_v21 = vsel %vm347_vm1, %v2472_v14, %v2476_v15  ;;  %v4568_v14 = vld [vmem:[%s4703_s17 + $0x9c] sm:$0xff]   ;;  %v4572_v15 = vld [vmem:[%s4703_s17 + $0x6c] sm:$0xff]  }
  0x9b   : > { %1163 = vst.msk [vmem:[#allocation2] sm:$0xff] %vm1162_vm8, %v1139_v23  ;;  %2234 = vrot.lane.b32.xlu1 %v2214_v30, %s4663_s20  ;;  %v1039_v27 = vrot.slane %v4552_v17, 1  ;;  %v2481_v24 = vshll.u32 %v4554_v12, 16  ;;  %v4562_v53 = vld [vmem:[%s4703_s17 + $0x98] ss:$0 sps:$4 sm:$0x11]  }
  0x9c   : > { %2092 = vrot.lane.b32.xlu0 %v2037_v34, %s4664_s21  ;;  %v882_v3 = vor.u32 %v881_v60, %v877_v52  ;;  %v899_v30 = vsel %vm347_vm1, %v894_v18, %v898_v26  ;;  %v4556_v34 = vld [vmem:[%s4703_s17 + $0x84] sm:$0xfe]   ;;  %v4561_v52 = vld [vmem:[%s4703_s17 + $0x90] sm:$0xfe]   ;;  %v4576_v18 = vld [vmem:[%s4703_s17 + $0x3c] sm:$0xff]  }
  0x9d   : > { %v1358_v31 = vpop.permute.xlu1 %1357  ;;  %v1041_v32 = vsel %vm565_vm0, %v1039_v27, %v1040_v28  ;;  %v4577_v26 = vld [vmem:[%s4703_s17 + $0x9c] sm:$0xff]   ;;  %256 = vst.msk [vmem:[#allocation2 + $0x28] sm:$0xff] %vm250_vm2, %v4576_v18 }
  0x9e   : > { %1381 = vst.msk [vmem:[#allocation2 + $0x8] sm:$0xff] %vm1379_vm9, %v1358_v31  ;;  %v1356_v36 = vpop.permute.xlu0 %1355  ;;  %v887_v13 = vsel %vm347_vm1, %v882_v3, %v886_v61  ;;  %v2483_v31 = vrot.slane %v2481_v24, 1  ;;  %v4567_v61 = vld [vmem:[%s4703_s17 + $0x30] sm:$0xff]  }
  0x9f   : > { %1380 = vst.msk [vmem:[#allocation2] sm:$0xff] %vm1379_vm9, %v1356_v36  ;;  %695 = vrot.lane.b32.xlu1 %v4535_v33, %s4661_s18  ;;  %v2486_v33 = vshll.u32 %v4555_v29, 16  ;;  %v4569_v3 = vld [vmem:[%s4703_s17 + $0x90] sm:$0xff]  }
  0xa0   : > { %604 = vrot.lane.b32.xlu0 %v589_v38, %s4663_s20  ;;  %v2484_v37 = vor.u32 %v2483_v31, %v2479_v20  ;;  %v4557_v38 = vld [vmem:[%s4703_s17 + $0x8c] ss:$0 sps:$4 sm:$0x11]   ;;  %255 = vst.msk [vmem:[#allocation2 + $0x20] sm:$0xff] %vm250_vm2, %v4567_v61  ;;  %v2919_v10 = vshrl.u32 %v4569_v3, 16  ;;  %v2921_v11 = vshll.u32 %v4569_v3, 16 }
  0xa1   : > { %v449_v41 = vpop.permute.xlu1 %448  ;;  %v2488_v39 = vrot.slane %v2486_v33, 1  ;;  %v2665_v42 = vrot.slane %v4557_v38, 1  ;;  %v4581_v24 = vld [vmem:[%s4703_s17 + $0x6c] sm:$0xff]   ;;  %v2931_v33 = vshrl.u32 %v4577_v26, 16 }
  0xa2   : > { %471 = vst.msk [vmem:[#allocation2 + $0x10] sm:$0xff] %vm468_vm3, %v449_v41  ;;  %v1501_v46 = vpop.permute.xlu0 %1500  ;;  %v4565_v41 = vld [vmem:[%s4703_s17 + $0x60] sm:$0xff]   ;;  %v2923_v7 = vrot.slane %v2921_v11, 1 }
  0xa3   : > { %1525 = vst.msk [vmem:[#allocation2] sm:$0xff] %vm1524_vm10, %v1501_v46  ;;  %2326 = vrot.lane.b32.xlu1 %v4540_v40, %s4661_s18  ;;  %v2664_v40 = vrot.slane %v4556_v34, 1  ;;  %v2489_v45 = vsel %vm347_vm1, %v2484_v37, %v2488_v39  ;;  %v1332_v54 = vshrl.u32 %v4565_v41, 16  ;;  %v1334_v60 = vshll.u32 %v4565_v41, 16 }
  0xa4   : > { %2236 = vrot.lane.b32.xlu0 %v2217_v47, %s4663_s20 }
  0xa5   : > { %v451_v56 = vpop.permute.xlu1 %450  ;;  %v2666_v46 = vsel %vm565_vm0, %v2664_v40, %v2665_v42  ;;  %v1336_v2 = vrot.slane %v1334_v60, 1  ;;  %v2933_v40 = vshll.u32 %v4577_v26, 16  ;;  %v4578_v42 = vld [vmem:[%s4703_s17 + $0xa4] ss:$0 sps:$4 sm:$0x11]  }
  0xa6   : > { %v1503_v57 = vpop.permute.xlu0 %1502  ;;  %472 = vst.msk [vmem:[#allocation2 + $0x18] sm:$0xff] %vm468_vm3, %v451_v56  ;;  %v2667_v56 = vrot.slane %v4561_v52, 1  ;;  %v4580_v52 = vld [vmem:[%s4703_s17 + $0x98] ss:$0 sps:$4 sm:$0x11]  }
  0xa7   : > { %1526 = vst.msk [vmem:[#allocation2 + $0x8] sm:$0xff] %vm1524_vm10, %v1503_v57  ;;  %912 = vrot.lane.b32.xlu1 %v887_v13, %s4665_s22  ;;  %v2668_v57 = vrot.slane %v4562_v53, 1  ;;  %v4570_v13 = vld [vmem:[%s4703_s17 + $0x98] ss:$0 sps:$4 sm:$0x11]  }
  0xa8   : > { %697 = vrot.lane.b32.xlu0 %v4543_v50, %s4661_s18  ;;  %v1043_v50 = vrot.slane %v4559_v44, 1  ;;  %v2926_v17 = vshll.u32 %v4570_v13, 16  ;;  %v2935_v44 = vrot.slane %v2933_v40, 1  ;;  %v4591_v26 = vld [vmem:[%s4703_s17 + $0x98] ss:$0 sps:$4 sm:$0x11]  }
  0xa9   : > { %v597_v6 = vpop.permute.xlu1 %596  ;;  %v2669_v62 = vsel %vm565_vm0, %v2667_v56, %v2668_v57  ;;  %v3117_v56 = vrot.slane %v4580_v52, 1  ;;  %v4582_v57 = vld [vmem:[%s4703_s17 + $0x6c] sm:$0xfe]   ;;  %v4596_v40 = vld [vmem:[%s4703_s17 + $0x9c] sm:$0xff]  }
  0xaa   : > { %v595_v8 = vpop.permute.xlu0 %594  ;;  %v1533_v9 = vld [vmem:[#allocation2] sm:$0xff]  ;;  %618 = vst.msk [vmem:[#allocation2 + $0x18] sm:$0xff] %vm614_vm4, %v597_v6  ;;  %v1044_v55 = vsel %vm565_vm0, %v1042_v49, %v1043_v50  ;;  %v2928_v27 = vrot.slane %v2926_v17, 1  ;;  %v4579_v49 = vld [vmem:[%s4703_s17 + $0x90] sm:$0xfe]  }
  0xab   : > { %617 = vst.msk [vmem:[#allocation2 + $0x10] sm:$0xff] %vm614_vm4, %v595_v8  ;;  %4350 = vmatprep.mubr.msk.bf16.mxu0 %vm1561_vm12, %v1533_v9  ;;  %2542 = vrot.lane.b32.xlu1 %v2477_v21, %s4665_s22  ;;  %v1337_v9 = vor.u32 %v1336_v2, %v1332_v54  ;;  %v2924_v21 = vor.u32 %v2923_v7, %v2919_v10  ;;  %v4589_v17 = vld [vmem:[%s4703_s17 + $0xa4] ss:$0 sps:$4 sm:$0x11]  }
  0xac   : > { %2328 = vrot.lane.b32.xlu0 %v4547_v0, %s4661_s18  ;;  %v4566_v0 = vld [vmem:[%s4703_s17 + $0x68] ss:$0 sps:$4 sm:$0x11]   ;;  %1894 = vst.msk [vmem:[#allocation2] sm:$0xff] %vm250_vm2, %v4571_v5 }
  0xad   : > { %v690_v22 = vpop.permute.xlu1 %689  ;;  %v1339_v4 = vshll.u32 %v4566_v0, 16  ;;  %v2929_v31 = vsel %vm347_vm1, %v2924_v21, %v2928_v27  ;;  %v4585_v5 = vld [vmem:[%s4703_s17 + $0x98] ss:$0 sps:$4 sm:$0x11]  }
  0xae   : > { %v688_v23 = vpop.permute.xlu0 %687  ;;  %v1534_v25 = vld [vmem:[#allocation2 + $0x8] sm:$0xff]  ;;  %711 = vst.msk [vmem:[#allocation2 + $0x18] sm:$0xff] %vm707_vm5, %v690_v22  ;;  %v4573_v22 = vld [vmem:[%s4703_s17 + $0x74] ss:$0 sps:$4 sm:$0x11]   ;;  %v2046_v10 = vshll.u32 %v4585_v5, 16 }
  0xaf   : > { %710 = vst.msk [vmem:[#allocation2 + $0x10] sm:$0xff] %vm707_vm5, %v688_v23  ;;  %4351 = vmatmul.mubr.msk.bf16.vlgmr.msra.gmra.mrb[0].mxu0 %vm1561_vm12, %v1534_v25  ;;  %1057 = vrot.lane.b32.xlu1 %v1041_v32, %s4662_s19  ;;  %v1341_v12 = vrot.slane %v1339_v4, 1  ;;  %v1344_v23 = vshrl.u32 %v4572_v15, 16  ;;  %v1346_v25 = vshll.u32 %v4572_v15, 16  ;;  %v1351_v29 = vshll.u32 %v4573_v22, 16 }
  0xb0   : > { %914 = vrot.lane.b32.xlu0 %v899_v30, %s4665_s22  ;;  %v4574_v30 = vld [vmem:[%s4703_s17 + $0x60] sm:$0xfe]   ;;  %v4575_v32 = vld [vmem:[%s4703_s17 + $0x68] ss:$0 sps:$4 sm:$0x11]   ;;  %1895 = vst.msk [vmem:[#allocation2 + $0x8] sm:$0xff] %vm250_vm2, %v4581_v24 }
  0xb1   : > { %v907_v35 = vpop.permute.xlu1 %906  ;;  %v1342_v16 = vsel %vm347_vm1, %v1337_v9, %v1341_v12  ;;  %v1348_v28 = vrot.slane %v1346_v25, 1  ;;  %v1353_v37 = vrot.slane %v1351_v29, 1  ;;  %v1494_v38 = vrot.slane %v4574_v30, 1  ;;  %v4587_v12 = vld [vmem:[%s4703_s17 + $0xa4] ss:$0 sps:$4 sm:$0x11]  }
  0xb2   : > { %v905_v36 = vpop.permute.xlu0 %904  ;;  %928 = vst.msk [vmem:[#allocation2 + $0x18] sm:$0xff] %vm924_vm6, %v907_v35  ;;  %v1495_v39 = vrot.slane %v4575_v32, 1  ;;  %v2048_v7 = vrot.slane %v2046_v10, 1  ;;  %v2058_v22 = vshll.u32 %v4589_v17, 16  ;;  %v4590_v25 = vld [vmem:[%s4703_s17 + $0x90] sm:$0xfe]  }
  0xb3   : > { %927 = vst.msk [vmem:[#allocation2 + $0x10] sm:$0xff] %vm924_vm6, %v905_v36  ;;  %2686 = vrot.lane.b32.xlu1 %v2666_v46, %s4662_s19  ;;  %v1349_v36 = vor.u32 %v1348_v28, %v1344_v23  ;;  %v2218_v29 = vrot.slane %v4590_v25, 1  ;;  %v4592_v30 = vld [vmem:[%s4703_s17 + $0x9c] sm:$0xfe]   ;;  %v4602_v5 = vld [vmem:[%s4703_s17 + $0xa8] sm:$0xfe]  }
  0xb4   : > { %2544 = vrot.lane.b32.xlu0 %v2489_v45, %s4665_s22  ;;  %v1496_v43 = vsel %vm565_vm0, %v1494_v38, %v1495_v39  ;;  %v4584_v45 = vld [vmem:[%s4703_s17 + $0x90] sm:$0xff]   ;;  %v2060_v24 = vrot.slane %v2058_v22, 1  ;;  %v4593_v32 = vld [vmem:[%s4703_s17 + $0xa4] ss:$0 sps:$4 sm:$0x11]   ;;  %v4594_v38 = vld [vmem:[%s4703_s17 + $0x9c] sm:$0xff]  }
  0xb5   : > { %v1052_v47 = vpop.permute.xlu1 %1051  ;;  %v1354_v41 = vsel %vm347_vm1, %v1349_v36, %v1353_v37  ;;  %v2039_v53 = vshrl.u32 %v4584_v45, 16  ;;  %v2222_v37 = vrot.slane %v4593_v32, 1  ;;  %v2673_v10 = vrot.slane %v4602_v5, 1  ;;  %v4612_v25 = vld [vmem:[%s4703_s17 + $0xa8] sm:$0xff]  }
  0xb6   : > { %v1050_v48 = vpop.permute.xlu0 %1049  ;;  %1073 = vst.msk [vmem:[#allocation2 + $0x18] sm:$0xff] %vm1069_vm7, %v1052_v47 }
  0xb7   : > { %1072 = vst.msk [vmem:[#allocation2 + $0x10] sm:$0xff] %vm1069_vm7, %v1050_v48  ;;  %1150 = vrot.lane.b32.xlu1 %v4560_v51, %s4666_s23  ;;  %v2938_v48 = vshll.u32 %v4578_v42, 16  ;;  %v2936_v51 = vor.u32 %v2935_v44, %v2931_v33  ;;  %v4595_v42 = vld [vmem:[%s4703_s17 + $0xa8] sm:$0xff]  }
  0xb8   : > { %1059 = vrot.lane.b32.xlu0 %v1044_v55, %s4662_s19  ;;  %v3116_v55 = vrot.slane %v4579_v49, 1  ;;  %v4598_v44 = vld [vmem:[%s4703_s17 + $0xa8] sm:$0xff]   ;;  %v4599_v49 = vld [vmem:[%s4703_s17 + $0xb0] ss:$0 sps:$4 sm:$0x11]  }
  0xb9   : > { %v1145_v58 = vpop.permute.xlu1 %1144  ;;  %v2940_v54 = vrot.slane %v2938_v48, 1 }
  0xba   : > { %v1143_v59 = vpop.permute.xlu0 %1142  ;;  %1166 = vst.msk [vmem:[#allocation2 + $0x18] sm:$0xff] %vm1162_vm8, %v1145_v58  ;;  %v2041_v58 = vshll.u32 %v4584_v45, 16  ;;  %v3118_v0 = vsel %vm565_vm0, %v3116_v55, %v3117_v56  ;;  %v2510_v56 = vshll.u32 %v4599_v49, 16 }
  0xbb   : > { %1165 = vst.msk [vmem:[#allocation2 + $0x10] sm:$0xff] %vm1162_vm8, %v1143_v59  ;;  %2778 = vrot.lane.b32.xlu1 %v4563_v63, %s4666_s23  ;;  %v2941_v59 = vsel %vm347_vm1, %v2936_v51, %v2940_v54  ;;  %v4588_v63 = vld [vmem:[%s4703_s17 + $0x9c] sm:$0xff]   ;;  %v2505_v51 = vshll.u32 %v4598_v44, 16 }
  0xbc   : > { %2688 = vrot.lane.b32.xlu0 %v2669_v62, %s4662_s19  ;;  %v4583_v62 = vld [vmem:[%s4703_s17 + $0x74] ss:$0 sps:$4 sm:$0x11]   ;;  %v2043_v2 = vrot.slane %v2041_v58, 1  ;;  %v2053_v18 = vshll.u32 %v4588_v63, 16 }
  0xbd   : > { %v1362_v6 = vpop.permute.xlu1 %1361  ;;  %v1498_v4 = vrot.slane %v4583_v62, 1  ;;  %v2507_v55 = vrot.slane %v2505_v51, 1  ;;  %v4615_v51 = vld [vmem:[%s4703_s17 + $0xbc] ss:$0 sps:$4 sm:$0x11]  }
  0xbe   : > { %v1360_v8 = vpop.permute.xlu0 %1359  ;;  %1383 = vst.msk [vmem:[#allocation2 + $0x18] sm:$0xff] %vm1379_vm9, %v1362_v6  ;;  %v4586_v6 = vld [vmem:[%s4703_s17 + $0x9c] sm:$0xfe]   ;;  %v2044_v9 = vor.u32 %v2043_v2, %v2039_v53  ;;  %v2055_v21 = vrot.slane %v2053_v18, 1 }
  0xbf   : > { %1382 = vst.msk [vmem:[#allocation2 + $0x10] sm:$0xff] %vm1379_vm9, %v1360_v8  ;;  %1367 = vrot.lane.b32.xlu1 %v1342_v16, %s4667_s24  ;;  %v3119_v13 = vrot.slane %v4586_v6, 1  ;;  %v3120_v16 = vrot.slane %v4587_v12, 1 }
  0xc0   : > { %1152 = vrot.lane.b32.xlu0 %v4564_v1, %s4666_s23  ;;  %v1497_v1 = vrot.slane %v4582_v57, 1 }
  0xc1   : > { %v453_v19 = vpop.permute.xlu1 %452 }
  0xc2   : > { %v1505_v20 = vpop.permute.xlu0 %1504  ;;  %473 = vst.msk [vmem:[#allocation2 + $0x20] sm:$0xff] %vm468_vm3, %v453_v19  ;;  %v1499_v8 = vsel %vm565_vm0, %v1497_v1, %v1498_v4  ;;  %v2049_v19 = vsel %vm347_vm1, %v2044_v9, %v2048_v7 }
  0xc3   : > { %1527 = vst.msk [vmem:[#allocation2 + $0x10] sm:$0xff] %vm1524_vm10, %v1505_v20  ;;  %2994 = vrot.lane.b32.xlu1 %v2929_v31, %s4667_s24  ;;  %v3121_v20 = vsel %vm565_vm0, %v3119_v13, %v3120_v16  ;;  %v2219_v31 = vrot.slane %v4591_v26, 1 }
  0xc4   : > { %2780 = vrot.lane.b32.xlu0 %v4568_v14, %s4666_s23  ;;  %v2051_v14 = vshrl.u32 %v4588_v63, 16  ;;  %v2512_v63 = vrot.slane %v2510_v56, 1  ;;  %v3126_v56 = vrot.slane %v4615_v51, 1 }
  0xc5   : > { %v2087_v34 = vpop.permute.xlu1 %2086  ;;  %v2220_v36 = vsel %vm565_vm0, %v2218_v29, %v2219_v31  ;;  %v4610_v29 = vld [vmem:[%s4703_s17 + $0xa8] sm:$0xfe]  }
  0xc6   : > { %v1507_v35 = vpop.permute.xlu0 %1506  ;;  %2110 = vst.msk [vmem:[#allocation2] sm:$0xff] %vm468_vm3, %v2087_v34  ;;  %v2056_v27 = vor.u32 %v2055_v21, %v2051_v14  ;;  %v2221_v34 = vrot.slane %v4592_v30, 1  ;;  %v4604_v14 = vld [vmem:[%s4703_s17 + $0xa8] sm:$0xff]  }
  0xc7   : > { %1528 = vst.msk [vmem:[#allocation2 + $0x18] sm:$0xff] %vm1524_vm10, %v1507_v35  ;;  %1512 = vrot.lane.b32.xlu1 %v1496_v43, %s4668_s25  ;;  %v4597_v43 = vld [vmem:[%s4703_s17 + $0xa4] ss:$0 sps:$4 sm:$0x11]  }
  0xc8   : > { %1369 = vrot.lane.b32.xlu0 %v1354_v41, %s4667_s24  ;;  %v2061_v33 = vsel %vm347_vm1, %v2056_v27, %v2060_v24  ;;  %v2223_v41 = vsel %vm565_vm0, %v2221_v34, %v2222_v37  ;;  %v2498_v48 = vshll.u32 %v4597_v43, 16  ;;  %v4609_v24 = vld [vmem:[%s4703_s17 + $0xbc] ss:$0 sps:$4 sm:$0x11]   ;;  %v2063_v34 = vshrl.u32 %v4612_v25, 16 }
  0xc9   : > { %v599_v46 = vpop.permute.xlu1 %598  ;;  %v2962_v32 = vshll.u32 %v4609_v24, 16  ;;  %v2065_v37 = vshll.u32 %v4612_v25, 16  ;;  %v4613_v43 = vld [vmem:[%s4703_s17 + $0xb0] ss:$0 sps:$4 sm:$0x11]   ;;  %v4628_v24 = vld [vmem:[%s4703_s17 + $0x48] sm:$0xff]  }
  0xca   : > { %v1535_v47 = vld [vmem:[#allocation2 + $0x10] sm:$0xff]  ;;  %619 = vst.msk [vmem:[#allocation2 + $0x20] sm:$0xff] %vm614_vm4, %v599_v46  ;;  %v455_v50 = vpop.permute.xlu0 %454  ;;  %v2491_v46 = vshrl.u32 %v4596_v40, 16  ;;  %v2500_v54 = vrot.slane %v2498_v48, 1  ;;  %v2070_v49 = vshll.u32 %v4613_v43, 16  ;;  %v4634_v43 = vld [vmem:[%s4703_s17 + $0x78] sm:$0xff]  }
  0xcb   : > { %4354 = vmatprep.mubr.msk.bf16.mxu0 %vm1561_vm12, %v1535_v47  ;;  %474 = vst.msk [vmem:[#allocation2 + $0x28] sm:$0xff] %vm468_vm3, %v455_v50  ;;  %3138 = vrot.lane.b32.xlu1 %v3118_v0, %s4668_s25  ;;  %v2493_v47 = vshll.u32 %v4596_v40, 16  ;;  %v2503_v50 = vshrl.u32 %v4598_v44, 16  ;;  %v4608_v0 = vld [vmem:[%s4703_s17 + $0xb4] sm:$0xff]   ;;  %v2964_v40 = vrot.slane %v2962_v32, 1  ;;  %v2067_v44 = vrot.slane %v2065_v37, 1 }
  0xcc   : > { %2996 = vrot.lane.b32.xlu0 %v2941_v59, %s4667_s24  ;;  %v4600_v59 = vld [vmem:[%s4703_s17 + $0x9c] sm:$0xfe]   ;;  %v2957_v17 = vshll.u32 %v4608_v0, 16  ;;  %v2955_v21 = vshrl.u32 %v4608_v0, 16  ;;  %v4618_v0 = vld [vmem:[%s4703_s17 + $0xa8] sm:$0xfe]  }
  0xcd   : > { %v2231_v60 = vpop.permute.xlu1 %2230  ;;  %v2495_v53 = vrot.slane %v2493_v47, 1  ;;  %v2508_v62 = vor.u32 %v2507_v55, %v2503_v50  ;;  %v2068_v48 = vor.u32 %v2067_v44, %v2063_v34  ;;  %v2224_v5 = vrot.slane %v4618_v0, 1  ;;  %257 = vst.msk [vmem:[#allocation2 + $0x30] sm:$0xff] %vm250_vm2, %v4628_v24  ;;  %1896 = vst.msk [vmem:[#allocation2 + $0x10] sm:$0xff] %vm250_vm2, %v4634_v43 }
  0xce   : > { %v1536_v61 = vld [vmem:[#allocation2 + $0x18] sm:$0xff]  ;;  %2254 = vst.msk [vmem:[#allocation2] sm:$0xff] %vm614_vm4, %v2231_v60  ;;  %v2089_v3 = vpop.permute.xlu0 %2088  ;;  %v4601_v60 = vld [vmem:[%s4703_s17 + $0xa4] ss:$0 sps:$4 sm:$0x11]  }
  0xcf   : > { %4355 = vmatmul.mubr.msk.bf16.gmra.mrb[4].mxu0 %vm1561_vm12, %v1536_v61  ;;  %2111 = vst.msk [vmem:[#allocation2 + $0x8] sm:$0xff] %vm468_vm3, %v2089_v3  ;;  %2094 = vrot.lane.b32.xlu1 %v2049_v19, %s4664_s21  ;;  %v2496_v57 = vor.u32 %v2495_v53, %v2491_v46  ;;  %v4606_v61 = vld [vmem:[%s4703_s17 + $0xa8] sm:$0xff]   ;;  %v2670_v3 = vrot.slane %v4600_v59, 1  ;;  %v2671_v4 = vrot.slane %v4601_v60, 1  ;;  %v2513_v6 = vsel %vm347_vm1, %v2508_v62, %v2512_v63  ;;  %v4605_v19 = vld [vmem:[%s4703_s17 + $0xb4] sm:$0xff]  }
  0xd0   : > { %1514 = vrot.lane.b32.xlu0 %v1499_v8, %s4668_s25  ;;  %v4603_v8 = vld [vmem:[%s4703_s17 + $0xb0] ss:$0 sps:$4 sm:$0x11]   ;;  %v2945_v12 = vshll.u32 %v4606_v61, 16  ;;  %v2943_v7 = vshrl.u32 %v4606_v61, 16 }
  0xd1   : > { %v692_v11 = vpop.permute.xlu1 %691  ;;  %v2501_v1 = vsel %vm347_vm1, %v2496_v57, %v2500_v54  ;;  %v2672_v9 = vsel %vm565_vm0, %v2670_v3, %v2671_v4  ;;  %v2674_v13 = vrot.slane %v4603_v8, 1  ;;  %v4614_v46 = vld [vmem:[%s4703_s17 + $0xb4] sm:$0xfe]   ;;  %v4617_v53 = vld [vmem:[%s4703_s17 + $0xbc] ss:$0 sps:$4 sm:$0x11]  }
  0xd2   : > { %712 = vst.msk [vmem:[#allocation2 + $0x20] sm:$0xff] %vm707_vm5, %v692_v11  ;;  %v601_v15 = vpop.permute.xlu0 %600  ;;  %v2947_v16 = vrot.slane %v2945_v12, 1  ;;  %v2072_v54 = vrot.slane %v2070_v49, 1  ;;  %v2082_v59 = vshll.u32 %v4617_v53, 16  ;;  %v4620_v8 = vld [vmem:[%s4703_s17 + $0xb4] sm:$0xfe]  }
  0xd3   : > { %620 = vst.msk [vmem:[#allocation2 + $0x28] sm:$0xff] %vm614_vm4, %v601_v15  ;;  %2096 = vrot.lane.b32.xlu1 %v2061_v33, %s4664_s21  ;;  %v2675_v18 = vsel %vm565_vm0, %v2673_v10, %v2674_v13  ;;  %v4611_v33 = vld [vmem:[%s4703_s17 + $0xb0] ss:$0 sps:$4 sm:$0x11]   ;;  %v4624_v10 = vld [vmem:[%s4703_s17 + $0xb4] sm:$0xff]   ;;  %v2227_v13 = vrot.slane %v4620_v8, 1 }
  0xd4   : > { %3140 = vrot.lane.b32.xlu0 %v3121_v20, %s4668_s25  ;;  %v4607_v20 = vld [vmem:[%s4703_s17 + $0xb0] ss:$0 sps:$4 sm:$0x11]   ;;  %v2948_v26 = vor.u32 %v2947_v16, %v2943_v7  ;;  %v2073_v60 = vsel %vm347_vm1, %v2068_v48, %v2072_v54  ;;  %v4626_v7 = vld [vmem:[%s4703_s17 + $0xc0] sm:$0xff]   ;;  %v4622_v16 = vld [vmem:[%s4703_s17 + $0xb4] sm:$0xff]  }
  0xd5   : > { %v2323_v23 = vpop.permute.xlu1 %2322  ;;  %v2950_v27 = vshll.u32 %v4607_v20, 16  ;;  %v2527_v20 = vshrl.u32 %v4626_v7, 16  ;;  %v2529_v25 = vshll.u32 %v4626_v7, 16  ;;  %v4633_v49 = vld [vmem:[%s4703_s17 + $0xc8] ss:$0 sps:$4 sm:$0x11]  }
  0xd6   : > { %2346 = vst.msk [vmem:[#allocation2] sm:$0xff] %vm707_vm5, %v2323_v23  ;;  %v2233_v28 = vpop.permute.xlu0 %2232  ;;  %v2959_v23 = vrot.slane %v2957_v17, 1  ;;  %v2515_v17 = vshrl.u32 %v4624_v10, 16  ;;  %v2680_v54 = vrot.slane %v4633_v49, 1 }
  0xd7   : > { %2255 = vst.msk [vmem:[#allocation2 + $0x8] sm:$0xff] %vm614_vm4, %v2233_v28  ;;  %2240 = vrot.lane.b32.xlu1 %v2223_v41, %s4663_s20  ;;  %v2952_v30 = vrot.slane %v2950_v27, 1  ;;  %v3123_v41 = vrot.slane %v4611_v33, 1 }
  0xd8   : > { %2238 = vrot.lane.b32.xlu0 %v2220_v36, %s4663_s20  ;;  %v2960_v31 = vor.u32 %v2959_v23, %v2955_v21  ;;  %v3122_v36 = vrot.slane %v4610_v29, 1  ;;  %v4625_v23 = vld [vmem:[%s4703_s17 + $0xbc] ss:$0 sps:$4 sm:$0x11]  }
  0xd9   : > { %v909_v35 = vpop.permute.xlu1 %908  ;;  %v4627_v29 = vld [vmem:[%s4703_s17 + $0xc8] ss:$0 sps:$4 sm:$0x11]  }
  0xda   : > { %929 = vst.msk [vmem:[#allocation2 + $0x20] sm:$0xff] %vm924_vm6, %v909_v35  ;;  %v694_v39 = vpop.permute.xlu0 %693  ;;  %v3124_v47 = vsel %vm565_vm0, %v3122_v36, %v3123_v41  ;;  %v2534_v36 = vshll.u32 %v4627_v29, 16 }
  0xdb   : > { %713 = vst.msk [vmem:[#allocation2 + $0x28] sm:$0xff] %vm707_vm5, %v694_v39  ;;  %2332 = vrot.lane.b32.xlu1 %v4595_v42, %s4661_s18  ;;  %v2953_v39 = vsel %vm347_vm1, %v2948_v26, %v2952_v30  ;;  %v2531_v30 = vrot.slane %v2529_v25, 1  ;;  %v4646_v25 = vld [vmem:[%s4703_s17 + $0xc8] ss:$0 sps:$4 sm:$0x11]  }
  0xdc   : > { %2330 = vrot.lane.b32.xlu0 %v4594_v38, %s4661_s18  ;;  %v4616_v38 = vld [vmem:[%s4703_s17 + $0xb4] sm:$0xff]  }
  0xdd   : > { %v2539_v45 = vpop.permute.xlu1 %2538  ;;  %v2075_v57 = vshrl.u32 %v4616_v38, 16 }
  0xde   : > { %2562 = vst.msk [vmem:[#allocation2] sm:$0xff] %vm924_vm6, %v2539_v45  ;;  %v2325_v52 = vpop.permute.xlu0 %2324  ;;  %v2965_v45 = vsel %vm347_vm1, %v2960_v31, %v2964_v40  ;;  %v4629_v31 = vld [vmem:[%s5390_s1] sm:$0xff]  }
  0xdf   : > { %2347 = vst.msk [vmem:[#allocation2 + $0x8] sm:$0xff] %vm707_vm5, %v2325_v52  ;;  %2548 = vrot.lane.b32.xlu1 %v2513_v6, %s4665_s22  ;;  %v3125_v52 = vrot.slane %v4614_v46, 1  ;;  %4366 = vmatprep.subr.bf16.mxu1 %v4629_v31 }
  0xe0   : > { %2546 = vrot.lane.b32.xlu0 %v2501_v1, %s4665_s22  ;;  %v4619_v1 = vld [vmem:[%s4703_s17 + $0xb0] ss:$0 sps:$4 sm:$0x11]   ;;  %4367 = vmatpush3.bf16.msra.mxu1 %v4629_v31 }
  0xe1   : > { %v1054_v58 = vpop.permute.xlu1 %1053  ;;  %v3127_v61 = vsel %vm565_vm0, %v3125_v52, %v3126_v56  ;;  %v2225_v6 = vrot.slane %v4619_v1, 1  ;;  %v4640_v1 = vld [vmem:[%s4703_s17 + $0xc0] sm:$0xff]   ;;  %v4647_v31 = vld [vmem:[%s4703_s17 + $0xcc] sm:$0xfe]  }
  0xe2   : > { %1074 = vst.msk [vmem:[#allocation2 + $0x20] sm:$0xff] %vm1069_vm7, %v1054_v58  ;;  %v911_v2 = vpop.permute.xlu0 %910  ;;  %v2077_v58 = vshll.u32 %v4616_v38, 16  ;;  %v4630_v38 = vld [vmem:[%s4703_s17 + $0xb4] sm:$0xfe]  }
  0xe3   : > { %930 = vst.msk [vmem:[#allocation2 + $0x28] sm:$0xff] %vm924_vm6, %v911_v2  ;;  %2692 = vrot.lane.b32.xlu1 %v2675_v18, %s4662_s19  ;;  %v2084_v2 = vrot.slane %v2082_v59, 1  ;;  %v2226_v12 = vsel %vm565_vm0, %v2224_v5, %v2225_v6  ;;  %v4637_v59 = vld [vmem:[%s4703_s17 + $0xcc] sm:$0xff]   ;;  %v2967_v5 = vshrl.u32 %v4640_v1, 16  ;;  %v2969_v6 = vshll.u32 %v4640_v1, 16 }
  0xe4   : > { %2690 = vrot.lane.b32.xlu0 %v2672_v9, %s4662_s19  ;;  %v2079_v62 = vrot.slane %v2077_v58, 1  ;;  %v4621_v9 = vld [vmem:[%s4703_s17 + $0xbc] ss:$0 sps:$4 sm:$0x11]  }
  0xe5   : > { %v2683_v11 = vpop.permute.xlu1 %2682 }
  0xe6   : > { %2706 = vst.msk [vmem:[#allocation2] sm:$0xff] %vm1069_vm7, %v2683_v11  ;;  %v2541_v15 = vpop.permute.xlu0 %2540  ;;  %v2080_v3 = vor.u32 %v2079_v62, %v2075_v57  ;;  %v4636_v57 = vld [vmem:[%s4703_s17 + $0xc0] sm:$0xff]  }
  0xe7   : > { %2563 = vst.msk [vmem:[#allocation2 + $0x8] sm:$0xff] %vm924_vm6, %v2541_v15  ;;  %2784 = vrot.lane.b32.xlu1 %v4605_v19, %s4666_s23  ;;  %v2228_v15 = vrot.slane %v4621_v9, 1  ;;  %v2517_v19 = vshll.u32 %v4624_v10, 16  ;;  %v4643_v9 = vld [vmem:[%s4703_s17 + $0xd4] ss:$0 sps:$4 sm:$0x11]  }
  0xe8   : > { %2782 = vrot.lane.b32.xlu0 %v4604_v14, %s4666_s23  ;;  %v2085_v11 = vsel %vm347_vm1, %v2080_v3, %v2084_v2  ;;  %v4641_v3 = vld [vmem:[%s4703_s17 + $0xc8] ss:$0 sps:$4 sm:$0x11]  }
  0xe9   : > { %v1147_v22 = vpop.permute.xlu1 %1146  ;;  %v2229_v21 = vsel %vm565_vm0, %v2227_v13, %v2228_v15  ;;  %v2519_v27 = vrot.slane %v2517_v19, 1  ;;  %v2974_v8 = vshll.u32 %v4641_v3, 16  ;;  %v4644_v13 = vld [vmem:[%s4703_s17 + $0x84] sm:$0xff]   ;;  %v4649_v19 = vld [vmem:[%s4703_s17 + $0x90] sm:$0xff]  }
  0xea   : > { %1167 = vst.msk [vmem:[#allocation2 + $0x20] sm:$0xff] %vm1162_vm8, %v1147_v22  ;;  %v1056_v28 = vpop.permute.xlu0 %1055  ;;  %v4623_v22 = vld [vmem:[%s4703_s17 + $0xc0] sm:$0xff]  }
  0xeb   : > { %1075 = vst.msk [vmem:[#allocation2 + $0x28] sm:$0xff] %vm1069_vm7, %v1056_v28  ;;  %3000 = vrot.lane.b32.xlu1 %v2965_v45, %s4667_s24  ;;  %v2522_v28 = vshll.u32 %v4625_v23, 16  ;;  %v2520_v33 = vor.u32 %v2519_v27, %v2515_v17  ;;  %v2676_v45 = vrot.slane %v4630_v38, 1  ;;  %v2976_v15 = vrot.slane %v2974_v8, 1 }
  0xec   : > { %2998 = vrot.lane.b32.xlu0 %v2953_v39, %s4667_s24  ;;  %v4631_v39 = vld [vmem:[%s4703_s17 + $0xbc] ss:$0 sps:$4 sm:$0x11]   ;;  %v2986_v17 = vshll.u32 %v4643_v9, 16  ;;  %1897 = vst.msk [vmem:[#allocation2 + $0x18] sm:$0xff] %vm250_vm2, %v4644_v13 }
  0xed   : > { %v2775_v35 = vpop.permute.xlu1 %2774  ;;  %v2524_v34 = vrot.slane %v2522_v28, 1  ;;  %v2677_v46 = vrot.slane %v4631_v39, 1  ;;  %v4650_v28 = vld [vmem:[%s4703_s17 + $0x9c] sm:$0xff]  }
  0xee   : > { %2798 = vst.msk [vmem:[#allocation2] sm:$0xff] %vm1162_vm8, %v2775_v35  ;;  %v2685_v42 = vpop.permute.xlu0 %2684  ;;  %v2532_v35 = vor.u32 %v2531_v30, %v2527_v20  ;;  %v2988_v23 = vrot.slane %v2986_v17, 1  ;;  %v3129_v30 = vrot.slane %v4646_v25, 1 }
  0xef   : > { %2707 = vst.msk [vmem:[#allocation2 + $0x8] sm:$0xff] %vm1069_vm7, %v2685_v42  ;;  %2098 = vrot.lane.b32.xlu1 %v2073_v60, %s4664_s21  ;;  %v2525_v41 = vsel %vm347_vm1, %v2520_v33, %v2524_v34  ;;  %v2536_v42 = vrot.slane %v2534_v36, 1  ;;  %v2678_v51 = vsel %vm565_vm0, %v2676_v45, %v2677_v46  ;;  %v4638_v60 = vld [vmem:[%s4703_s17 + $0x54] sm:$0xff]  }
  0xf0   : > { %3142 = vrot.lane.b32.xlu0 %v3124_v47, %s4668_s25  ;;  %v4632_v47 = vld [vmem:[%s4703_s17 + $0xc0] sm:$0xfe]   ;;  %258 = vst.msk [vmem:[#allocation2 + $0x38] sm:$0xff] %vm250_vm2, %v4638_v60  ;;  %v4651_v60 = vld [vmem:[%s4703_s17 + $0xa8] sm:$0xff]  }
  0xf1   : > { %v1364_v50 = vpop.permute.xlu1 %1363  ;;  %v2537_v48 = vsel %vm347_vm1, %v2532_v35, %v2536_v42  ;;  %v2679_v52 = vrot.slane %v4632_v47, 1  ;;  %v3131_v35 = vrot.slane %v4647_v31, 1 }
  0xf2   : > { %1384 = vst.msk [vmem:[#allocation2 + $0x20] sm:$0xff] %vm1379_vm9, %v1364_v50  ;;  %v1149_v55 = vpop.permute.xlu0 %1148  ;;  %v4635_v50 = vld [vmem:[%s5390_s1 + $0x8] sm:$0xff]  }
  0xf3   : > { %1168 = vst.msk [vmem:[#allocation2 + $0x28] sm:$0xff] %vm1162_vm8, %v1149_v55  ;;  %2100 = vrot.lane.b32.xlu1 %v2085_v11, %s4664_s21  ;;  %4368 = vmatprep.subr.bf16.mxu1 %v4635_v50  ;;  %v2681_v58 = vsel %vm565_vm0, %v2679_v52, %v2680_v54 }
  0xf4   : > { %3144 = vrot.lane.b32.xlu0 %v3127_v61, %s4668_s25  ;;  %4369 = vmatpush3.bf16.msra.mxu1 %v4635_v50  ;;  %v4639_v61 = vld [vmem:[%s5390_s1 + $0x10] ss:$0 sps:$4 sm:$0x33]  }
  0xf5   : > { %v2991_v63 = vpop.permute.xlu1 %2990  ;;  %4389 = vmatprep.subr.msk.bf16.mxu1 %vm1586_vm11, %v4639_v61  ;;  %v3219_v0 = vsel %vm1586_vm11, %v4639_v61, 0 }
  0xf6   : > { %3014 = vst.msk [vmem:[#allocation2] sm:$0xff] %vm1379_vm9, %v2991_v63  ;;  %v2777_v4 = vpop.permute.xlu0 %2776 }
  0xf7   : > { %2799 = vst.msk [vmem:[#allocation2 + $0x8] sm:$0xff] %vm1162_vm8, %v2777_v4  ;;  %2244 = vrot.lane.b32.xlu1 %v2229_v21, %s4663_s20  ;;  %v4642_v4 = vld [vmem:[%s4703_s17 + $0xcc] sm:$0xff]   ;;  %v4645_v21 = vld [vmem:[%s4703_s17 + $0xc0] sm:$0xfe]  }
  0xf8   : > { %2242 = vrot.lane.b32.xlu0 %v2226_v12, %s4663_s20  ;;  %4371 = vmatpush3.bf16.msra.mxu1 %v3219_v0  ;;  %v2979_v10 = vshrl.u32 %v4642_v4, 16  ;;  %v2981_v11 = vshll.u32 %v4642_v4, 16  ;;  %v2971_v12 = vrot.slane %v2969_v6, 1  ;;  %v3128_v27 = vrot.slane %v4645_v21, 1 }
  0xf9   : > { %v1509_v14 = vpop.permute.xlu1 %1508 }
  0xfa   : > { %1529 = vst.msk [vmem:[#allocation2 + $0x20] sm:$0xff] %vm1524_vm10, %v1509_v14  ;;  %v1366_v18 = vpop.permute.xlu0 %1365  ;;  %v2972_v20 = vor.u32 %v2971_v12, %v2967_v5  ;;  %v3130_v34 = vsel %vm565_vm0, %v3128_v27, %v3129_v30 }
  0xfb   : > { %1385 = vst.msk [vmem:[#allocation2 + $0x28] sm:$0xff] %vm1379_vm9, %v1366_v18  ;;  %2336 = vrot.lane.b32.xlu1 %v4623_v22, %s4661_s18 }
  0xfc   : > { %2334 = vrot.lane.b32.xlu0 %v4622_v16, %s4661_s18  ;;  %v2983_v16 = vrot.slane %v2981_v11, 1 }
  0xfd   : > { %v3135_v26 = vpop.permute.xlu1 %3134 }
  0xfe   : > { %3158 = vst.msk [vmem:[#allocation2] sm:$0xff] %vm1524_vm10, %v3135_v26  ;;  %v2993_v32 = vpop.permute.xlu0 %2992  ;;  %v2984_v22 = vor.u32 %v2983_v16, %v2979_v10  ;;  %v2977_v26 = vsel %vm347_vm1, %v2972_v20, %v2976_v15 }
  0xff   : > { %3015 = vst.msk [vmem:[#allocation2 + $0x8] sm:$0xff] %vm1379_vm9, %v2993_v32  ;;  %2552 = vrot.lane.b32.xlu1 %v2537_v48, %s4665_s22  ;;  %v4648_v32 = vld [vmem:[%s4703_s17 + $0xd4] ss:$0 sps:$4 sm:$0x11]  }
 0x100   : > { %2550 = vrot.lane.b32.xlu0 %v2525_v41, %s4665_s22  ;;  %v2989_v29 = vsel %vm347_vm1, %v2984_v22, %v2988_v23  ;;  %v3132_v36 = vrot.slane %v4648_v32, 1 }
 0x101   : > { %v1511_v37 = vpop.permute.xlu1 %1510  ;;  %v1537_v40 = vld [vmem:[#allocation2 + $0x20] sm:$0xff] }
 0x102   : > { %1530 = vst.msk [vmem:[#allocation2 + $0x28] sm:$0xff] %vm1524_vm10, %v1511_v37  ;;  %4358 = vmatprep.mubr.msk.bf16.mxu0 %vm1561_vm12, %v1537_v40  ;;  %v457_v44 = vpop.permute.xlu0 %456  ;;  %v3133_v38 = vsel %vm565_vm0, %v3131_v35, %v3132_v36 }
 0x103   : > { %475 = vst.msk [vmem:[#allocation2 + $0x30] sm:$0xff] %vm468_vm3, %v457_v44  ;;  %2696 = vrot.lane.b32.xlu1 %v2681_v58, %s4662_s19 }
 0x104   : > { %2694 = vrot.lane.b32.xlu0 %v2678_v51, %s4662_s19  ;;  %1898 = vst.msk [vmem:[#allocation2 + $0x20] sm:$0xff] %vm250_vm2, %v4649_v19 }
 0x105   : > { %v3137_v53 = vpop.permute.xlu1 %3136  ;;  %v3166_v55 = vld [vmem:[#allocation2] sm:$0xff] }
 0x106   : > { %3159 = vst.msk [vmem:[#allocation2 + $0x8] sm:$0xff] %vm1524_vm10, %v3137_v53  ;;  %v2091_v56 = vpop.permute.xlu0 %2090  ;;  %4372 = vmatprep.mubr.msk.bf16.mxu1 %vm1561_vm12, %v3166_v55 }
 0x107   : > { %2112 = vst.msk [vmem:[#allocation2 + $0x10] sm:$0xff] %vm468_vm3, %v2091_v56  ;;  %2788 = vrot.lane.b32.xlu1 %v4637_v59, %s4666_s23 }
 0x108   : > { %2786 = vrot.lane.b32.xlu0 %v4636_v57, %s4666_s23 }
 0x109   : > { %v603_v62 = vpop.permute.xlu1 %602  ;;  %v1538_v63 = vld [vmem:[#allocation2 + $0x28] sm:$0xff] }
 0x10a   : > { %621 = vst.msk [vmem:[#allocation2 + $0x30] sm:$0xff] %vm614_vm4, %v603_v62  ;;  %v459_v2 = vpop.permute.xlu0 %458  ;;  %4359 = vmatmul.mubr.msk.bf16.gmra.mrb[8].mxu0 %vm1561_vm12, %v1538_v63 }
 0x10b   : > { %476 = vst.msk [vmem:[#allocation2 + $0x38] sm:$0xff] %vm468_vm3, %v459_v2  ;;  %3004 = vrot.lane.b32.xlu1 %v2989_v29, %s4667_s24  ;;  %v4652_v2 = vld [vmem:[%s4703_s17 + $0xb4] sm:$0xff]   ;;  %s3561_s17 = sshll.u32 %s5394_s13, 1 }
 0x10c   : > { %3002 = vrot.lane.b32.xlu0 %v2977_v26, %s4667_s24  ;;  %1899 = vst.msk [vmem:[#allocation2 + $0x28] sm:$0xff] %vm250_vm2, %v4650_v28  ;;  %s181_s20 = scalar_lea.vmem %s5392_s3, %s3561_s17 }
 0x10d   : > { %v2235_v14 = vpop.permute.xlu1 %2234  ;;  %v3167_v7 = vld [vmem:[#allocation2 + $0x8] sm:$0xff] }
 0x10e   : > { %v2093_v18 = vpop.permute.xlu0 %2092  ;;  %2256 = vst.msk [vmem:[#allocation2 + $0x10] sm:$0xff] %vm614_vm4, %v2235_v14  ;;  %4373 = vmatmul.mubr.msk.bf16.vlgmr.msra.gmra.mrb[0].mxu1 %vm1561_vm12, %v3167_v7 }
 0x10f   : > { %2113 = vst.msk [vmem:[#allocation2 + $0x18] sm:$0xff] %vm468_vm3, %v2093_v18  ;;  %3148 = vrot.lane.b32.xlu1 %v3133_v38, %s4668_s25 }
 0x110   : > { %3146 = vrot.lane.b32.xlu0 %v3130_v34, %s4668_s25 }
 0x111   : > { %v696_v24 = vpop.permute.xlu1 %695 }
 0x112   : > { %v605_v33 = vpop.permute.xlu0 %604  ;;  %714 = vst.msk [vmem:[#allocation2 + $0x30] sm:$0xff] %vm707_vm5, %v696_v24 }
 0x113   : > { %622 = vst.msk [vmem:[#allocation2 + $0x38] sm:$0xff] %vm614_vm4, %v605_v33 }
 0x115   : > { %v2327_v37 = vpop.permute.xlu1 %2326 }
 0x116   : > { %v2237_v39 = vpop.permute.xlu0 %2236  ;;  %2348 = vst.msk [vmem:[#allocation2 + $0x10] sm:$0xff] %vm707_vm5, %v2327_v37 }
 0x117   : > { %2257 = vst.msk [vmem:[#allocation2 + $0x18] sm:$0xff] %vm614_vm4, %v2237_v39 }
 0x119   : > { %v913_v41 = vpop.permute.xlu1 %912 }
 0x11a   : > { %v698_v40 = vpop.permute.xlu0 %697  ;;  %931 = vst.msk [vmem:[#allocation2 + $0x30] sm:$0xff] %vm924_vm6, %v913_v41 }
 0x11b   : > { %715 = vst.msk [vmem:[#allocation2 + $0x38] sm:$0xff] %vm707_vm5, %v698_v40 }
 0x11d   : > { %v2543_v43 = vpop.permute.xlu1 %2542 }
 0x11e   : > { %v2329_v42 = vpop.permute.xlu0 %2328  ;;  %2564 = vst.msk [vmem:[#allocation2 + $0x10] sm:$0xff] %vm924_vm6, %v2543_v43 }
 0x11f   : > { %2349 = vst.msk [vmem:[#allocation2 + $0x18] sm:$0xff] %vm707_vm5, %v2329_v42 }
 0x121   : > { %v1058_v45 = vpop.permute.xlu1 %1057 }
 0x122   : > { %v915_v44 = vpop.permute.xlu0 %914  ;;  %1076 = vst.msk [vmem:[#allocation2 + $0x30] sm:$0xff] %vm1069_vm7, %v1058_v45 }
 0x123   : > { %932 = vst.msk [vmem:[#allocation2 + $0x38] sm:$0xff] %vm924_vm6, %v915_v44 }
 0x125   : > { %v2687_v47 = vpop.permute.xlu1 %2686 }
 0x126   : > { %v2545_v46 = vpop.permute.xlu0 %2544  ;;  %2708 = vst.msk [vmem:[#allocation2 + $0x10] sm:$0xff] %vm1069_vm7, %v2687_v47 }
 0x127   : > { %2565 = vst.msk [vmem:[#allocation2 + $0x18] sm:$0xff] %vm924_vm6, %v2545_v46 }
 0x129   : > { %v1151_v49 = vpop.permute.xlu1 %1150 }
 0x12a   : > { %v1060_v48 = vpop.permute.xlu0 %1059  ;;  %1169 = vst.msk [vmem:[#allocation2 + $0x30] sm:$0xff] %vm1162_vm8, %v1151_v49 }
 0x12b   : > { %1077 = vst.msk [vmem:[#allocation2 + $0x38] sm:$0xff] %vm1069_vm7, %v1060_v48 }
 0x12d   : > { %v2779_v51 = vpop.permute.xlu1 %2778 }
 0x12e   : > { %v2689_v50 = vpop.permute.xlu0 %2688  ;;  %2800 = vst.msk [vmem:[#allocation2 + $0x10] sm:$0xff] %vm1162_vm8, %v2779_v51 }
 0x12f   : > { %2709 = vst.msk [vmem:[#allocation2 + $0x18] sm:$0xff] %vm1069_vm7, %v2689_v50 }
 0x131   : > { %v1368_v53 = vpop.permute.xlu1 %1367 }
 0x132   : > { %v1153_v52 = vpop.permute.xlu0 %1152  ;;  %1386 = vst.msk [vmem:[#allocation2 + $0x30] sm:$0xff] %vm1379_vm9, %v1368_v53 }
 0x133   : > { %1170 = vst.msk [vmem:[#allocation2 + $0x38] sm:$0xff] %vm1162_vm8, %v1153_v52 }
 0x135   : > { %v2995_v55 = vpop.permute.xlu1 %2994 }
 0x136   : > { %v2781_v54 = vpop.permute.xlu0 %2780  ;;  %3016 = vst.msk [vmem:[#allocation2 + $0x10] sm:$0xff] %vm1379_vm9, %v2995_v55 }
 0x137   : > { %2801 = vst.msk [vmem:[#allocation2 + $0x18] sm:$0xff] %vm1162_vm8, %v2781_v54 }
 0x139   : > { %v1513_v57 = vpop.permute.xlu1 %1512 }
 0x13a   : > { %v1370_v56 = vpop.permute.xlu0 %1369  ;;  %1531 = vst.msk [vmem:[#allocation2 + $0x30] sm:$0xff] %vm1524_vm10, %v1513_v57 }
 0x13b   : > { %1387 = vst.msk [vmem:[#allocation2 + $0x38] sm:$0xff] %vm1379_vm9, %v1370_v56 }
 0x13d   : > { %v3139_v59 = vpop.permute.xlu1 %3138 }
 0x13e   : > { %v2997_v58 = vpop.permute.xlu0 %2996  ;;  %3160 = vst.msk [vmem:[#allocation2 + $0x10] sm:$0xff] %vm1524_vm10, %v3139_v59 }
 0x13f   : > { %3017 = vst.msk [vmem:[#allocation2 + $0x18] sm:$0xff] %vm1379_vm9, %v2997_v58 }
 0x141   : > { %v1539_v62 = vld [vmem:[#allocation2 + $0x30] sm:$0xff]  ;;  %v2095_v63 = vpop.permute.xlu1 %2094 }
 0x142   : > { %v1515_v61 = vpop.permute.xlu0 %1514  ;;  %4362 = vmatprep.mubr.msk.bf16.mxu0 %vm1561_vm12, %v1539_v62  ;;  %1900 = vst.msk [vmem:[#allocation2 + $0x30] sm:$0xff] %vm250_vm2, %v4651_v60 }
 0x143   : > { %1532 = vst.msk [vmem:[#allocation2 + $0x38] sm:$0xff] %vm1524_vm10, %v1515_v61 }
 0x144   : > { %2114 = vst.msk [vmem:[#allocation2 + $0x20] sm:$0xff] %vm468_vm3, %v2095_v63 }
 0x145   : > { %v3168_v1 = vld [vmem:[#allocation2 + $0x10] sm:$0xff]  ;;  %v2097_v3 = vpop.permute.xlu1 %2096 }
 0x146   : > { %v3141_v0 = vpop.permute.xlu0 %3140  ;;  %4376 = vmatprep.mubr.msk.bf16.mxu1 %vm1561_vm12, %v3168_v1  ;;  %2115 = vst.msk [vmem:[#allocation2 + $0x28] sm:$0xff] %vm468_vm3, %v2097_v3 }
 0x147   : > { %3161 = vst.msk [vmem:[#allocation2 + $0x18] sm:$0xff] %vm1524_vm10, %v3141_v0 }
 0x149   : > { %v2241_v6 = vpop.permute.xlu1 %2240 }
 0x14a   : > { %v1540_v4 = vld [vmem:[#allocation2 + $0x38] sm:$0xff]  ;;  %v2239_v5 = vpop.permute.xlu0 %2238  ;;  %2259 = vst.msk [vmem:[#allocation2 + $0x28] sm:$0xff] %vm614_vm4, %v2241_v6 }
 0x14b   : > { %4363 = vmatmul.mubr.msk.bf16.gmra.mrb[12].mxu0 %vm1561_vm12, %v1540_v4  ;;  %1901 = vst.msk [vmem:[#allocation2 + $0x38] sm:$0xff] %vm250_vm2, %v4652_v2 }
 0x14c   : > { %2258 = vst.msk [vmem:[#allocation2 + $0x20] sm:$0xff] %vm614_vm4, %v2239_v5 }
 0x14d   : > { %v2333_v10 = vpop.permute.xlu1 %2332 }
 0x14e   : > { %v3169_v8 = vld [vmem:[#allocation2 + $0x18] sm:$0xff]  ;;  %v2331_v9 = vpop.permute.xlu0 %2330  ;;  %2351 = vst.msk [vmem:[#allocation2 + $0x28] sm:$0xff] %vm707_vm5, %v2333_v10 }
 0x14f   : > { %4377 = vmatmul.mubr.msk.bf16.gmra.mrb[4].mxu1 %vm1561_vm12, %v3169_v8  ;;  %2350 = vst.msk [vmem:[#allocation2 + $0x20] sm:$0xff] %vm707_vm5, %v2331_v9 }
 0x151   : > { %v2549_v12 = vpop.permute.xlu1 %2548 }
 0x152   : > { %v2547_v11 = vpop.permute.xlu0 %2546  ;;  %2567 = vst.msk [vmem:[#allocation2 + $0x28] sm:$0xff] %vm924_vm6, %v2549_v12 }
 0x153   : > { %2566 = vst.msk [vmem:[#allocation2 + $0x20] sm:$0xff] %vm924_vm6, %v2547_v11 }
 0x155   : > { %v2693_v14 = vpop.permute.xlu1 %2692 }
 0x156   : > { %v2691_v13 = vpop.permute.xlu0 %2690  ;;  %2711 = vst.msk [vmem:[#allocation2 + $0x28] sm:$0xff] %vm1069_vm7, %v2693_v14 }
 0x157   : > { %2710 = vst.msk [vmem:[#allocation2 + $0x20] sm:$0xff] %vm1069_vm7, %v2691_v13 }
 0x159   : > { %v2785_v15 = vpop.permute.xlu1 %2784 }
 0x15a   : > { %v2783_v7 = vpop.permute.xlu0 %2782  ;;  %2803 = vst.msk [vmem:[#allocation2 + $0x28] sm:$0xff] %vm1162_vm8, %v2785_v15 }
 0x15b   : > { %2802 = vst.msk [vmem:[#allocation2 + $0x20] sm:$0xff] %vm1162_vm8, %v2783_v7 }
 0x15d   : > { %v3001_v17 = vpop.permute.xlu1 %3000 }
 0x15e   : > { %v2999_v16 = vpop.permute.xlu0 %2998  ;;  %3019 = vst.msk [vmem:[#allocation2 + $0x28] sm:$0xff] %vm1379_vm9, %v3001_v17 }
 0x15f   : > { %3018 = vst.msk [vmem:[#allocation2 + $0x20] sm:$0xff] %vm1379_vm9, %v2999_v16 }
 0x161   : > { %v2099_v19 = vpop.permute.xlu1 %2098 }
 0x162   : > { %v3143_v18 = vpop.permute.xlu0 %3142  ;;  %2116 = vst.msk [vmem:[#allocation2 + $0x30] sm:$0xff] %vm468_vm3, %v2099_v19 }
 0x163   : > { %3162 = vst.msk [vmem:[#allocation2 + $0x20] sm:$0xff] %vm1524_vm10, %v3143_v18 }
 0x165   : > { %v2101_v21 = vpop.permute.xlu1 %2100 }
 0x166   : > { %v3145_v20 = vpop.permute.xlu0 %3144  ;;  %2117 = vst.msk [vmem:[#allocation2 + $0x38] sm:$0xff] %vm468_vm3, %v2101_v21 }
 0x167   : > { %3163 = vst.msk [vmem:[#allocation2 + $0x28] sm:$0xff] %vm1524_vm10, %v3145_v20 }
 0x169   : > { %v2245_v25 = vpop.permute.xlu1 %2244 }
 0x16a   : > { %v2243_v22 = vpop.permute.xlu0 %2242  ;;  %v3170_v23 = vld [vmem:[#allocation2 + $0x20] sm:$0xff]  ;;  %2261 = vst.msk [vmem:[#allocation2 + $0x38] sm:$0xff] %vm614_vm4, %v2245_v25 }
 0x16b   : > { %2260 = vst.msk [vmem:[#allocation2 + $0x30] sm:$0xff] %vm614_vm4, %v2243_v22  ;;  %4380 = vmatprep.mubr.msk.bf16.mxu1 %vm1561_vm12, %v3170_v23 }
 0x16d   : > { %v2337_v24 = vpop.permute.xlu1 %2336 }
 0x16e   : > { %v2335_v26 = vpop.permute.xlu0 %2334  ;;  %v3171_v27 = vld [vmem:[#allocation2 + $0x28] sm:$0xff]  ;;  %2353 = vst.msk [vmem:[#allocation2 + $0x38] sm:$0xff] %vm707_vm5, %v2337_v24 }
 0x16f   : > { %2352 = vst.msk [vmem:[#allocation2 + $0x30] sm:$0xff] %vm707_vm5, %v2335_v26  ;;  %4381 = vmatmul.mubr.msk.bf16.gmra.mrb[8].mxu1 %vm1561_vm12, %v3171_v27 }
 0x171   : > { %v2553_v29 = vpop.permute.xlu1 %2552 }
 0x172   : > { %v2551_v28 = vpop.permute.xlu0 %2550  ;;  %2569 = vst.msk [vmem:[#allocation2 + $0x38] sm:$0xff] %vm924_vm6, %v2553_v29 }
 0x173   : > { %2568 = vst.msk [vmem:[#allocation2 + $0x30] sm:$0xff] %vm924_vm6, %v2551_v28 }
 0x175   : > { %v2697_v31 = vpop.permute.xlu1 %2696 }
 0x176   : > { %v2695_v30 = vpop.permute.xlu0 %2694  ;;  %2713 = vst.msk [vmem:[#allocation2 + $0x38] sm:$0xff] %vm1069_vm7, %v2697_v31 }
 0x177   : > { %2712 = vst.msk [vmem:[#allocation2 + $0x30] sm:$0xff] %vm1069_vm7, %v2695_v30 }
 0x179   : > { %v2789_v33 = vpop.permute.xlu1 %2788 }
 0x17a   : > { %v2787_v32 = vpop.permute.xlu0 %2786  ;;  %2805 = vst.msk [vmem:[#allocation2 + $0x38] sm:$0xff] %vm1162_vm8, %v2789_v33 }
 0x17b   : > { %2804 = vst.msk [vmem:[#allocation2 + $0x30] sm:$0xff] %vm1162_vm8, %v2787_v32 }
 0x17d   : > { %v3005_v44 = vpop.permute.xlu1 %3004 }
 0x17e   : > { %v3003_v39 = vpop.permute.xlu0 %3002  ;;  %3021 = vst.msk [vmem:[#allocation2 + $0x38] sm:$0xff] %vm1379_vm9, %v3005_v44 }
 0x17f   : > { %3020 = vst.msk [vmem:[#allocation2 + $0x30] sm:$0xff] %vm1379_vm9, %v3003_v39 }
 0x181   : > { %v3149_v52 = vpop.permute.xlu1 %3148 }
 0x182   : > { %v4352_v34 = vpop.f32.mrb[0].mxu0  ;;  %v3147_v48 = vpop.permute.xlu0 %3146  ;;  %3165 = vst.msk [vmem:[#allocation2 + $0x38] sm:$0xff] %vm1524_vm10, %v3149_v52 }
 0x183   : > { %v1624_v35 = vpop.f32.mrb[1].mxu0  ;;  %v1791_v45 = vmul.f32 %v4352_v34, %v4352_v34  ;;  %3164 = vst.msk [vmem:[#allocation2 + $0x30] sm:$0xff] %vm1524_vm10, %v3147_v48 }
 0x184   : > { %v4353_v36 = vpop.f32.mrb[2].mxu0  ;;  %v1789_v40 = vmul.f32 %v1624_v35, %v1624_v35 }
 0x185   : > { %v4235_v37 = vpack.c.bf16 %v4353_v36, %v4352_v34  ;;  %v1627_v38 = vpop.f32.mrb[3].mxu0  ;;  %v1792_v49 = vmul.f32 %v4353_v36, %v4353_v36 }
 0x186   : > { %v4230_v41 = vpack.c.bf16 %v1627_v38, %v1624_v35  ;;  %v1767_v42 = vadd.f32 %v1627_v38, %v1624_v35  ;;  %v1790_v43 = vmul.f32 %v1627_v38, %v1627_v38 }
 0x187   : > { %4307 = vst [vmem:[%s5358_s16 + $0x8] sm:$0xff] %v4235_v37  }
 0x188   : > { %4231 = vst [vmem:[%s5358_s16] sm:$0xff] %v4230_v41   ;;  %v1768_v46 = vadd.f32 %v4352_v34, %v1767_v42  ;;  %v1805_v47 = vadd.f32 %v1790_v43, %v1789_v40 }
 0x189   : > { %v3173_v55 = vld [vmem:[#allocation2 + $0x38] sm:$0xff] }
 0x18a   : > { %v1806_v50 = vadd.f32 %v1805_v47, %v1791_v45  ;;  %v1769_v51 = vadd.f32 %v4353_v36, %v1768_v46  ;;  %v3172_v54 = vld [vmem:[#allocation2 + $0x30] sm:$0xff] }
 0x18b   : > { %4384 = vmatprep.mubr.msk.bf16.mxu1 %vm1561_vm12, %v3172_v54 }
 0x18c   : > { %v1807_v53 = vadd.f32 %v1806_v50, %v1792_v49  ;;  %4385 = vmatmul.mubr.msk.bf16.gmra.mrb[12].mxu1 %vm1561_vm12, %v3173_v55 }
 0x1a2   : > { %v4356_v56 = vpop.f32.mrb[4].mxu0 }
 0x1a3   : > { %v1640_v57 = vpop.f32.mrb[5].mxu0  ;;  %v1795_v3 = vmul.f32 %v4356_v56, %v4356_v56 }
 0x1a4   : > { %v1770_v58 = vadd.f32 %v1769_v51, %v1640_v57  ;;  %v1793_v59 = vmul.f32 %v1640_v57, %v1640_v57  ;;  %v4357_v60 = vpop.f32.mrb[6].mxu0 }
 0x1a5   : > { %v4245_v61 = vpack.c.bf16 %v4357_v60, %v4356_v56  ;;  %v1643_v62 = vpop.f32.mrb[7].mxu0  ;;  %v1796_v6 = vmul.f32 %v4357_v60, %v4357_v60 }
 0x1a6   : > { %v1808_v63 = vadd.f32 %v1807_v53, %v1793_v59  ;;  %v4240_v0 = vpack.c.bf16 %v1643_v62, %v1640_v57  ;;  %v1771_v1 = vadd.f32 %v1770_v58, %v1643_v62  ;;  %v1794_v2 = vmul.f32 %v1643_v62, %v1643_v62 }
 0x1a7   : > { %4309 = vst [vmem:[%s5358_s16 + $0x18] sm:$0xff] %v4245_v61  }
 0x1a8   : > { %4308 = vst [vmem:[%s5358_s16 + $0x10] sm:$0xff] %v4240_v0   ;;  %v1772_v4 = vadd.f32 %v4356_v56, %v1771_v1  ;;  %v1809_v5 = vadd.f32 %v1808_v63, %v1794_v2 }
 0x1aa   : > { %v1810_v8 = vadd.f32 %v1809_v5, %v1795_v3  ;;  %v1773_v9 = vadd.f32 %v4357_v60, %v1772_v4 }
 0x1ac   : > { %v1811_v10 = vadd.f32 %v1810_v8, %v1796_v6 }
 0x1dd   : > { %v4360_v11 = vpop.f32.mrb[8].mxu0 }
 0x1de   : > { %v1656_v12 = vpop.f32.mrb[9].mxu0  ;;  %v1799_v23 = vmul.f32 %v4360_v11, %v4360_v11 }
 0x1df   : > { %v1774_v13 = vadd.f32 %v1773_v9, %v1656_v12  ;;  %v1797_v14 = vmul.f32 %v1656_v12, %v1656_v12  ;;  %v4361_v7 = vpop.f32.mrb[10].mxu0 }
 0x1e0   : > { %v4255_v15 = vpack.c.bf16 %v4361_v7, %v4360_v11  ;;  %v1659_v16 = vpop.f32.mrb[11].mxu0  ;;  %v1800_v24 = vmul.f32 %v4361_v7, %v4361_v7 }
 0x1e1   : > { %v1812_v17 = vadd.f32 %v1811_v10, %v1797_v14  ;;  %v4250_v18 = vpack.c.bf16 %v1659_v16, %v1656_v12  ;;  %v1775_v19 = vadd.f32 %v1774_v13, %v1659_v16  ;;  %v1798_v20 = vmul.f32 %v1659_v16, %v1659_v16  ;;  %v4374_v21 = vpop.f32.mrb[0].mxu1 }
 0x1e2   : > { %4311 = vst [vmem:[%s5358_s16 + $0x28] sm:$0xff] %v4255_v15   ;;  %v3255_v22 = vpop.f32.mrb[1].mxu1  ;;  %v3423_v36 = vmul.f32 %v4374_v21, %v4374_v21 }
 0x1e3   : > { %4310 = vst [vmem:[%s5358_s16 + $0x20] sm:$0xff] %v4250_v18   ;;  %v1776_v25 = vadd.f32 %v4360_v11, %v1775_v19  ;;  %v1813_v26 = vadd.f32 %v1812_v17, %v1798_v20  ;;  %v4375_v27 = vpop.f32.mrb[2].mxu1  ;;  %v3421_v28 = vmul.f32 %v3255_v22, %v3255_v22 }
 0x1e4   : > { %v4275_v29 = vpack.c.bf16 %v4375_v27, %v4374_v21  ;;  %v3258_v30 = vpop.f32.mrb[3].mxu1  ;;  %v3424_v40 = vmul.f32 %v4375_v27, %v4375_v27 }
 0x1e5   : > { %v1814_v31 = vadd.f32 %v1813_v26, %v1799_v23  ;;  %v4270_v32 = vpack.c.bf16 %v3258_v30, %v3255_v22  ;;  %v3399_v33 = vadd.f32 %v3258_v30, %v3255_v22  ;;  %v3422_v34 = vmul.f32 %v3258_v30, %v3258_v30 }
 0x1e6   : > { %4315 = vst [vmem:[%s5358_s16 + $0x48] sm:$0xff] %v4275_v29   ;;  %v1777_v35 = vadd.f32 %v4361_v7, %v1776_v25 }
 0x1e7   : > { %4314 = vst [vmem:[%s5358_s16 + $0x40] sm:$0xff] %v4270_v32   ;;  %v3400_v37 = vadd.f32 %v4374_v21, %v3399_v33  ;;  %v3437_v38 = vadd.f32 %v3422_v34, %v3421_v28  ;;  %v1815_v39 = vadd.f32 %v1814_v31, %v1800_v24 }
 0x1e9   : > { %v3438_v41 = vadd.f32 %v3437_v38, %v3423_v36  ;;  %v3401_v42 = vadd.f32 %v4375_v27, %v3400_v37 }
 0x1eb   : > { %v3439_v43 = vadd.f32 %v3438_v41, %v3424_v40 }
 0x21e   : > { %v4364_v44 = vpop.f32.mrb[12].mxu0 }
 0x21f   : > { %v1672_v45 = vpop.f32.mrb[13].mxu0  ;;  %v1803_v56 = vmul.f32 %v4364_v44, %v4364_v44 }
 0x220   : > { %v1778_v46 = vadd.f32 %v1777_v35, %v1672_v45  ;;  %v1801_v47 = vmul.f32 %v1672_v45, %v1672_v45  ;;  %v4365_v48 = vpop.f32.mrb[14].mxu0 }
 0x221   : > { %v4265_v49 = vpack.c.bf16 %v4365_v48, %v4364_v44  ;;  %v1675_v50 = vpop.f32.mrb[15].mxu0  ;;  %v1804_v63 = vmul.f32 %v4365_v48, %v4365_v48 }
 0x222   : > { %v1816_v51 = vadd.f32 %v1815_v39, %v1801_v47  ;;  %v4260_v52 = vpack.c.bf16 %v1675_v50, %v1672_v45  ;;  %v1779_v53 = vadd.f32 %v1778_v46, %v1675_v50  ;;  %v1802_v54 = vmul.f32 %v1675_v50, %v1675_v50  ;;  %v4378_v55 = vpop.f32.mrb[4].mxu1 }
 0x223   : > { %4313 = vst [vmem:[%s5358_s16 + $0x38] sm:$0xff] %v4265_v49   ;;  %v3271_v57 = vpop.f32.mrb[5].mxu1  ;;  %v3427_v10 = vmul.f32 %v4378_v55, %v4378_v55 }
 0x224   : > { %4312 = vst [vmem:[%s5358_s16 + $0x30] sm:$0xff] %v4260_v52   ;;  %v1780_v58 = vadd.f32 %v4364_v44, %v1779_v53  ;;  %v1817_v59 = vadd.f32 %v1816_v51, %v1802_v54  ;;  %v3402_v60 = vadd.f32 %v3401_v42, %v3271_v57  ;;  %v3425_v61 = vmul.f32 %v3271_v57, %v3271_v57  ;;  %v4379_v62 = vpop.f32.mrb[6].mxu1 }
 0x225   : > { %v4285_v0 = vpack.c.bf16 %v4379_v62, %v4378_v55  ;;  %v3274_v1 = vpop.f32.mrb[7].mxu1  ;;  %v3428_v13 = vmul.f32 %v4379_v62, %v4379_v62 }
 0x226   : > { %v1781_v2 = vadd.f32 %v4365_v48, %v1780_v58  ;;  %v1818_v3 = vadd.f32 %v1817_v59, %v1803_v56  ;;  %v3440_v4 = vadd.f32 %v3439_v43, %v3425_v61  ;;  %v4280_v5 = vpack.c.bf16 %v3274_v1, %v3271_v57 }
 0x227   : > { %4317 = vst [vmem:[%s5358_s16 + $0x58] sm:$0xff] %v4285_v0   ;;  %v3403_v6 = vadd.f32 %v3402_v60, %v3274_v1  ;;  %v3426_v8 = vmul.f32 %v3274_v1, %v3274_v1 }
 0x228   : > { %v1819_v9 = vadd.f32 %v1818_v3, %v1804_v63  ;;  %4316 = vst [vmem:[%s5358_s16 + $0x50] sm:$0xff] %v4280_v5   ;;  %v1782_v34 = vrot.slane %v1781_v2, 4 }
 0x229   : > { %v3404_v11 = vadd.f32 %v4378_v55, %v3403_v6  ;;  %v3441_v12 = vadd.f32 %v3440_v4, %v3426_v8 }
 0x22a   : > { %v1820_v37 = vrot.slane %v1819_v9, 4  ;;  %v1783_v41 = vadd.f32 %v1782_v34, %v1781_v2 }
 0x22b   : > { %v3442_v14 = vadd.f32 %v3441_v12, %v3427_v10  ;;  %v3405_v7 = vadd.f32 %v4379_v62, %v3404_v11 }
 0x22c   : > { %v1821_v48 = vadd.f32 %v1820_v37, %v1819_v9  ;;  %v1784_v52 = vrot.slane %v1783_v41, 2 }
 0x22d   : > { %v3443_v15 = vadd.f32 %v3442_v14, %v3428_v13 }
 0x22e   : > { %v1822_v56 = vrot.slane %v1821_v48, 2  ;;  %v1785_v59 = vadd.f32 %v1784_v52, %v1783_v41 }
 0x230   : > { %v1823_v62 = vadd.f32 %v1822_v56, %v1821_v48  ;;  %v1786_v1 = vrot.slane %v1785_v59, 1 }
 0x232   : > { %v1824_v4 = vrot.slane %v1823_v62, 1  ;;  %v1787_v8 = vadd.f32 %v1786_v1, %v1785_v59 }
 0x234   : > { %v1825_v11 = vadd.f32 %v1824_v4, %v1823_v62 }
 0x242   : > { %v4382_v16 = vpop.f32.mrb[8].mxu1 }
 0x243   : > { %v3287_v17 = vpop.f32.mrb[9].mxu1  ;;  %v3431_v24 = vmul.f32 %v4382_v16, %v4382_v16 }
 0x244   : > { %v3406_v18 = vadd.f32 %v3405_v7, %v3287_v17  ;;  %v3429_v19 = vmul.f32 %v3287_v17, %v3287_v17  ;;  %v4383_v20 = vpop.f32.mrb[10].mxu1 }
 0x245   : > { %v4295_v21 = vpack.c.bf16 %v4383_v20, %v4382_v16  ;;  %v3290_v22 = vpop.f32.mrb[11].mxu1  ;;  %v3432_v30 = vmul.f32 %v4383_v20, %v4383_v20 }
 0x246   : > { %v3444_v23 = vadd.f32 %v3443_v15, %v3429_v19  ;;  %v4290_v25 = vpack.c.bf16 %v3290_v22, %v3287_v17  ;;  %v3407_v26 = vadd.f32 %v3406_v18, %v3290_v22  ;;  %v3430_v27 = vmul.f32 %v3290_v22, %v3290_v22 }
 0x247   : > { %4319 = vst [vmem:[%s5358_s16 + $0x68] sm:$0xff] %v4295_v21  }
 0x248   : > { %4318 = vst [vmem:[%s5358_s16 + $0x60] sm:$0xff] %v4290_v25   ;;  %v3408_v28 = vadd.f32 %v4382_v16, %v3407_v26  ;;  %v3445_v29 = vadd.f32 %v3444_v23, %v3430_v27 }
 0x24a   : > { %v3446_v31 = vadd.f32 %v3445_v29, %v3431_v24  ;;  %v3409_v32 = vadd.f32 %v4383_v20, %v3408_v28 }
 0x24c   : > { %v3447_v33 = vadd.f32 %v3446_v31, %v3432_v30 }
 0x25f   : > { %v4386_v35 = vpop.f32.mrb[12].mxu1 }
 0x260   : > { %v3303_v36 = vpop.f32.mrb[13].mxu1  ;;  %v3435_v49 = vmul.f32 %v4386_v35, %v4386_v35 }
 0x261   : > { %v3410_v38 = vadd.f32 %v3409_v32, %v3303_v36  ;;  %v3433_v39 = vmul.f32 %v3303_v36, %v3303_v36  ;;  %v4387_v40 = vpop.f32.mrb[14].mxu1 }
 0x262   : > { %v4305_v42 = vpack.c.bf16 %v4387_v40, %v4386_v35  ;;  %v3306_v43 = vpop.f32.mrb[15].mxu1  ;;  %v3436_v53 = vmul.f32 %v4387_v40, %v4387_v40 }
 0x263   : > { %v3448_v44 = vadd.f32 %v3447_v33, %v3433_v39  ;;  %v4300_v45 = vpack.c.bf16 %v3306_v43, %v3303_v36  ;;  %v3411_v46 = vadd.f32 %v3410_v38, %v3306_v43  ;;  %v3434_v47 = vmul.f32 %v3306_v43, %v3306_v43 }
 0x264   : > { %4321 = vst [vmem:[%s5358_s16 + $0x78] sm:$0xff] %v4305_v42  }
 0x265   : > { %4320 = vst [vmem:[%s5358_s16 + $0x70] sm:$0xff] %v4300_v45   ;;  %v3412_v50 = vadd.f32 %v4386_v35, %v3411_v46  ;;  %v3449_v51 = vadd.f32 %v3448_v44, %v3434_v47 }
 0x267   : > { %v3413_v54 = vadd.f32 %v4387_v40, %v3412_v50  ;;  %v3450_v55 = vadd.f32 %v3449_v51, %v3435_v49 }
 0x269   : > { %v3414_v57 = vrot.slane %v3413_v54, 4  ;;  %v3451_v58 = vadd.f32 %v3450_v55, %v3436_v53 }
 0x26b   : > { %v3415_v60 = vadd.f32 %v3414_v57, %v3413_v54  ;;  %v3452_v61 = vrot.slane %v3451_v58, 4 }
 0x26d   : > { %v3416_v63 = vrot.slane %v3415_v60, 2  ;;  %v3453_v0 = vadd.f32 %v3452_v61, %v3451_v58 }
 0x26f   : > { %v3417_v2 = vadd.f32 %v3416_v63, %v3415_v60  ;;  %v3454_v3 = vrot.slane %v3453_v0, 2 }
 0x271   : > { %v3418_v5 = vrot.slane %v3417_v2, 1  ;;  %v3455_v6 = vadd.f32 %v3454_v3, %v3453_v0 }
 0x273   : > { %v3419_v9 = vadd.f32 %v3418_v5, %v3417_v2  ;;  %v3456_v10 = vrot.slane %v3455_v6, 1 }
 0x275   : > { %v3420_v12 = vadd.f32 %v3419_v9, %v1787_v8  ;;  %v3457_v13 = vadd.f32 %v3456_v10, %v3455_v6 }
 0x277   : > { %v3458_v14 = vadd.f32 %v3457_v13, %v1825_v11 }
 0x279   : > { %v3460_v7 = vsel %vm3459_vm13, %v3420_v12, %v3458_v14 }
 0x27a   : > { %3461 = vst [vmem:[%s181_s20] sm:$0x3] %v3460_v7 }
 0x27b PF: > { %s14_s12 = sadd.s32 1, %s4659_s12  }
 0x27c   : > { %p11_p4 = scmp.ge.s32.totalorder %s14_s12, 4  }
 0x27e   :  { %13 = sbr.rel (!%p11_p4) target bundleno = 1 (0x1), region = 77 }

</bundles_post_ra>
